<compile_context>
chip_gen: v6e
topology: v6e:2x2x1
jax: 0.10.0
libtpu: 0.0.40
codegen_flags: <defaults>
</compile_context>

<pallas_src>
import functools

import numpy as np
import jax
import jax.numpy as jnp
from jax import lax
from jax.experimental import pallas as pl
from jax.experimental.pallas import tpu as pltpu

_BN_EPS = 1e-5
_NEG_SLOPE = 0.1        # FWINET's EncoderBlock / UpsampleingBlock default

_VMEM = pl.BlockSpec(memory_space=pltpu.MemorySpace.VMEM)


# ---------------------------------------------------------------------------
# In-kernel building blocks (operate on lane-packed (H, C*W) values).
# ---------------------------------------------------------------------------
def _conv3x3_packed(x, m_ref):
    """3x3 / stride 1 / 'same' conv.  x: (H, Cin*W).  m_ref: (3, Cin*W, Cout*W)
    with horizontal taps + channel mixing folded in; vertical shift here."""
    zero = jnp.zeros_like(x[:1])
    t_up = jnp.concatenate([zero, x[:-1]], axis=0)        # in[y-1], row 0 = 0
    t_dn = jnp.concatenate([x[1:], zero], axis=0)         # in[y+1], last row = 0
    return (jnp.dot(t_up, m_ref[0], preferred_element_type=jnp.float32) +
            jnp.dot(x,    m_ref[1], preferred_element_type=jnp.float32) +
            jnp.dot(t_dn, m_ref[2], preferred_element_type=jnp.float32))


def _bn_leaky_packed(y, aff, bs_ref, inv_n):
    """Conv-bias + training-mode BatchNorm2d (batch=1, biased var) + LeakyReLU.
    aff: (3, C*W) rows = [bias, gamma, beta] pre-broadcast across lanes.
    bs_ref: (C*W, C*W) block-ones matrix for per-channel sum + broadcast."""
    y = y + aff[0:1]
    stats = jnp.concatenate([jnp.sum(y, axis=0, keepdims=True),
                             jnp.sum(y * y, axis=0, keepdims=True)], axis=0)
    sb = jnp.dot(stats, bs_ref[...], preferred_element_type=jnp.float32)
    mean = sb[0:1] * inv_n
    var = jnp.maximum(sb[1:2] * inv_n - mean * mean, 0.0)
    z = (y - mean) * (lax.rsqrt(var + _BN_EPS) * aff[1:2]) + aff[2:3]
    return jnp.where(z >= 0, z, _NEG_SLOPE * z)


def _pool2x2_packed(y, selh_ref, selw_ref):
    """MaxPool2d(2,2) over all channels at once: adjacent max + 2 selection
    matmuls (selw is channel-block aware, so pairs never cross channels)."""
    vm = jnp.maximum(y[:-1, :], y[1:, :])
    rs = jnp.dot(selh_ref[...], vm, preferred_element_type=jnp.float32)
    hm = jnp.maximum(rs[:, :-1], rs[:, 1:])
    return jnp.dot(hm, selw_ref[...], preferred_element_type=jnp.float32)


def _up2x_packed(y, uh_ref, uwbd_ref):
    """Bilinear 2x upsample (align_corners=False) for all channels:
    Uh @ (y @ blockdiag(Uw^T))."""
    t = jnp.dot(y, uwbd_ref[...], preferred_element_type=jnp.float32)
    return jnp.dot(uh_ref[...], t, preferred_element_type=jnp.float32)


# ---------------------------------------------------------------------------
# The single fused kernel.
# ---------------------------------------------------------------------------
def _fwinet_kernel(x_ref,
                   dc_m, dc_b, e1_m, e1_aff, e2_m, e2_aff, e3_m, e3_aff,
                   selh1, selw1, selh2, selw2, selh3, selw3,
                   bs_e1, bs_e2, bs_e3,
                   w1f, b1, w2t, b2,
                   u2_m, u2_aff, u3_m, u3_aff,
                   uf_m, uf_aff, uo_m, uo_b,
                   bs_u2, bs_u3, bs_uf,
                   uh8, uwbd2, uh16, uwbd3, uh32, uwbdf,
                   out_ref, *, shots, mf, H, W):
    c4 = 4 * mf
    f32 = jnp.float32

    # Lane-pack the input shots: (H, shots*W).
    x = jnp.concatenate([x_ref[0, c] for c in range(shots)], axis=1)

    # data_compress: bare Conv2d(shots, 1, 3, 1, 1) (no BN / activation).
    h = _conv3x3_packed(x, dc_m) + dc_b[...]

    # encoder1 + maxpool
    h = _conv3x3_packed(h, e1_m)
    h = _bn_leaky_packed(h, e1_aff[...], bs_e1, 1.0 / (H * W))
    h = _pool2x2_packed(h, selh1, selw1)                   # (H/2, mf*W/2)

    # encoder2 + maxpool
    h = _conv3x3_packed(h, e2_m)
    h = _bn_leaky_packed(h, e2_aff[...], bs_e2, 1.0 / ((H // 2) * (W // 2)))
    h = _pool2x2_packed(h, selh2, selw2)                   # (H/4, 2mf*W/4)

    # encoder3 + maxpool
    h = _conv3x3_packed(h, e3_m)
    h = _bn_leaky_packed(h, e3_aff[...], bs_e3, 1.0 / ((H // 4) * (W // 4)))
    h = _pool2x2_packed(h, selh3, selw3)                   # (H/8, 4mf*W/8)

    # linear1: single lane-dense matmul on the flattened row.
    d1 = H // 8
    flat = jnp.concatenate([h[i:i + 1, :] for i in range(d1)], axis=1)
    lat = jnp.dot(flat, w1f[...], preferred_element_type=f32) + b1[...]

    # linear2: weights pre-permuted so the output row is already the decoder
    # seed in row-major, lane-packed order; split into 8 aligned row slices.
    row = jnp.dot(lat, w2t[...], preferred_element_type=f32) + b2[...]
    sw = c4 * 16
    h = jnp.concatenate([row[:, r * sw:(r + 1) * sw] for r in range(8)],
                        axis=0)                            # (8, 4mf*16)

    # up_vp_2: conv3x3 + BN + LeakyReLU + bilinear 2x
    h = _conv3x3_packed(h, u2_m)
    h = _bn_leaky_packed(h, u2_aff[...], bs_u2, 1.0 / (8 * 16))
    h = _up2x_packed(h, uh8, uwbd2)                        # (16, 2mf*32)

    # up_vp_3
    h = _conv3x3_packed(h, u3_m)
    h = _bn_leaky_packed(h, u3_aff[...], bs_u3, 1.0 / (16 * 32))
    h = _up2x_packed(h, uh16, uwbd3)                       # (32, mf*64)

    # up_vp_final: 1x1 conv + BN + LeakyReLU + bilinear 2x
    h = jnp.dot(h, uf_m[...], preferred_element_type=f32)
    h = _bn_leaky_packed(h, uf_aff[...], bs_uf, 1.0 / (32 * 64))
    h = _up2x_packed(h, uh32, uwbdf)                       # (64, mf*128)

    # up_vp_out: 1x1 conv (mf -> 1) + exact sigmoid (parity with torch).
    y = jnp.dot(h, uo_m[...], preferred_element_type=f32) + uo_b[...]
    out_ref[...] = 1.0 / (1.0 + jnp.exp(-y))


# ---------------------------------------------------------------------------
# Host-side (numpy) weight packing & constant matrices -- done ONCE.
# ---------------------------------------------------------------------------
def _upsample_matrix(n):
    """(2n, n) bilinear interpolation matrix, PyTorch align_corners=False."""
    u = np.zeros((2 * n, n), np.float32)
    for i in range(2 * n):
        src = max((i + 0.5) * 0.5 - 0.5, 0.0)
        x0 = int(np.floor(src))
        x1 = min(x0 + 1, n - 1)
        f = src - x0
        u[i, x0] += 1.0 - f
        u[i, x1] += f
    return u


def _upsample_bd(c, w):
    """Block-diagonal (c*w, c*2w) horizontal-upsample matrix (Uw^T per block)."""
    return np.kron(np.eye(c, dtype=np.float32), _upsample_matrix(w).T)


def _conv3x3_lane_mats(w, w_lane):
    """w: (cout, cin, 3, 3) -> (3, cin*W, cout*W): horizontal taps + channel
    mixing folded per vertical offset dy (zero horizontal padding built in)."""
    w = np.asarray(w, np.float32)
    cout, cin = w.shape[0], w.shape[1]
    m = np.zeros((3, cin * w_lane, cout * w_lane), np.float32)
    for dy in range(3):
        for co in range(cout):
            for ci in range(cin):
                for dx in range(3):
                    for x in range(w_lane):
                        u = x + dx - 1
                        if 0 <= u < w_lane:
                            m[dy, ci * w_lane + u, co * w_lane + x] = w[co, ci, dy, dx]
    return m


def _conv1x1_lane_mat(w, w_lane):
    """w: (cout, cin) -> (cin*W, cout*W) block-identity-scaled matrix."""
    w = np.asarray(w, np.float32)
    cout, cin = w.shape
    m = np.zeros((cin * w_lane, cout * w_lane), np.float32)
    for co in range(cout):
        for ci in range(cin):
            for x in range(w_lane):
                m[ci * w_lane + x, co * w_lane + x] = w[co, ci]
    return m


def _lane_rows(vals, w_lane):
    """Per-channel scalars broadcast across W lanes -> (len(vals), C*W)."""
    return np.stack([np.repeat(np.asarray(v, np.float32), w_lane)
                     for v in vals], axis=0)


def _block_ones(c, w):
    """(C*W, C*W) block-diagonal all-ones (per-channel sum + broadcast)."""
    return np.kron(np.eye(c, dtype=np.float32), np.ones((w, w), np.float32))


def _pool_mats(h, c, w):
    """Row selector (H/2, H-1) and channel-aware column selector
    (C*W-1, C*(W/2)) for MaxPool2d(2,2) in the lane-packed layout."""
    selh = np.zeros((h // 2, h - 1), np.float32)
    selh[np.arange(h // 2), 2 * np.arange(h // 2)] = 1.0
    selw = np.zeros((c * w - 1, c * (w // 2)), np.float32)
    for ch in range(c):
        for j in range(w // 2):
            selw[ch * w + 2 * j, ch * (w // 2) + j] = 1.0
    return selh, selw


def pack_params(params, shot_counts, nsamples, nrecs, min_filters, latent_length):
    """Fold all FWINET weights into lane-packed matmul operands (numpy, once)."""
    mf, H, W = min_filters, nsamples, nrecs
    c1, c2, c4 = mf, 2 * mf, 4 * mf
    d1, d2 = H // 8, W // 8

    g = lambda a: np.asarray(a, np.float32)

    dc, e1, e2, e3 = (params[k] for k in
                      ("data_compress", "encoder1", "encoder2", "encoder3"))
    u2, u3, uf, uo = (params[k] for k in
                      ("up_vp_2", "up_vp_3", "up_vp_final", "up_vp_out"))

    def aff_rows(p, w_lane):
        return _lane_rows([g(p["b"]), g(p["gamma"]), g(p["beta"])], w_lane)

    # linear1: rows reordered (i, c, j) to match the lane-packed flatten order.
    w1 = g(params["linear1"]["w"]).reshape(latent_length, c4, d1, d2)
    w1f = np.transpose(w1, (2, 1, 3, 0)).reshape(d1 * c4 * d2, latent_length)
    b1 = g(params["linear1"]["b"]).reshape(1, latent_length)

    # linear2: columns permuted to (r, c, j) so the output row is the decoder
    # seed in row-major packed order (torch .view(1, 4mf, 8, 16) for free).
    w2 = g(params["linear2"]["w"]).reshape(c4, 8, 16, latent_length)
    w2t = np.transpose(w2, (3, 1, 0, 2)).reshape(latent_length, c4 * 8 * 16)
    b2 = np.transpose(g(params["linear2"]["b"]).reshape(c4, 8, 16),
                      (1, 0, 2)).reshape(1, c4 * 8 * 16)

    selh1, selw1 = _pool_mats(H, c1, W)
    selh2, selw2 = _pool_mats(H // 2, c2, W // 2)
    selh3, selw3 = _pool_mats(H // 4, c4, W // 4)

    packed = (
        _conv3x3_lane_mats(g(dc["w"]), W), _lane_rows([g(dc["b"])], W),
        _conv3x3_lane_mats(g(e1["w"]), W), aff_rows(e1, W),
        _conv3x3_lane_mats(g(e2["w"]), W // 2), aff_rows(e2, W // 2),
        _conv3x3_lane_mats(g(e3["w"]), W // 4), aff_rows(e3, W // 4),
        selh1, selw1, selh2, selw2, selh3, selw3,
        _block_ones(c1, W), _block_ones(c2, W // 2), _block_ones(c4, W // 4),
        w1f, b1, w2t, b2,
        _conv3x3_lane_mats(g(u2["w"]), 16), aff_rows(u2, 16),
        _conv3x3_lane_mats(g(u3["w"]), 32), aff_rows(u3, 32),
        _conv1x1_lane_mat(g(uf["w"])[:, :, 0, 0], 64), aff_rows(uf, 64),
        _conv1x1_lane_mat(g(uo["w"])[:, :, 0, 0], 128),
        _lane_rows([g(uo["b"])], 128),
        _block_ones(c2, 16), _block_ones(c1, 32), _block_ones(c1, 64),
        _upsample_matrix(8), _upsample_bd(c2, 16),
        _upsample_matrix(16), _upsample_bd(c1, 32),
        _upsample_matrix(32), _upsample_bd(c1, 64),
    )
    return tuple(jnp.asarray(a) for a in packed)


# ---------------------------------------------------------------------------
# Parameter init (deterministic, synthetic) and forward pass.
# ---------------------------------------------------------------------------
def init_params(key, shot_counts, nsamples, nrecs, min_filters, latent_length):
    mf = min_filters
    dim1, dim2 = nsamples // 8, nrecs // 8
    vdim1, vdim2 = 64 // 8, 128 // 8      # domain = (64, 128) in FWINET

    def conv_p(k, cout, cin, ks, bn):
        k1, k2, k3, k4 = jax.random.split(k, 4)
        fan_in = cin * ks * ks
        p = {"w": jax.random.normal(k1, (cout, cin, ks, ks), jnp.float32)
                  * np.sqrt(2.0 / fan_in),
             "b": jax.random.normal(k2, (cout,), jnp.float32) * 0.01}
        if bn:
            p["gamma"] = 1.0 + 0.1 * jax.random.normal(k3, (cout,), jnp.float32)
            p["beta"] = 0.05 * jax.random.normal(k4, (cout,), jnp.float32)
        return p

    def lin_p(k, out_f, in_f):
        k1, k2 = jax.random.split(k)
        return {"w": jax.random.normal(k1, (out_f, in_f), jnp.float32)
                     * np.sqrt(2.0 / in_f),
                "b": jax.random.normal(k2, (out_f,), jnp.float32) * 0.01}

    ks = jax.random.split(key, 10)
    return {
        "data_compress": conv_p(ks[0], 1, shot_counts, 3, False),
        "encoder1": conv_p(ks[1], mf, 1, 3, True),
        "encoder2": conv_p(ks[2], mf * 2, mf, 3, True),
        "encoder3": conv_p(ks[3], mf * 4, mf * 2, 3, True),
        "linear1": lin_p(ks[4], latent_length, mf * 4 * dim1 * dim2),
        "linear2": lin_p(ks[5], mf * 4 * vdim1 * vdim2, latent_length),
        "up_vp_2": conv_p(ks[6], mf * 2, mf * 4, 3, True),
        "up_vp_3": conv_p(ks[7], mf, mf * 2, 3, True),
        "up_vp_final": conv_p(ks[8], mf, mf, 1, True),
        "up_vp_out": conv_p(ks[9], 1, mf, 1, False),
    }


def fwinet_forward(x, packed, *, shots, H, W, mf):
    """x: (1, shots, H, W) f32 (NCHW, batch must be 1).  Returns (64, 128)."""
    kernel = functools.partial(_fwinet_kernel, shots=shots, mf=mf, H=H, W=W)
    return pl.pallas_call(
        kernel,
        out_shape=jax.ShapeDtypeStruct((64, 128), jnp.float32),
        in_specs=[_VMEM] * (1 + len(packed)),
        out_specs=_VMEM,
    )(x.astype(jnp.float32), *packed)


if __name__ == "__main__":
    shot_counts, nsamples, nrecs = 2, 16, 16
    min_filters, latent_length = 2, 8

    key = jax.random.PRNGKey(0)
    kx, kp = jax.random.split(key)
    x = jax.random.normal(kx, (1, shot_counts, nsamples, nrecs), jnp.float32)
    params = init_params(kp, shot_counts, nsamples, nrecs,
                         min_filters, latent_length)
    packed = pack_params(params, shot_counts, nsamples, nrecs,
                         min_filters, latent_length)

    fwd = jax.jit(functools.partial(fwinet_forward, shots=shot_counts,
                                    H=nsamples, W=nrecs, mf=min_filters))
    out = jax.block_until_ready(fwd(x, packed))
    assert out.shape == (64, 128), out.shape
    assert bool(jnp.all(jnp.isfinite(out)))
    print("KERNEL_OK")
</pallas_src>

<mosaic_0001>
module attributes {stable_mosaic.version = 11 : i64} {
  func.func @_fwinet_kernel(%arg0: memref<1x2x16x16xf32, #tpu.memory_space<vmem>>, %arg1: memref<3x32x16xf32, #tpu.memory_space<vmem>>, %arg2: memref<1x16xf32, #tpu.memory_space<vmem>>, %arg3: memref<3x16x32xf32, #tpu.memory_space<vmem>>, %arg4: memref<3x32xf32, #tpu.memory_space<vmem>>, %arg5: memref<3x16x32xf32, #tpu.memory_space<vmem>>, %arg6: memref<3x32xf32, #tpu.memory_space<vmem>>, %arg7: memref<3x16x32xf32, #tpu.memory_space<vmem>>, %arg8: memref<3x32xf32, #tpu.memory_space<vmem>>, %arg9: memref<8x15xf32, #tpu.memory_space<vmem>>, %arg10: memref<31x16xf32, #tpu.memory_space<vmem>>, %arg11: memref<4x7xf32, #tpu.memory_space<vmem>>, %arg12: memref<31x16xf32, #tpu.memory_space<vmem>>, %arg13: memref<2x3xf32, #tpu.memory_space<vmem>>, %arg14: memref<31x16xf32, #tpu.memory_space<vmem>>, %arg15: memref<32x32xf32, #tpu.memory_space<vmem>>, %arg16: memref<32x32xf32, #tpu.memory_space<vmem>>, %arg17: memref<32x32xf32, #tpu.memory_space<vmem>>, %arg18: memref<32x8xf32, #tpu.memory_space<vmem>>, %arg19: memref<1x8xf32, #tpu.memory_space<vmem>>, %arg20: memref<8x1024xf32, #tpu.memory_space<vmem>>, %arg21: memref<1x1024xf32, #tpu.memory_space<vmem>>, %arg22: memref<3x128x64xf32, #tpu.memory_space<vmem>>, %arg23: memref<3x64xf32, #tpu.memory_space<vmem>>, %arg24: memref<3x128x64xf32, #tpu.memory_space<vmem>>, %arg25: memref<3x64xf32, #tpu.memory_space<vmem>>, %arg26: memref<128x128xf32, #tpu.memory_space<vmem>>, %arg27: memref<3x128xf32, #tpu.memory_space<vmem>>, %arg28: memref<256x128xf32, #tpu.memory_space<vmem>>, %arg29: memref<1x128xf32, #tpu.memory_space<vmem>>, %arg30: memref<64x64xf32, #tpu.memory_space<vmem>>, %arg31: memref<64x64xf32, #tpu.memory_space<vmem>>, %arg32: memref<128x128xf32, #tpu.memory_space<vmem>>, %arg33: memref<16x8xf32, #tpu.memory_space<vmem>>, %arg34: memref<64x128xf32, #tpu.memory_space<vmem>>, %arg35: memref<32x16xf32, #tpu.memory_space<vmem>>, %arg36: memref<64x128xf32, #tpu.memory_space<vmem>>, %arg37: memref<64x32xf32, #tpu.memory_space<vmem>>, %arg38: memref<128x256xf32, #tpu.memory_space<vmem>>, %arg39: memref<64x128xf32, #tpu.memory_space<vmem>>) attributes {dimension_semantics = [], scalar_prefetch = 0 : i64, scratch_operands = 0 : i64, tpu.core_type = #tpu.core_type<tc>} {
    %c0 = arith.constant 0 : index
    %c0_0 = arith.constant 0 : index
    %c0_1 = arith.constant 0 : index
    %c0_2 = arith.constant 0 : index
    %0 = vector.load %arg0[%c0, %c0_0, %c0_1, %c0_2] : memref<1x2x16x16xf32, #tpu.memory_space<vmem>>, vector<1x1x16x16xf32>
    %1 = vector.shape_cast %0 : vector<1x1x16x16xf32> to vector<16x16xf32>
    %c0_3 = arith.constant 0 : index
    %c1 = arith.constant 1 : index
    %c0_4 = arith.constant 0 : index
    %c0_5 = arith.constant 0 : index
    %2 = vector.load %arg0[%c0_3, %c1, %c0_4, %c0_5] : memref<1x2x16x16xf32, #tpu.memory_space<vmem>>, vector<1x1x16x16xf32>
    %3 = vector.shape_cast %2 : vector<1x1x16x16xf32> to vector<16x16xf32>
    %4 = tpu.concatenate %1, %3 in 1 : vector<16x16xf32>, vector<16x16xf32> -> vector<16x32xf32>
    %cst = arith.constant 0.000000e+00 : f32
    %5 = vector.broadcast %cst : f32 to vector<1x32xf32>
    %6 = vector.extract_strided_slice %4 {offsets = [0, 0], sizes = [15, 32], strides = [1, 1]} : vector<16x32xf32> to vector<15x32xf32>
    %7 = tpu.concatenate %5, %6 in 0 : vector<1x32xf32>, vector<15x32xf32> -> vector<16x32xf32>
    %8 = vector.extract_strided_slice %4 {offsets = [1, 0], sizes = [15, 32], strides = [1, 1]} : vector<16x32xf32> to vector<15x32xf32>
    %9 = tpu.concatenate %8, %5 in 0 : vector<15x32xf32>, vector<1x32xf32> -> vector<16x32xf32>
    %c0_6 = arith.constant 0 : index
    %c0_7 = arith.constant 0 : index
    %c0_8 = arith.constant 0 : index
    %10 = vector.load %arg1[%c0_6, %c0_7, %c0_8] : memref<3x32x16xf32, #tpu.memory_space<vmem>>, vector<1x32x16xf32>
    %11 = vector.shape_cast %10 : vector<1x32x16xf32> to vector<32x16xf32>
    %cst_9 = arith.constant dense<0.000000e+00> : vector<16x16xf32>
    %12 = tpu.matmul %7, %11, %cst_9 {dimension_numbers = #tpu.dot_dimension_numbers<[1], [0], [0], [1], [0, 0, 1, 1], [], []>} : vector<16x32xf32>, vector<32x16xf32>, vector<16x16xf32> -> vector<16x16xf32>
    %c1_10 = arith.constant 1 : index
    %c0_11 = arith.constant 0 : index
    %c0_12 = arith.constant 0 : index
    %13 = vector.load %arg1[%c1_10, %c0_11, %c0_12] : memref<3x32x16xf32, #tpu.memory_space<vmem>>, vector<1x32x16xf32>
    %14 = vector.shape_cast %13 : vector<1x32x16xf32> to vector<32x16xf32>
    %cst_13 = arith.constant dense<0.000000e+00> : vector<16x16xf32>
    %15 = tpu.matmul %4, %14, %cst_13 {dimension_numbers = #tpu.dot_dimension_numbers<[1], [0], [0], [1], [0, 0, 1, 1], [], []>} : vector<16x32xf32>, vector<32x16xf32>, vector<16x16xf32> -> vector<16x16xf32>
    %16 = arith.addf %12, %15 : vector<16x16xf32>
    %c2 = arith.constant 2 : index
    %c0_14 = arith.constant 0 : index
    %c0_15 = arith.constant 0 : index
    %17 = vector.load %arg1[%c2, %c0_14, %c0_15] : memref<3x32x16xf32, #tpu.memory_space<vmem>>, vector<1x32x16xf32>
    %18 = vector.shape_cast %17 : vector<1x32x16xf32> to vector<32x16xf32>
    %cst_16 = arith.constant dense<0.000000e+00> : vector<16x16xf32>
    %19 = tpu.matmul %9, %18, %cst_16 {dimension_numbers = #tpu.dot_dimension_numbers<[1], [0], [0], [1], [0, 0, 1, 1], [], []>} : vector<16x32xf32>, vector<32x16xf32>, vector<16x16xf32> -> vector<16x16xf32>
    %20 = arith.addf %16, %19 : vector<16x16xf32>
    %c0_17 = arith.constant 0 : index
    %c0_18 = arith.constant 0 : index
    %21 = vector.load %arg2[%c0_17, %c0_18] : memref<1x16xf32, #tpu.memory_space<vmem>>, vector<1x16xf32>
    %22 = vector.broadcast %21 : vector<1x16xf32> to vector<16x16xf32>
    %23 = arith.addf %20, %22 : vector<16x16xf32>
    %cst_19 = arith.constant 0.000000e+00 : f32
    %24 = vector.broadcast %cst_19 : f32 to vector<1x16xf32>
    %25 = vector.extract_strided_slice %23 {offsets = [0, 0], sizes = [15, 16], strides = [1, 1]} : vector<16x16xf32> to vector<15x16xf32>
    %26 = tpu.concatenate %24, %25 in 0 : vector<1x16xf32>, vector<15x16xf32> -> vector<16x16xf32>
    %27 = vector.extract_strided_slice %23 {offsets = [1, 0], sizes = [15, 16], strides = [1, 1]} : vector<16x16xf32> to vector<15x16xf32>
    %28 = tpu.concatenate %27, %24 in 0 : vector<15x16xf32>, vector<1x16xf32> -> vector<16x16xf32>
    %c0_20 = arith.constant 0 : index
    %c0_21 = arith.constant 0 : index
    %c0_22 = arith.constant 0 : index
    %29 = vector.load %arg3[%c0_20, %c0_21, %c0_22] : memref<3x16x32xf32, #tpu.memory_space<vmem>>, vector<1x16x32xf32>
    %30 = vector.shape_cast %29 : vector<1x16x32xf32> to vector<16x32xf32>
    %cst_23 = arith.constant dense<0.000000e+00> : vector<16x32xf32>
    %31 = tpu.matmul %26, %30, %cst_23 {dimension_numbers = #tpu.dot_dimension_numbers<[1], [0], [0], [1], [0, 0, 1, 1], [], []>} : vector<16x16xf32>, vector<16x32xf32>, vector<16x32xf32> -> vector<16x32xf32>
    %c1_24 = arith.constant 1 : index
    %c0_25 = arith.constant 0 : index
    %c0_26 = arith.constant 0 : index
    %32 = vector.load %arg3[%c1_24, %c0_25, %c0_26] : memref<3x16x32xf32, #tpu.memory_space<vmem>>, vector<1x16x32xf32>
    %33 = vector.shape_cast %32 : vector<1x16x32xf32> to vector<16x32xf32>
    %cst_27 = arith.constant dense<0.000000e+00> : vector<16x32xf32>
    %34 = tpu.matmul %23, %33, %cst_27 {dimension_numbers = #tpu.dot_dimension_numbers<[1], [0], [0], [1], [0, 0, 1, 1], [], []>} : vector<16x16xf32>, vector<16x32xf32>, vector<16x32xf32> -> vector<16x32xf32>
    %35 = arith.addf %31, %34 : vector<16x32xf32>
    %c2_28 = arith.constant 2 : index
    %c0_29 = arith.constant 0 : index
    %c0_30 = arith.constant 0 : index
    %36 = vector.load %arg3[%c2_28, %c0_29, %c0_30] : memref<3x16x32xf32, #tpu.memory_space<vmem>>, vector<1x16x32xf32>
    %37 = vector.shape_cast %36 : vector<1x16x32xf32> to vector<16x32xf32>
    %cst_31 = arith.constant dense<0.000000e+00> : vector<16x32xf32>
    %38 = tpu.matmul %28, %37, %cst_31 {dimension_numbers = #tpu.dot_dimension_numbers<[1], [0], [0], [1], [0, 0, 1, 1], [], []>} : vector<16x16xf32>, vector<16x32xf32>, vector<16x32xf32> -> vector<16x32xf32>
    %39 = arith.addf %35, %38 : vector<16x32xf32>
    %c0_32 = arith.constant 0 : index
    %c0_33 = arith.constant 0 : index
    %40 = vector.load %arg4[%c0_32, %c0_33] : memref<3x32xf32, #tpu.memory_space<vmem>>, vector<3x32xf32>
    %41 = vector.extract_strided_slice %40 {offsets = [0, 0], sizes = [1, 32], strides = [1, 1]} : vector<3x32xf32> to vector<1x32xf32>
    %42 = vector.broadcast %41 : vector<1x32xf32> to vector<16x32xf32>
    %43 = arith.addf %39, %42 : vector<16x32xf32>
    %cst_34 = arith.constant dense<0.000000e+00> : vector<32xf32>
    %44 = vector.multi_reduction <add>, %43, %cst_34 [0] : vector<16x32xf32> to vector<32xf32>
    %45 = vector.shape_cast %44 : vector<32xf32> to vector<1x32xf32>
    %46 = arith.mulf %43, %43 : vector<16x32xf32>
    %cst_35 = arith.constant dense<0.000000e+00> : vector<32xf32>
    %47 = vector.multi_reduction <add>, %46, %cst_35 [0] : vector<16x32xf32> to vector<32xf32>
    %48 = vector.shape_cast %47 : vector<32xf32> to vector<1x32xf32>
    %49 = tpu.concatenate %45, %48 in 0 : vector<1x32xf32>, vector<1x32xf32> -> vector<2x32xf32>
    %c0_36 = arith.constant 0 : index
    %c0_37 = arith.constant 0 : index
    %50 = vector.load %arg15[%c0_36, %c0_37] : memref<32x32xf32, #tpu.memory_space<vmem>>, vector<32x32xf32>
    %cst_38 = arith.constant dense<0.000000e+00> : vector<2x32xf32>
    %51 = tpu.matmul %49, %50, %cst_38 {dimension_numbers = #tpu.dot_dimension_numbers<[1], [0], [0], [1], [0, 0, 1, 1], [], []>} : vector<2x32xf32>, vector<32x32xf32>, vector<2x32xf32> -> vector<2x32xf32>
    %52 = vector.extract_strided_slice %51 {offsets = [0, 0], sizes = [1, 32], strides = [1, 1]} : vector<2x32xf32> to vector<1x32xf32>
    %cst_39 = arith.constant 3.906250e-03 : f32
    %53 = vector.broadcast %cst_39 : f32 to vector<1x32xf32>
    %54 = arith.mulf %52, %53 : vector<1x32xf32>
    %55 = vector.extract_strided_slice %51 {offsets = [1, 0], sizes = [1, 32], strides = [1, 1]} : vector<2x32xf32> to vector<1x32xf32>
    %cst_40 = arith.constant 3.906250e-03 : f32
    %56 = vector.broadcast %cst_40 : f32 to vector<1x32xf32>
    %57 = arith.mulf %55, %56 : vector<1x32xf32>
    %58 = arith.mulf %54, %54 : vector<1x32xf32>
    %59 = arith.subf %57, %58 : vector<1x32xf32>
    %cst_41 = arith.constant 0.000000e+00 : f32
    %60 = vector.broadcast %cst_41 : f32 to vector<1x32xf32>
    %61 = arith.maximumf %59, %60 : vector<1x32xf32>
    %62 = vector.broadcast %54 : vector<1x32xf32> to vector<16x32xf32>
    %63 = arith.subf %43, %62 : vector<16x32xf32>
    %cst_42 = arith.constant 9.99999974E-6 : f32
    %64 = vector.broadcast %cst_42 : f32 to vector<1x32xf32>
    %65 = arith.addf %61, %64 : vector<1x32xf32>
    %66 = math.rsqrt %65 : vector<1x32xf32>
    %67 = vector.extract_strided_slice %40 {offsets = [1, 0], sizes = [1, 32], strides = [1, 1]} : vector<3x32xf32> to vector<1x32xf32>
    %68 = arith.mulf %66, %67 : vector<1x32xf32>
    %69 = vector.broadcast %68 : vector<1x32xf32> to vector<16x32xf32>
    %70 = arith.mulf %63, %69 : vector<16x32xf32>
    %71 = vector.extract_strided_slice %40 {offsets = [2, 0], sizes = [1, 32], strides = [1, 1]} : vector<3x32xf32> to vector<1x32xf32>
    %72 = vector.broadcast %71 : vector<1x32xf32> to vector<16x32xf32>
    %73 = arith.addf %70, %72 : vector<16x32xf32>
    %cst_43 = arith.constant 0.000000e+00 : f32
    %74 = vector.broadcast %cst_43 : f32 to vector<16x32xf32>
    %75 = arith.cmpf oge, %73, %74 : vector<16x32xf32>
    %cst_44 = arith.constant 1.000000e-01 : f32
    %76 = vector.broadcast %cst_44 : f32 to vector<16x32xf32>
    %77 = arith.mulf %76, %73 : vector<16x32xf32>
    %78 = arith.select %75, %73, %77 : vector<16x32xi1>, vector<16x32xf32>
    %79 = vector.extract_strided_slice %78 {offsets = [0, 0], sizes = [15, 32], strides = [1, 1]} : vector<16x32xf32> to vector<15x32xf32>
    %80 = vector.extract_strided_slice %78 {offsets = [1, 0], sizes = [15, 32], strides = [1, 1]} : vector<16x32xf32> to vector<15x32xf32>
    %81 = arith.maximumf %79, %80 : vector<15x32xf32>
    %c0_45 = arith.constant 0 : index
    %c0_46 = arith.constant 0 : index
    %82 = vector.load %arg9[%c0_45, %c0_46] : memref<8x15xf32, #tpu.memory_space<vmem>>, vector<8x15xf32>
    %cst_47 = arith.constant dense<0.000000e+00> : vector<8x32xf32>
    %83 = tpu.matmul %82, %81, %cst_47 {dimension_numbers = #tpu.dot_dimension_numbers<[1], [0], [0], [1], [0, 0, 1, 1], [], []>} : vector<8x15xf32>, vector<15x32xf32>, vector<8x32xf32> -> vector<8x32xf32>
    %84 = vector.extract_strided_slice %83 {offsets = [0, 0], sizes = [8, 31], strides = [1, 1]} : vector<8x32xf32> to vector<8x31xf32>
    %85 = vector.extract_strided_slice %83 {offsets = [0, 1], sizes = [8, 31], strides = [1, 1]} : vector<8x32xf32> to vector<8x31xf32>
    %86 = arith.maximumf %84, %85 : vector<8x31xf32>
    %c0_48 = arith.constant 0 : index
    %c0_49 = arith.constant 0 : index
    %87 = vector.load %arg10[%c0_48, %c0_49] : memref<31x16xf32, #tpu.memory_space<vmem>>, vector<31x16xf32>
    %cst_50 = arith.constant dense<0.000000e+00> : vector<8x16xf32>
    %88 = tpu.matmul %86, %87, %cst_50 {dimension_numbers = #tpu.dot_dimension_numbers<[1], [0], [0], [1], [0, 0, 1, 1], [], []>} : vector<8x31xf32>, vector<31x16xf32>, vector<8x16xf32> -> vector<8x16xf32>
    %cst_51 = arith.constant 0.000000e+00 : f32
    %89 = vector.broadcast %cst_51 : f32 to vector<1x16xf32>
    %90 = vector.extract_strided_slice %88 {offsets = [0, 0], sizes = [7, 16], strides = [1, 1]} : vector<8x16xf32> to vector<7x16xf32>
    %91 = tpu.concatenate %89, %90 in 0 : vector<1x16xf32>, vector<7x16xf32> -> vector<8x16xf32>
    %92 = vector.extract_strided_slice %88 {offsets = [1, 0], sizes = [7, 16], strides = [1, 1]} : vector<8x16xf32> to vector<7x16xf32>
    %93 = tpu.concatenate %92, %89 in 0 : vector<7x16xf32>, vector<1x16xf32> -> vector<8x16xf32>
    %c0_52 = arith.constant 0 : index
    %c0_53 = arith.constant 0 : index
    %c0_54 = arith.constant 0 : index
    %94 = vector.load %arg5[%c0_52, %c0_53, %c0_54] : memref<3x16x32xf32, #tpu.memory_space<vmem>>, vector<1x16x32xf32>
    %95 = vector.shape_cast %94 : vector<1x16x32xf32> to vector<16x32xf32>
    %cst_55 = arith.constant dense<0.000000e+00> : vector<8x32xf32>
    %96 = tpu.matmul %91, %95, %cst_55 {dimension_numbers = #tpu.dot_dimension_numbers<[1], [0], [0], [1], [0, 0, 1, 1], [], []>} : vector<8x16xf32>, vector<16x32xf32>, vector<8x32xf32> -> vector<8x32xf32>
    %c1_56 = arith.constant 1 : index
    %c0_57 = arith.constant 0 : index
    %c0_58 = arith.constant 0 : index
    %97 = vector.load %arg5[%c1_56, %c0_57, %c0_58] : memref<3x16x32xf32, #tpu.memory_space<vmem>>, vector<1x16x32xf32>
    %98 = vector.shape_cast %97 : vector<1x16x32xf32> to vector<16x32xf32>
    %cst_59 = arith.constant dense<0.000000e+00> : vector<8x32xf32>
    %99 = tpu.matmul %88, %98, %cst_59 {dimension_numbers = #tpu.dot_dimension_numbers<[1], [0], [0], [1], [0, 0, 1, 1], [], []>} : vector<8x16xf32>, vector<16x32xf32>, vector<8x32xf32> -> vector<8x32xf32>
    %100 = arith.addf %96, %99 : vector<8x32xf32>
    %c2_60 = arith.constant 2 : index
    %c0_61 = arith.constant 0 : index
    %c0_62 = arith.constant 0 : index
    %101 = vector.load %arg5[%c2_60, %c0_61, %c0_62] : memref<3x16x32xf32, #tpu.memory_space<vmem>>, vector<1x16x32xf32>
    %102 = vector.shape_cast %101 : vector<1x16x32xf32> to vector<16x32xf32>
    %cst_63 = arith.constant dense<0.000000e+00> : vector<8x32xf32>
    %103 = tpu.matmul %93, %102, %cst_63 {dimension_numbers = #tpu.dot_dimension_numbers<[1], [0], [0], [1], [0, 0, 1, 1], [], []>} : vector<8x16xf32>, vector<16x32xf32>, vector<8x32xf32> -> vector<8x32xf32>
    %104 = arith.addf %100, %103 : vector<8x32xf32>
    %c0_64 = arith.constant 0 : index
    %c0_65 = arith.constant 0 : index
    %105 = vector.load %arg6[%c0_64, %c0_65] : memref<3x32xf32, #tpu.memory_space<vmem>>, vector<3x32xf32>
    %106 = vector.extract_strided_slice %105 {offsets = [0, 0], sizes = [1, 32], strides = [1, 1]} : vector<3x32xf32> to vector<1x32xf32>
    %107 = vector.broadcast %106 : vector<1x32xf32> to vector<8x32xf32>
    %108 = arith.addf %104, %107 : vector<8x32xf32>
    %cst_66 = arith.constant dense<0.000000e+00> : vector<32xf32>
    %109 = vector.multi_reduction <add>, %108, %cst_66 [0] : vector<8x32xf32> to vector<32xf32>
    %110 = vector.shape_cast %109 : vector<32xf32> to vector<1x32xf32>
    %111 = arith.mulf %108, %108 : vector<8x32xf32>
    %cst_67 = arith.constant dense<0.000000e+00> : vector<32xf32>
    %112 = vector.multi_reduction <add>, %111, %cst_67 [0] : vector<8x32xf32> to vector<32xf32>
    %113 = vector.shape_cast %112 : vector<32xf32> to vector<1x32xf32>
    %114 = tpu.concatenate %110, %113 in 0 : vector<1x32xf32>, vector<1x32xf32> -> vector<2x32xf32>
    %c0_68 = arith.constant 0 : index
    %c0_69 = arith.constant 0 : index
    %115 = vector.load %arg16[%c0_68, %c0_69] : memref<32x32xf32, #tpu.memory_space<vmem>>, vector<32x32xf32>
    %cst_70 = arith.constant dense<0.000000e+00> : vector<2x32xf32>
    %116 = tpu.matmul %114, %115, %cst_70 {dimension_numbers = #tpu.dot_dimension_numbers<[1], [0], [0], [1], [0, 0, 1, 1], [], []>} : vector<2x32xf32>, vector<32x32xf32>, vector<2x32xf32> -> vector<2x32xf32>
    %117 = vector.extract_strided_slice %116 {offsets = [0, 0], sizes = [1, 32], strides = [1, 1]} : vector<2x32xf32> to vector<1x32xf32>
    %cst_71 = arith.constant 1.562500e-02 : f32
    %118 = vector.broadcast %cst_71 : f32 to vector<1x32xf32>
    %119 = arith.mulf %117, %118 : vector<1x32xf32>
    %120 = vector.extract_strided_slice %116 {offsets = [1, 0], sizes = [1, 32], strides = [1, 1]} : vector<2x32xf32> to vector<1x32xf32>
    %cst_72 = arith.constant 1.562500e-02 : f32
    %121 = vector.broadcast %cst_72 : f32 to vector<1x32xf32>
    %122 = arith.mulf %120, %121 : vector<1x32xf32>
    %123 = arith.mulf %119, %119 : vector<1x32xf32>
    %124 = arith.subf %122, %123 : vector<1x32xf32>
    %cst_73 = arith.constant 0.000000e+00 : f32
    %125 = vector.broadcast %cst_73 : f32 to vector<1x32xf32>
    %126 = arith.maximumf %124, %125 : vector<1x32xf32>
    %127 = vector.broadcast %119 : vector<1x32xf32> to vector<8x32xf32>
    %128 = arith.subf %108, %127 : vector<8x32xf32>
    %cst_74 = arith.constant 9.99999974E-6 : f32
    %129 = vector.broadcast %cst_74 : f32 to vector<1x32xf32>
    %130 = arith.addf %126, %129 : vector<1x32xf32>
    %131 = math.rsqrt %130 : vector<1x32xf32>
    %132 = vector.extract_strided_slice %105 {offsets = [1, 0], sizes = [1, 32], strides = [1, 1]} : vector<3x32xf32> to vector<1x32xf32>
    %133 = arith.mulf %131, %132 : vector<1x32xf32>
    %134 = vector.broadcast %133 : vector<1x32xf32> to vector<8x32xf32>
    %135 = arith.mulf %128, %134 : vector<8x32xf32>
    %136 = vector.extract_strided_slice %105 {offsets = [2, 0], sizes = [1, 32], strides = [1, 1]} : vector<3x32xf32> to vector<1x32xf32>
    %137 = vector.broadcast %136 : vector<1x32xf32> to vector<8x32xf32>
    %138 = arith.addf %135, %137 : vector<8x32xf32>
    %cst_75 = arith.constant 0.000000e+00 : f32
    %139 = vector.broadcast %cst_75 : f32 to vector<8x32xf32>
    %140 = arith.cmpf oge, %138, %139 : vector<8x32xf32>
    %cst_76 = arith.constant 1.000000e-01 : f32
    %141 = vector.broadcast %cst_76 : f32 to vector<8x32xf32>
    %142 = arith.mulf %141, %138 : vector<8x32xf32>
    %143 = arith.select %140, %138, %142 : vector<8x32xi1>, vector<8x32xf32>
    %144 = vector.extract_strided_slice %143 {offsets = [0, 0], sizes = [7, 32], strides = [1, 1]} : vector<8x32xf32> to vector<7x32xf32>
    %145 = vector.extract_strided_slice %143 {offsets = [1, 0], sizes = [7, 32], strides = [1, 1]} : vector<8x32xf32> to vector<7x32xf32>
    %146 = arith.maximumf %144, %145 : vector<7x32xf32>
    %c0_77 = arith.constant 0 : index
    %c0_78 = arith.constant 0 : index
    %147 = vector.load %arg11[%c0_77, %c0_78] : memref<4x7xf32, #tpu.memory_space<vmem>>, vector<4x7xf32>
    %cst_79 = arith.constant dense<0.000000e+00> : vector<4x32xf32>
    %148 = tpu.matmul %147, %146, %cst_79 {dimension_numbers = #tpu.dot_dimension_numbers<[1], [0], [0], [1], [0, 0, 1, 1], [], []>} : vector<4x7xf32>, vector<7x32xf32>, vector<4x32xf32> -> vector<4x32xf32>
    %149 = vector.extract_strided_slice %148 {offsets = [0, 0], sizes = [4, 31], strides = [1, 1]} : vector<4x32xf32> to vector<4x31xf32>
    %150 = vector.extract_strided_slice %148 {offsets = [0, 1], sizes = [4, 31], strides = [1, 1]} : vector<4x32xf32> to vector<4x31xf32>
    %151 = arith.maximumf %149, %150 : vector<4x31xf32>
    %c0_80 = arith.constant 0 : index
    %c0_81 = arith.constant 0 : index
    %152 = vector.load %arg12[%c0_80, %c0_81] : memref<31x16xf32, #tpu.memory_space<vmem>>, vector<31x16xf32>
    %cst_82 = arith.constant dense<0.000000e+00> : vector<4x16xf32>
    %153 = tpu.matmul %151, %152, %cst_82 {dimension_numbers = #tpu.dot_dimension_numbers<[1], [0], [0], [1], [0, 0, 1, 1], [], []>} : vector<4x31xf32>, vector<31x16xf32>, vector<4x16xf32> -> vector<4x16xf32>
    %cst_83 = arith.constant 0.000000e+00 : f32
    %154 = vector.broadcast %cst_83 : f32 to vector<1x16xf32>
    %155 = vector.extract_strided_slice %153 {offsets = [0, 0], sizes = [3, 16], strides = [1, 1]} : vector<4x16xf32> to vector<3x16xf32>
    %156 = tpu.concatenate %154, %155 in 0 : vector<1x16xf32>, vector<3x16xf32> -> vector<4x16xf32>
    %157 = vector.extract_strided_slice %153 {offsets = [1, 0], sizes = [3, 16], strides = [1, 1]} : vector<4x16xf32> to vector<3x16xf32>
    %158 = tpu.concatenate %157, %154 in 0 : vector<3x16xf32>, vector<1x16xf32> -> vector<4x16xf32>
    %c0_84 = arith.constant 0 : index
    %c0_85 = arith.constant 0 : index
    %c0_86 = arith.constant 0 : index
    %159 = vector.load %arg7[%c0_84, %c0_85, %c0_86] : memref<3x16x32xf32, #tpu.memory_space<vmem>>, vector<1x16x32xf32>
    %160 = vector.shape_cast %159 : vector<1x16x32xf32> to vector<16x32xf32>
    %cst_87 = arith.constant dense<0.000000e+00> : vector<4x32xf32>
    %161 = tpu.matmul %156, %160, %cst_87 {dimension_numbers = #tpu.dot_dimension_numbers<[1], [0], [0], [1], [0, 0, 1, 1], [], []>} : vector<4x16xf32>, vector<16x32xf32>, vector<4x32xf32> -> vector<4x32xf32>
    %c1_88 = arith.constant 1 : index
    %c0_89 = arith.constant 0 : index
    %c0_90 = arith.constant 0 : index
    %162 = vector.load %arg7[%c1_88, %c0_89, %c0_90] : memref<3x16x32xf32, #tpu.memory_space<vmem>>, vector<1x16x32xf32>
    %163 = vector.shape_cast %162 : vector<1x16x32xf32> to vector<16x32xf32>
    %cst_91 = arith.constant dense<0.000000e+00> : vector<4x32xf32>
    %164 = tpu.matmul %153, %163, %cst_91 {dimension_numbers = #tpu.dot_dimension_numbers<[1], [0], [0], [1], [0, 0, 1, 1], [], []>} : vector<4x16xf32>, vector<16x32xf32>, vector<4x32xf32> -> vector<4x32xf32>
    %165 = arith.addf %161, %164 : vector<4x32xf32>
    %c2_92 = arith.constant 2 : index
    %c0_93 = arith.constant 0 : index
    %c0_94 = arith.constant 0 : index
    %166 = vector.load %arg7[%c2_92, %c0_93, %c0_94] : memref<3x16x32xf32, #tpu.memory_space<vmem>>, vector<1x16x32xf32>
    %167 = vector.shape_cast %166 : vector<1x16x32xf32> to vector<16x32xf32>
    %cst_95 = arith.constant dense<0.000000e+00> : vector<4x32xf32>
    %168 = tpu.matmul %158, %167, %cst_95 {dimension_numbers = #tpu.dot_dimension_numbers<[1], [0], [0], [1], [0, 0, 1, 1], [], []>} : vector<4x16xf32>, vector<16x32xf32>, vector<4x32xf32> -> vector<4x32xf32>
    %169 = arith.addf %165, %168 : vector<4x32xf32>
    %c0_96 = arith.constant 0 : index
    %c0_97 = arith.constant 0 : index
    %170 = vector.load %arg8[%c0_96, %c0_97] : memref<3x32xf32, #tpu.memory_space<vmem>>, vector<3x32xf32>
    %171 = vector.extract_strided_slice %170 {offsets = [0, 0], sizes = [1, 32], strides = [1, 1]} : vector<3x32xf32> to vector<1x32xf32>
    %172 = vector.broadcast %171 : vector<1x32xf32> to vector<4x32xf32>
    %173 = arith.addf %169, %172 : vector<4x32xf32>
    %cst_98 = arith.constant dense<0.000000e+00> : vector<32xf32>
    %174 = vector.multi_reduction <add>, %173, %cst_98 [0] : vector<4x32xf32> to vector<32xf32>
    %175 = vector.shape_cast %174 : vector<32xf32> to vector<1x32xf32>
    %176 = arith.mulf %173, %173 : vector<4x32xf32>
    %cst_99 = arith.constant dense<0.000000e+00> : vector<32xf32>
    %177 = vector.multi_reduction <add>, %176, %cst_99 [0] : vector<4x32xf32> to vector<32xf32>
    %178 = vector.shape_cast %177 : vector<32xf32> to vector<1x32xf32>
    %179 = tpu.concatenate %175, %178 in 0 : vector<1x32xf32>, vector<1x32xf32> -> vector<2x32xf32>
    %c0_100 = arith.constant 0 : index
    %c0_101 = arith.constant 0 : index
    %180 = vector.load %arg17[%c0_100, %c0_101] : memref<32x32xf32, #tpu.memory_space<vmem>>, vector<32x32xf32>
    %cst_102 = arith.constant dense<0.000000e+00> : vector<2x32xf32>
    %181 = tpu.matmul %179, %180, %cst_102 {dimension_numbers = #tpu.dot_dimension_numbers<[1], [0], [0], [1], [0, 0, 1, 1], [], []>} : vector<2x32xf32>, vector<32x32xf32>, vector<2x32xf32> -> vector<2x32xf32>
    %182 = vector.extract_strided_slice %181 {offsets = [0, 0], sizes = [1, 32], strides = [1, 1]} : vector<2x32xf32> to vector<1x32xf32>
    %cst_103 = arith.constant 6.250000e-02 : f32
    %183 = vector.broadcast %cst_103 : f32 to vector<1x32xf32>
    %184 = arith.mulf %182, %183 : vector<1x32xf32>
    %185 = vector.extract_strided_slice %181 {offsets = [1, 0], sizes = [1, 32], strides = [1, 1]} : vector<2x32xf32> to vector<1x32xf32>
    %cst_104 = arith.constant 6.250000e-02 : f32
    %186 = vector.broadcast %cst_104 : f32 to vector<1x32xf32>
    %187 = arith.mulf %185, %186 : vector<1x32xf32>
    %188 = arith.mulf %184, %184 : vector<1x32xf32>
    %189 = arith.subf %187, %188 : vector<1x32xf32>
    %cst_105 = arith.constant 0.000000e+00 : f32
    %190 = vector.broadcast %cst_105 : f32 to vector<1x32xf32>
    %191 = arith.maximumf %189, %190 : vector<1x32xf32>
    %192 = vector.broadcast %184 : vector<1x32xf32> to vector<4x32xf32>
    %193 = arith.subf %173, %192 : vector<4x32xf32>
    %cst_106 = arith.constant 9.99999974E-6 : f32
    %194 = vector.broadcast %cst_106 : f32 to vector<1x32xf32>
    %195 = arith.addf %191, %194 : vector<1x32xf32>
    %196 = math.rsqrt %195 : vector<1x32xf32>
    %197 = vector.extract_strided_slice %170 {offsets = [1, 0], sizes = [1, 32], strides = [1, 1]} : vector<3x32xf32> to vector<1x32xf32>
    %198 = arith.mulf %196, %197 : vector<1x32xf32>
    %199 = vector.broadcast %198 : vector<1x32xf32> to vector<4x32xf32>
    %200 = arith.mulf %193, %199 : vector<4x32xf32>
    %201 = vector.extract_strided_slice %170 {offsets = [2, 0], sizes = [1, 32], strides = [1, 1]} : vector<3x32xf32> to vector<1x32xf32>
    %202 = vector.broadcast %201 : vector<1x32xf32> to vector<4x32xf32>
    %203 = arith.addf %200, %202 : vector<4x32xf32>
    %cst_107 = arith.constant 0.000000e+00 : f32
    %204 = vector.broadcast %cst_107 : f32 to vector<4x32xf32>
    %205 = arith.cmpf oge, %203, %204 : vector<4x32xf32>
    %cst_108 = arith.constant 1.000000e-01 : f32
    %206 = vector.broadcast %cst_108 : f32 to vector<4x32xf32>
    %207 = arith.mulf %206, %203 : vector<4x32xf32>
    %208 = arith.select %205, %203, %207 : vector<4x32xi1>, vector<4x32xf32>
    %209 = vector.extract_strided_slice %208 {offsets = [0, 0], sizes = [3, 32], strides = [1, 1]} : vector<4x32xf32> to vector<3x32xf32>
    %210 = vector.extract_strided_slice %208 {offsets = [1, 0], sizes = [3, 32], strides = [1, 1]} : vector<4x32xf32> to vector<3x32xf32>
    %211 = arith.maximumf %209, %210 : vector<3x32xf32>
    %c0_109 = arith.constant 0 : index
    %c0_110 = arith.constant 0 : index
    %212 = vector.load %arg13[%c0_109, %c0_110] : memref<2x3xf32, #tpu.memory_space<vmem>>, vector<2x3xf32>
    %cst_111 = arith.constant dense<0.000000e+00> : vector<2x32xf32>
    %213 = tpu.matmul %212, %211, %cst_111 {dimension_numbers = #tpu.dot_dimension_numbers<[1], [0], [0], [1], [0, 0, 1, 1], [], []>} : vector<2x3xf32>, vector<3x32xf32>, vector<2x32xf32> -> vector<2x32xf32>
    %214 = vector.extract_strided_slice %213 {offsets = [0, 0], sizes = [2, 31], strides = [1, 1]} : vector<2x32xf32> to vector<2x31xf32>
    %215 = vector.extract_strided_slice %213 {offsets = [0, 1], sizes = [2, 31], strides = [1, 1]} : vector<2x32xf32> to vector<2x31xf32>
    %216 = arith.maximumf %214, %215 : vector<2x31xf32>
    %c0_112 = arith.constant 0 : index
    %c0_113 = arith.constant 0 : index
    %217 = vector.load %arg14[%c0_112, %c0_113] : memref<31x16xf32, #tpu.memory_space<vmem>>, vector<31x16xf32>
    %cst_114 = arith.constant dense<0.000000e+00> : vector<2x16xf32>
    %218 = tpu.matmul %216, %217, %cst_114 {dimension_numbers = #tpu.dot_dimension_numbers<[1], [0], [0], [1], [0, 0, 1, 1], [], []>} : vector<2x31xf32>, vector<31x16xf32>, vector<2x16xf32> -> vector<2x16xf32>
    %219 = vector.extract_strided_slice %218 {offsets = [0, 0], sizes = [1, 16], strides = [1, 1]} : vector<2x16xf32> to vector<1x16xf32>
    %220 = vector.extract_strided_slice %218 {offsets = [1, 0], sizes = [1, 16], strides = [1, 1]} : vector<2x16xf32> to vector<1x16xf32>
    %221 = tpu.concatenate %219, %220 in 1 : vector<1x16xf32>, vector<1x16xf32> -> vector<1x32xf32>
    %c0_115 = arith.constant 0 : index
    %c0_116 = arith.constant 0 : index
    %222 = vector.load %arg18[%c0_115, %c0_116] : memref<32x8xf32, #tpu.memory_space<vmem>>, vector<32x8xf32>
    %cst_117 = arith.constant dense<0.000000e+00> : vector<1x8xf32>
    %223 = tpu.matmul %221, %222, %cst_117 {dimension_numbers = #tpu.dot_dimension_numbers<[1], [0], [0], [1], [0, 0, 1, 1], [], []>} : vector<1x32xf32>, vector<32x8xf32>, vector<1x8xf32> -> vector<1x8xf32>
    %c0_118 = arith.constant 0 : index
    %c0_119 = arith.constant 0 : index
    %224 = vector.load %arg19[%c0_118, %c0_119] : memref<1x8xf32, #tpu.memory_space<vmem>>, vector<1x8xf32>
    %225 = arith.addf %223, %224 : vector<1x8xf32>
    %c0_120 = arith.constant 0 : index
    %c0_121 = arith.constant 0 : index
    %226 = vector.load %arg20[%c0_120, %c0_121] : memref<8x1024xf32, #tpu.memory_space<vmem>>, vector<8x1024xf32>
    %cst_122 = arith.constant dense<0.000000e+00> : vector<1x1024xf32>
    %227 = tpu.matmul %225, %226, %cst_122 {dimension_numbers = #tpu.dot_dimension_numbers<[1], [0], [0], [1], [0, 0, 1, 1], [], []>} : vector<1x8xf32>, vector<8x1024xf32>, vector<1x1024xf32> -> vector<1x1024xf32>
    %c0_123 = arith.constant 0 : index
    %c0_124 = arith.constant 0 : index
    %228 = vector.load %arg21[%c0_123, %c0_124] : memref<1x1024xf32, #tpu.memory_space<vmem>>, vector<1x1024xf32>
    %229 = arith.addf %227, %228 : vector<1x1024xf32>
    %230 = vector.extract_strided_slice %229 {offsets = [0, 0], sizes = [1, 128], strides = [1, 1]} : vector<1x1024xf32> to vector<1x128xf32>
    %231 = vector.extract_strided_slice %229 {offsets = [0, 128], sizes = [1, 128], strides = [1, 1]} : vector<1x1024xf32> to vector<1x128xf32>
    %232 = vector.extract_strided_slice %229 {offsets = [0, 256], sizes = [1, 128], strides = [1, 1]} : vector<1x1024xf32> to vector<1x128xf32>
    %233 = vector.extract_strided_slice %229 {offsets = [0, 384], sizes = [1, 128], strides = [1, 1]} : vector<1x1024xf32> to vector<1x128xf32>
    %234 = vector.extract_strided_slice %229 {offsets = [0, 512], sizes = [1, 128], strides = [1, 1]} : vector<1x1024xf32> to vector<1x128xf32>
    %235 = vector.extract_strided_slice %229 {offsets = [0, 640], sizes = [1, 128], strides = [1, 1]} : vector<1x1024xf32> to vector<1x128xf32>
    %236 = vector.extract_strided_slice %229 {offsets = [0, 768], sizes = [1, 128], strides = [1, 1]} : vector<1x1024xf32> to vector<1x128xf32>
    %237 = vector.extract_strided_slice %229 {offsets = [0, 896], sizes = [1, 128], strides = [1, 1]} : vector<1x1024xf32> to vector<1x128xf32>
    %238 = tpu.concatenate %230, %231, %232, %233, %234, %235, %236, %237 in 0 : vector<1x128xf32>, vector<1x128xf32>, vector<1x128xf32>, vector<1x128xf32>, vector<1x128xf32>, vector<1x128xf32>, vector<1x128xf32>, vector<1x128xf32> -> vector<8x128xf32>
    %cst_125 = arith.constant 0.000000e+00 : f32
    %239 = vector.broadcast %cst_125 : f32 to vector<1x128xf32>
    %240 = vector.extract_strided_slice %238 {offsets = [0, 0], sizes = [7, 128], strides = [1, 1]} : vector<8x128xf32> to vector<7x128xf32>
    %241 = tpu.concatenate %239, %240 in 0 : vector<1x128xf32>, vector<7x128xf32> -> vector<8x128xf32>
    %242 = vector.extract_strided_slice %238 {offsets = [1, 0], sizes = [7, 128], strides = [1, 1]} : vector<8x128xf32> to vector<7x128xf32>
    %243 = tpu.concatenate %242, %239 in 0 : vector<7x128xf32>, vector<1x128xf32> -> vector<8x128xf32>
    %c0_126 = arith.constant 0 : index
    %c0_127 = arith.constant 0 : index
    %c0_128 = arith.constant 0 : index
    %244 = vector.load %arg22[%c0_126, %c0_127, %c0_128] : memref<3x128x64xf32, #tpu.memory_space<vmem>>, vector<1x128x64xf32>
    %245 = vector.shape_cast %244 : vector<1x128x64xf32> to vector<128x64xf32>
    %cst_129 = arith.constant dense<0.000000e+00> : vector<8x64xf32>
    %246 = tpu.matmul %241, %245, %cst_129 {dimension_numbers = #tpu.dot_dimension_numbers<[1], [0], [0], [1], [0, 0, 1, 1], [], []>} : vector<8x128xf32>, vector<128x64xf32>, vector<8x64xf32> -> vector<8x64xf32>
    %c1_130 = arith.constant 1 : index
    %c0_131 = arith.constant 0 : index
    %c0_132 = arith.constant 0 : index
    %247 = vector.load %arg22[%c1_130, %c0_131, %c0_132] : memref<3x128x64xf32, #tpu.memory_space<vmem>>, vector<1x128x64xf32>
    %248 = vector.shape_cast %247 : vector<1x128x64xf32> to vector<128x64xf32>
    %cst_133 = arith.constant dense<0.000000e+00> : vector<8x64xf32>
    %249 = tpu.matmul %238, %248, %cst_133 {dimension_numbers = #tpu.dot_dimension_numbers<[1], [0], [0], [1], [0, 0, 1, 1], [], []>} : vector<8x128xf32>, vector<128x64xf32>, vector<8x64xf32> -> vector<8x64xf32>
    %250 = arith.addf %246, %249 : vector<8x64xf32>
    %c2_134 = arith.constant 2 : index
    %c0_135 = arith.constant 0 : index
    %c0_136 = arith.constant 0 : index
    %251 = vector.load %arg22[%c2_134, %c0_135, %c0_136] : memref<3x128x64xf32, #tpu.memory_space<vmem>>, vector<1x128x64xf32>
    %252 = vector.shape_cast %251 : vector<1x128x64xf32> to vector<128x64xf32>
    %cst_137 = arith.constant dense<0.000000e+00> : vector<8x64xf32>
    %253 = tpu.matmul %243, %252, %cst_137 {dimension_numbers = #tpu.dot_dimension_numbers<[1], [0], [0], [1], [0, 0, 1, 1], [], []>} : vector<8x128xf32>, vector<128x64xf32>, vector<8x64xf32> -> vector<8x64xf32>
    %254 = arith.addf %250, %253 : vector<8x64xf32>
    %c0_138 = arith.constant 0 : index
    %c0_139 = arith.constant 0 : index
    %255 = vector.load %arg23[%c0_138, %c0_139] : memref<3x64xf32, #tpu.memory_space<vmem>>, vector<3x64xf32>
    %256 = vector.extract_strided_slice %255 {offsets = [0, 0], sizes = [1, 64], strides = [1, 1]} : vector<3x64xf32> to vector<1x64xf32>
    %257 = vector.broadcast %256 : vector<1x64xf32> to vector<8x64xf32>
    %258 = arith.addf %254, %257 : vector<8x64xf32>
    %cst_140 = arith.constant dense<0.000000e+00> : vector<64xf32>
    %259 = vector.multi_reduction <add>, %258, %cst_140 [0] : vector<8x64xf32> to vector<64xf32>
    %260 = vector.shape_cast %259 : vector<64xf32> to vector<1x64xf32>
    %261 = arith.mulf %258, %258 : vector<8x64xf32>
    %cst_141 = arith.constant dense<0.000000e+00> : vector<64xf32>
    %262 = vector.multi_reduction <add>, %261, %cst_141 [0] : vector<8x64xf32> to vector<64xf32>
    %263 = vector.shape_cast %262 : vector<64xf32> to vector<1x64xf32>
    %264 = tpu.concatenate %260, %263 in 0 : vector<1x64xf32>, vector<1x64xf32> -> vector<2x64xf32>
    %c0_142 = arith.constant 0 : index
    %c0_143 = arith.constant 0 : index
    %265 = vector.load %arg30[%c0_142, %c0_143] : memref<64x64xf32, #tpu.memory_space<vmem>>, vector<64x64xf32>
    %cst_144 = arith.constant dense<0.000000e+00> : vector<2x64xf32>
    %266 = tpu.matmul %264, %265, %cst_144 {dimension_numbers = #tpu.dot_dimension_numbers<[1], [0], [0], [1], [0, 0, 1, 1], [], []>} : vector<2x64xf32>, vector<64x64xf32>, vector<2x64xf32> -> vector<2x64xf32>
    %267 = vector.extract_strided_slice %266 {offsets = [0, 0], sizes = [1, 64], strides = [1, 1]} : vector<2x64xf32> to vector<1x64xf32>
    %cst_145 = arith.constant 7.812500e-03 : f32
    %268 = vector.broadcast %cst_145 : f32 to vector<1x64xf32>
    %269 = arith.mulf %267, %268 : vector<1x64xf32>
    %270 = vector.extract_strided_slice %266 {offsets = [1, 0], sizes = [1, 64], strides = [1, 1]} : vector<2x64xf32> to vector<1x64xf32>
    %cst_146 = arith.constant 7.812500e-03 : f32
    %271 = vector.broadcast %cst_146 : f32 to vector<1x64xf32>
    %272 = arith.mulf %270, %271 : vector<1x64xf32>
    %273 = arith.mulf %269, %269 : vector<1x64xf32>
    %274 = arith.subf %272, %273 : vector<1x64xf32>
    %cst_147 = arith.constant 0.000000e+00 : f32
    %275 = vector.broadcast %cst_147 : f32 to vector<1x64xf32>
    %276 = arith.maximumf %274, %275 : vector<1x64xf32>
    %277 = vector.broadcast %269 : vector<1x64xf32> to vector<8x64xf32>
    %278 = arith.subf %258, %277 : vector<8x64xf32>
    %cst_148 = arith.constant 9.99999974E-6 : f32
    %279 = vector.broadcast %cst_148 : f32 to vector<1x64xf32>
    %280 = arith.addf %276, %279 : vector<1x64xf32>
    %281 = math.rsqrt %280 : vector<1x64xf32>
    %282 = vector.extract_strided_slice %255 {offsets = [1, 0], sizes = [1, 64], strides = [1, 1]} : vector<3x64xf32> to vector<1x64xf32>
    %283 = arith.mulf %281, %282 : vector<1x64xf32>
    %284 = vector.broadcast %283 : vector<1x64xf32> to vector<8x64xf32>
    %285 = arith.mulf %278, %284 : vector<8x64xf32>
    %286 = vector.extract_strided_slice %255 {offsets = [2, 0], sizes = [1, 64], strides = [1, 1]} : vector<3x64xf32> to vector<1x64xf32>
    %287 = vector.broadcast %286 : vector<1x64xf32> to vector<8x64xf32>
    %288 = arith.addf %285, %287 : vector<8x64xf32>
    %cst_149 = arith.constant 0.000000e+00 : f32
    %289 = vector.broadcast %cst_149 : f32 to vector<8x64xf32>
    %290 = arith.cmpf oge, %288, %289 : vector<8x64xf32>
    %cst_150 = arith.constant 1.000000e-01 : f32
    %291 = vector.broadcast %cst_150 : f32 to vector<8x64xf32>
    %292 = arith.mulf %291, %288 : vector<8x64xf32>
    %293 = arith.select %290, %288, %292 : vector<8x64xi1>, vector<8x64xf32>
    %c0_151 = arith.constant 0 : index
    %c0_152 = arith.constant 0 : index
    %294 = vector.load %arg34[%c0_151, %c0_152] : memref<64x128xf32, #tpu.memory_space<vmem>>, vector<64x128xf32>
    %cst_153 = arith.constant dense<0.000000e+00> : vector<8x128xf32>
    %295 = tpu.matmul %293, %294, %cst_153 {dimension_numbers = #tpu.dot_dimension_numbers<[1], [0], [0], [1], [0, 0, 1, 1], [], []>} : vector<8x64xf32>, vector<64x128xf32>, vector<8x128xf32> -> vector<8x128xf32>
    %c0_154 = arith.constant 0 : index
    %c0_155 = arith.constant 0 : index
    %296 = vector.load %arg33[%c0_154, %c0_155] : memref<16x8xf32, #tpu.memory_space<vmem>>, vector<16x8xf32>
    %cst_156 = arith.constant dense<0.000000e+00> : vector<16x128xf32>
    %297 = tpu.matmul %296, %295, %cst_156 {dimension_numbers = #tpu.dot_dimension_numbers<[1], [0], [0], [1], [0, 0, 1, 1], [], []>} : vector<16x8xf32>, vector<8x128xf32>, vector<16x128xf32> -> vector<16x128xf32>
    %cst_157 = arith.constant 0.000000e+00 : f32
    %298 = vector.broadcast %cst_157 : f32 to vector<1x128xf32>
    %299 = vector.extract_strided_slice %297 {offsets = [0, 0], sizes = [15, 128], strides = [1, 1]} : vector<16x128xf32> to vector<15x128xf32>
    %300 = tpu.concatenate %298, %299 in 0 : vector<1x128xf32>, vector<15x128xf32> -> vector<16x128xf32>
    %301 = vector.extract_strided_slice %297 {offsets = [1, 0], sizes = [15, 128], strides = [1, 1]} : vector<16x128xf32> to vector<15x128xf32>
    %302 = tpu.concatenate %301, %298 in 0 : vector<15x128xf32>, vector<1x128xf32> -> vector<16x128xf32>
    %c0_158 = arith.constant 0 : index
    %c0_159 = arith.constant 0 : index
    %c0_160 = arith.constant 0 : index
    %303 = vector.load %arg24[%c0_158, %c0_159, %c0_160] : memref<3x128x64xf32, #tpu.memory_space<vmem>>, vector<1x128x64xf32>
    %304 = vector.shape_cast %303 : vector<1x128x64xf32> to vector<128x64xf32>
    %cst_161 = arith.constant dense<0.000000e+00> : vector<16x64xf32>
    %305 = tpu.matmul %300, %304, %cst_161 {dimension_numbers = #tpu.dot_dimension_numbers<[1], [0], [0], [1], [0, 0, 1, 1], [], []>} : vector<16x128xf32>, vector<128x64xf32>, vector<16x64xf32> -> vector<16x64xf32>
    %c1_162 = arith.constant 1 : index
    %c0_163 = arith.constant 0 : index
    %c0_164 = arith.constant 0 : index
    %306 = vector.load %arg24[%c1_162, %c0_163, %c0_164] : memref<3x128x64xf32, #tpu.memory_space<vmem>>, vector<1x128x64xf32>
    %307 = vector.shape_cast %306 : vector<1x128x64xf32> to vector<128x64xf32>
    %cst_165 = arith.constant dense<0.000000e+00> : vector<16x64xf32>
    %308 = tpu.matmul %297, %307, %cst_165 {dimension_numbers = #tpu.dot_dimension_numbers<[1], [0], [0], [1], [0, 0, 1, 1], [], []>} : vector<16x128xf32>, vector<128x64xf32>, vector<16x64xf32> -> vector<16x64xf32>
    %309 = arith.addf %305, %308 : vector<16x64xf32>
    %c2_166 = arith.constant 2 : index
    %c0_167 = arith.constant 0 : index
    %c0_168 = arith.constant 0 : index
    %310 = vector.load %arg24[%c2_166, %c0_167, %c0_168] : memref<3x128x64xf32, #tpu.memory_space<vmem>>, vector<1x128x64xf32>
    %311 = vector.shape_cast %310 : vector<1x128x64xf32> to vector<128x64xf32>
    %cst_169 = arith.constant dense<0.000000e+00> : vector<16x64xf32>
    %312 = tpu.matmul %302, %311, %cst_169 {dimension_numbers = #tpu.dot_dimension_numbers<[1], [0], [0], [1], [0, 0, 1, 1], [], []>} : vector<16x128xf32>, vector<128x64xf32>, vector<16x64xf32> -> vector<16x64xf32>
    %313 = arith.addf %309, %312 : vector<16x64xf32>
    %c0_170 = arith.constant 0 : index
    %c0_171 = arith.constant 0 : index
    %314 = vector.load %arg25[%c0_170, %c0_171] : memref<3x64xf32, #tpu.memory_space<vmem>>, vector<3x64xf32>
    %315 = vector.extract_strided_slice %314 {offsets = [0, 0], sizes = [1, 64], strides = [1, 1]} : vector<3x64xf32> to vector<1x64xf32>
    %316 = vector.broadcast %315 : vector<1x64xf32> to vector<16x64xf32>
    %317 = arith.addf %313, %316 : vector<16x64xf32>
    %cst_172 = arith.constant dense<0.000000e+00> : vector<64xf32>
    %318 = vector.multi_reduction <add>, %317, %cst_172 [0] : vector<16x64xf32> to vector<64xf32>
    %319 = vector.shape_cast %318 : vector<64xf32> to vector<1x64xf32>
    %320 = arith.mulf %317, %317 : vector<16x64xf32>
    %cst_173 = arith.constant dense<0.000000e+00> : vector<64xf32>
    %321 = vector.multi_reduction <add>, %320, %cst_173 [0] : vector<16x64xf32> to vector<64xf32>
    %322 = vector.shape_cast %321 : vector<64xf32> to vector<1x64xf32>
    %323 = tpu.concatenate %319, %322 in 0 : vector<1x64xf32>, vector<1x64xf32> -> vector<2x64xf32>
    %c0_174 = arith.constant 0 : index
    %c0_175 = arith.constant 0 : index
    %324 = vector.load %arg31[%c0_174, %c0_175] : memref<64x64xf32, #tpu.memory_space<vmem>>, vector<64x64xf32>
    %cst_176 = arith.constant dense<0.000000e+00> : vector<2x64xf32>
    %325 = tpu.matmul %323, %324, %cst_176 {dimension_numbers = #tpu.dot_dimension_numbers<[1], [0], [0], [1], [0, 0, 1, 1], [], []>} : vector<2x64xf32>, vector<64x64xf32>, vector<2x64xf32> -> vector<2x64xf32>
    %326 = vector.extract_strided_slice %325 {offsets = [0, 0], sizes = [1, 64], strides = [1, 1]} : vector<2x64xf32> to vector<1x64xf32>
    %cst_177 = arith.constant 0.001953125 : f32
    %327 = vector.broadcast %cst_177 : f32 to vector<1x64xf32>
    %328 = arith.mulf %326, %327 : vector<1x64xf32>
    %329 = vector.extract_strided_slice %325 {offsets = [1, 0], sizes = [1, 64], strides = [1, 1]} : vector<2x64xf32> to vector<1x64xf32>
    %cst_178 = arith.constant 0.001953125 : f32
    %330 = vector.broadcast %cst_178 : f32 to vector<1x64xf32>
    %331 = arith.mulf %329, %330 : vector<1x64xf32>
    %332 = arith.mulf %328, %328 : vector<1x64xf32>
    %333 = arith.subf %331, %332 : vector<1x64xf32>
    %cst_179 = arith.constant 0.000000e+00 : f32
    %334 = vector.broadcast %cst_179 : f32 to vector<1x64xf32>
    %335 = arith.maximumf %333, %334 : vector<1x64xf32>
    %336 = vector.broadcast %328 : vector<1x64xf32> to vector<16x64xf32>
    %337 = arith.subf %317, %336 : vector<16x64xf32>
    %cst_180 = arith.constant 9.99999974E-6 : f32
    %338 = vector.broadcast %cst_180 : f32 to vector<1x64xf32>
    %339 = arith.addf %335, %338 : vector<1x64xf32>
    %340 = math.rsqrt %339 : vector<1x64xf32>
    %341 = vector.extract_strided_slice %314 {offsets = [1, 0], sizes = [1, 64], strides = [1, 1]} : vector<3x64xf32> to vector<1x64xf32>
    %342 = arith.mulf %340, %341 : vector<1x64xf32>
    %343 = vector.broadcast %342 : vector<1x64xf32> to vector<16x64xf32>
    %344 = arith.mulf %337, %343 : vector<16x64xf32>
    %345 = vector.extract_strided_slice %314 {offsets = [2, 0], sizes = [1, 64], strides = [1, 1]} : vector<3x64xf32> to vector<1x64xf32>
    %346 = vector.broadcast %345 : vector<1x64xf32> to vector<16x64xf32>
    %347 = arith.addf %344, %346 : vector<16x64xf32>
    %cst_181 = arith.constant 0.000000e+00 : f32
    %348 = vector.broadcast %cst_181 : f32 to vector<16x64xf32>
    %349 = arith.cmpf oge, %347, %348 : vector<16x64xf32>
    %cst_182 = arith.constant 1.000000e-01 : f32
    %350 = vector.broadcast %cst_182 : f32 to vector<16x64xf32>
    %351 = arith.mulf %350, %347 : vector<16x64xf32>
    %352 = arith.select %349, %347, %351 : vector<16x64xi1>, vector<16x64xf32>
    %c0_183 = arith.constant 0 : index
    %c0_184 = arith.constant 0 : index
    %353 = vector.load %arg36[%c0_183, %c0_184] : memref<64x128xf32, #tpu.memory_space<vmem>>, vector<64x128xf32>
    %cst_185 = arith.constant dense<0.000000e+00> : vector<16x128xf32>
    %354 = tpu.matmul %352, %353, %cst_185 {dimension_numbers = #tpu.dot_dimension_numbers<[1], [0], [0], [1], [0, 0, 1, 1], [], []>} : vector<16x64xf32>, vector<64x128xf32>, vector<16x128xf32> -> vector<16x128xf32>
    %c0_186 = arith.constant 0 : index
    %c0_187 = arith.constant 0 : index
    %355 = vector.load %arg35[%c0_186, %c0_187] : memref<32x16xf32, #tpu.memory_space<vmem>>, vector<32x16xf32>
    %cst_188 = arith.constant dense<0.000000e+00> : vector<32x128xf32>
    %356 = tpu.matmul %355, %354, %cst_188 {dimension_numbers = #tpu.dot_dimension_numbers<[1], [0], [0], [1], [0, 0, 1, 1], [], []>} : vector<32x16xf32>, vector<16x128xf32>, vector<32x128xf32> -> vector<32x128xf32>
    %c0_189 = arith.constant 0 : index
    %c0_190 = arith.constant 0 : index
    %357 = vector.load %arg26[%c0_189, %c0_190] : memref<128x128xf32, #tpu.memory_space<vmem>>, vector<128x128xf32>
    %cst_191 = arith.constant dense<0.000000e+00> : vector<32x128xf32>
    %358 = tpu.matmul %356, %357, %cst_191 {dimension_numbers = #tpu.dot_dimension_numbers<[1], [0], [0], [1], [0, 0, 1, 1], [], []>} : vector<32x128xf32>, vector<128x128xf32>, vector<32x128xf32> -> vector<32x128xf32>
    %c0_192 = arith.constant 0 : index
    %c0_193 = arith.constant 0 : index
    %359 = vector.load %arg27[%c0_192, %c0_193] : memref<3x128xf32, #tpu.memory_space<vmem>>, vector<3x128xf32>
    %360 = vector.extract_strided_slice %359 {offsets = [0, 0], sizes = [1, 128], strides = [1, 1]} : vector<3x128xf32> to vector<1x128xf32>
    %361 = vector.broadcast %360 : vector<1x128xf32> to vector<32x128xf32>
    %362 = arith.addf %358, %361 : vector<32x128xf32>
    %cst_194 = arith.constant dense<0.000000e+00> : vector<128xf32>
    %363 = vector.multi_reduction <add>, %362, %cst_194 [0] : vector<32x128xf32> to vector<128xf32>
    %364 = vector.shape_cast %363 : vector<128xf32> to vector<1x128xf32>
    %365 = arith.mulf %362, %362 : vector<32x128xf32>
    %cst_195 = arith.constant dense<0.000000e+00> : vector<128xf32>
    %366 = vector.multi_reduction <add>, %365, %cst_195 [0] : vector<32x128xf32> to vector<128xf32>
    %367 = vector.shape_cast %366 : vector<128xf32> to vector<1x128xf32>
    %368 = tpu.concatenate %364, %367 in 0 : vector<1x128xf32>, vector<1x128xf32> -> vector<2x128xf32>
    %c0_196 = arith.constant 0 : index
    %c0_197 = arith.constant 0 : index
    %369 = vector.load %arg32[%c0_196, %c0_197] : memref<128x128xf32, #tpu.memory_space<vmem>>, vector<128x128xf32>
    %cst_198 = arith.constant dense<0.000000e+00> : vector<2x128xf32>
    %370 = tpu.matmul %368, %369, %cst_198 {dimension_numbers = #tpu.dot_dimension_numbers<[1], [0], [0], [1], [0, 0, 1, 1], [], []>} : vector<2x128xf32>, vector<128x128xf32>, vector<2x128xf32> -> vector<2x128xf32>
    %371 = vector.extract_strided_slice %370 {offsets = [0, 0], sizes = [1, 128], strides = [1, 1]} : vector<2x128xf32> to vector<1x128xf32>
    %cst_199 = arith.constant 4.8828125E-4 : f32
    %372 = vector.broadcast %cst_199 : f32 to vector<1x128xf32>
    %373 = arith.mulf %371, %372 : vector<1x128xf32>
    %374 = vector.extract_strided_slice %370 {offsets = [1, 0], sizes = [1, 128], strides = [1, 1]} : vector<2x128xf32> to vector<1x128xf32>
    %cst_200 = arith.constant 4.8828125E-4 : f32
    %375 = vector.broadcast %cst_200 : f32 to vector<1x128xf32>
    %376 = arith.mulf %374, %375 : vector<1x128xf32>
    %377 = arith.mulf %373, %373 : vector<1x128xf32>
    %378 = arith.subf %376, %377 : vector<1x128xf32>
    %cst_201 = arith.constant 0.000000e+00 : f32
    %379 = vector.broadcast %cst_201 : f32 to vector<1x128xf32>
    %380 = arith.maximumf %378, %379 : vector<1x128xf32>
    %381 = vector.broadcast %373 : vector<1x128xf32> to vector<32x128xf32>
    %382 = arith.subf %362, %381 : vector<32x128xf32>
    %cst_202 = arith.constant 9.99999974E-6 : f32
    %383 = vector.broadcast %cst_202 : f32 to vector<1x128xf32>
    %384 = arith.addf %380, %383 : vector<1x128xf32>
    %385 = math.rsqrt %384 : vector<1x128xf32>
    %386 = vector.extract_strided_slice %359 {offsets = [1, 0], sizes = [1, 128], strides = [1, 1]} : vector<3x128xf32> to vector<1x128xf32>
    %387 = arith.mulf %385, %386 : vector<1x128xf32>
    %388 = vector.broadcast %387 : vector<1x128xf32> to vector<32x128xf32>
    %389 = arith.mulf %382, %388 : vector<32x128xf32>
    %390 = vector.extract_strided_slice %359 {offsets = [2, 0], sizes = [1, 128], strides = [1, 1]} : vector<3x128xf32> to vector<1x128xf32>
    %391 = vector.broadcast %390 : vector<1x128xf32> to vector<32x128xf32>
    %392 = arith.addf %389, %391 : vector<32x128xf32>
    %cst_203 = arith.constant 0.000000e+00 : f32
    %393 = vector.broadcast %cst_203 : f32 to vector<32x128xf32>
    %394 = arith.cmpf oge, %392, %393 : vector<32x128xf32>
    %cst_204 = arith.constant 1.000000e-01 : f32
    %395 = vector.broadcast %cst_204 : f32 to vector<32x128xf32>
    %396 = arith.mulf %395, %392 : vector<32x128xf32>
    %397 = arith.select %394, %392, %396 : vector<32x128xi1>, vector<32x128xf32>
    %c0_205 = arith.constant 0 : index
    %c0_206 = arith.constant 0 : index
    %398 = vector.load %arg38[%c0_205, %c0_206] : memref<128x256xf32, #tpu.memory_space<vmem>>, vector<128x256xf32>
    %cst_207 = arith.constant dense<0.000000e+00> : vector<32x256xf32>
    %399 = tpu.matmul %397, %398, %cst_207 {dimension_numbers = #tpu.dot_dimension_numbers<[1], [0], [0], [1], [0, 0, 1, 1], [], []>} : vector<32x128xf32>, vector<128x256xf32>, vector<32x256xf32> -> vector<32x256xf32>
    %c0_208 = arith.constant 0 : index
    %c0_209 = arith.constant 0 : index
    %400 = vector.load %arg37[%c0_208, %c0_209] : memref<64x32xf32, #tpu.memory_space<vmem>>, vector<64x32xf32>
    %cst_210 = arith.constant dense<0.000000e+00> : vector<64x256xf32>
    %401 = tpu.matmul %400, %399, %cst_210 {dimension_numbers = #tpu.dot_dimension_numbers<[1], [0], [0], [1], [0, 0, 1, 1], [], []>} : vector<64x32xf32>, vector<32x256xf32>, vector<64x256xf32> -> vector<64x256xf32>
    %c0_211 = arith.constant 0 : index
    %c0_212 = arith.constant 0 : index
    %402 = vector.load %arg28[%c0_211, %c0_212] : memref<256x128xf32, #tpu.memory_space<vmem>>, vector<256x128xf32>
    %cst_213 = arith.constant dense<0.000000e+00> : vector<64x128xf32>
    %403 = tpu.matmul %401, %402, %cst_213 {dimension_numbers = #tpu.dot_dimension_numbers<[1], [0], [0], [1], [0, 0, 1, 1], [], []>} : vector<64x256xf32>, vector<256x128xf32>, vector<64x128xf32> -> vector<64x128xf32>
    %c0_214 = arith.constant 0 : index
    %c0_215 = arith.constant 0 : index
    %404 = vector.load %arg29[%c0_214, %c0_215] : memref<1x128xf32, #tpu.memory_space<vmem>>, vector<1x128xf32>
    %405 = vector.broadcast %404 : vector<1x128xf32> to vector<64x128xf32>
    %406 = arith.addf %403, %405 : vector<64x128xf32>
    %cst_216 = arith.constant 0.000000e+00 : f32
    %407 = vector.broadcast %cst_216 : f32 to vector<64x128xf32>
    %408 = arith.subf %407, %406 : vector<64x128xf32>
    %409 = math.exp %408 : vector<64x128xf32>
    %cst_217 = arith.constant 1.000000e+00 : f32
    %410 = vector.broadcast %cst_217 : f32 to vector<64x128xf32>
    %411 = arith.addf %410, %409 : vector<64x128xf32>
    %cst_218 = arith.constant 1.000000e+00 : f32
    %412 = vector.broadcast %cst_218 : f32 to vector<64x128xf32>
    %413 = arith.divf %412, %411 : vector<64x128xf32>
    %c0_219 = arith.constant 0 : index
    %c0_220 = arith.constant 0 : index
    %414 = vector.load %arg39[%c0_219, %c0_220] : memref<64x128xf32, #tpu.memory_space<vmem>>, vector<64x128xf32>
    tpu.vector_store %arg39[%c0_219, %c0_220], %413 {strides = array<i32>} : memref<64x128xf32, #tpu.memory_space<vmem>>, vector<64x128xf32>,
    return
  }
}

</mosaic_0001>

<bundles_post_ra>
// kernel: fwinet_forward.1
= control target key start
LH: loop header
LB: loop body
LE: loop exit
PB: predicated region body
PF: predicated region fallthrough
CT: control target
= control target key end

     0   :  { %s6294_s6 = smov 1   ;;  %s6295_s10 = smov 2   ;;  %s7284_s0 = inlined_call_operand.smem [shape: u32[40], index: -1, kind: input, shape index: {}] }
   0x1   :  { %s6366_s5 = sld [smem:[%s7284_s0]]   ;;  %s6296_s14 = smov 3  }
   0x2   :  { %s6371_s9 = sld [smem:[%s7284_s0 + %s6294_s6]]   ;;  %s6297_s18 = smov 4  }
   0x3   :  { %s6376_s13 = sld [smem:[%s7284_s0 + %s6295_s10]]   ;;  %s6298_s22 = smov 5  }
   0x4   :  { %s6381_s17 = sld [smem:[%s7284_s0 + %s6296_s14]]   ;;  %s6299_s26 = smov 6  }
   0x5   :  { %s6386_s21 = sld [smem:[%s7284_s0 + %s6297_s18]]   ;;  %s6300_s30 = smov 7  }
   0x6   :  { %s6391_s25 = sld [smem:[%s7284_s0 + %s6298_s22]]   ;;  %s6301_s4 = smov 8  }
   0x7   :  { %s6396_s29 = sld [smem:[%s7284_s0 + %s6299_s26]]   ;;  %s6302_s10 = smov 9  }
   0x8   :  { %7303 = sst [smem:[#allocation43_spill]] %s6371_s9  ;;  %s6303_s15 = smov 10  }
   0x9   :  { %s6401_s3 = sld [smem:[%s7284_s0 + %s6300_s30]]   ;;  %s6304_s20 = smov 11  }
   0xa   :  { %7304 = sst [smem:[#allocation44_spill]] %s6381_s17  ;;  %s6305_s26 = smov 12  }
   0xb   :  { %s6406_s8 = sld [smem:[%s7284_s0 + %s6301_s4]]   ;;  %s6306_s1 = smov 13  }
   0xc   :  { %7305 = sst [smem:[#allocation45_spill]] %s6391_s25  ;;  %s6307_s7 = smov 14  }
   0xd   :  { %s6411_s14 = sld [smem:[%s7284_s0 + %s6302_s10]]   ;;  %s6309_s22 = smov 16  }
   0xe   :  { %s6416_s19 = sld [smem:[%s7284_s0 + %s6303_s15]]   ;;  %s6308_s15 = smov 15  }
   0xf   :  { %s6421_s24 = sld [smem:[%s7284_s0 + %s6304_s20]]   ;;  %s6310_s28 = smov 17  }
  0x10   :  { %s6426_s30 = sld [smem:[%s7284_s0 + %s6305_s26]]  }
  0x11   :  { %s6431_s6 = sld [smem:[%s7284_s0 + %s6306_s1]]  }
  0x12   :  { %s6436_s12 = sld [smem:[%s7284_s0 + %s6307_s7]]   ;;  %s6311_s7 = smov 18  }
  0x13   :  { %s6441_s20 = sld [smem:[%s7284_s0 + %s6308_s15]]   ;;  %s6312_s15 = smov 19  }
  0x14   :  { %7306 = sst [smem:[#allocation46_spill]] %s6416_s19 }
  0x15   :  { %s6446_s27 = sld [smem:[%s7284_s0 + %s6309_s22]]   ;;  %s6313_s22 = smov 20  }
  0x16   :  { %7307 = sst [smem:[#allocation47_spill]] %s6426_s30 }
  0x17   :  { %s6451_s4 = sld [smem:[%s7284_s0 + %s6310_s28]]   ;;  %s6314_s28 = smov 21  }
  0x18   :  { %7308 = sst [smem:[#allocation48_spill]] %s6436_s12 }
  0x19   :  { %s6456_s12 = sld [smem:[%s7284_s0 + %s6311_s7]]   ;;  %s6315_s7 = smov 22  }
  0x1a   :  { %s6461_s30 = sld [smem:[%s7284_s0 + %s6312_s15]]   ;;  %s6316_s15 = smov 23  }
  0x1b   :  { %s6466_s25 = sld [smem:[%s7284_s0 + %s6313_s22]]   ;;  %s6317_s22 = smov 24  }
  0x1c   :  { %s6471_s19 = sld [smem:[%s7284_s0 + %s6314_s28]]   ;;  %s6318_s28 = smov 25  }
  0x1d   :  { %s6481_s17 = sld [smem:[%s7284_s0 + %s6316_s15]]   ;;  %s6320_s15 = smov 27  }
  0x1e   :  { %s6491_s9 = sld [smem:[%s7284_s0 + %s6318_s28]]   ;;  %s6322_s28 = smov 29  }
  0x1f   :  { %7309 = sst [smem:[#allocation49_spill]] %s6456_s12 }
  0x20   :  { %7310 = sst [smem:[#allocation50_spill]] %s6461_s30 }
  0x21   :  { %7311 = sst [smem:[#allocation51_spill]] %s6466_s25 }
  0x22   :  { %s6476_s12 = sld [smem:[%s7284_s0 + %s6315_s7]]   ;;  %s6319_s7 = smov 26  }
  0x23   :  { %7313 = sst [smem:[#allocation53_spill]] %s6481_s17 }
  0x24   :  { %s6486_s25 = sld [smem:[%s7284_s0 + %s6317_s22]]   ;;  %s6321_s22 = smov 28  }
  0x25   :  { %s6501_s17 = sld [smem:[%s7284_s0 + %s6320_s15]]   ;;  %s6324_s15 = smov 31  }
  0x26   :  { %s6511_s30 = sld [smem:[%s7284_s0 + %s6322_s28]]   ;;  %s6326_s28 = smov 33  }
  0x28   :  { %7312 = sst [smem:[#allocation52_spill]] %s6476_s12 }
  0x29   :  { %s6496_s12 = sld [smem:[%s7284_s0 + %s6319_s7]]   ;;  %s6323_s7 = smov 30  }
  0x2a   :  { %7314 = sst [smem:[#allocation54_spill]] %s6486_s25 }
  0x2b   :  { %7316 = sst [smem:[#allocation56_spill]] %s6501_s17 }
  0x2c   :  { %s6506_s25 = sld [smem:[%s7284_s0 + %s6321_s22]]   ;;  %s6325_s22 = smov 32  }
  0x2d   :  { %7318 = sst [smem:[#allocation58_spill]] %s6511_s30 }
  0x2e   :  { %s6521_s17 = sld [smem:[%s7284_s0 + %s6324_s15]]   ;;  %s6328_s15 = smov 35  }
  0x2f   :  { %7315 = sst [smem:[#allocation55_spill]] %s6496_s12 }
  0x30   :  { %s6516_s12 = sld [smem:[%s7284_s0 + %s6323_s7]]   ;;  %s6327_s7 = smov 34  }
  0x31   :  { %s6531_s30 = sld [smem:[%s7284_s0 + %s6326_s28]]   ;;  %s6330_s28 = smov 37  }
  0x32   :  { %7317 = sst [smem:[#allocation57_spill]] %s6506_s25 }
  0x33   :  { %s6526_s25 = sld [smem:[%s7284_s0 + %s6325_s22]]   ;;  %s6329_s22 = smov 36  }
  0x34   :  { %7320 = sst [smem:[#allocation60_spill]] %s6521_s17 }
  0x35   :  { %s6541_s17 = sld [smem:[%s7284_s0 + %s6328_s15]]   ;;  %s6332_s15 = smov 39  }
  0x36   :  { %7319 = sst [smem:[#allocation59_spill]] %s6516_s12 }
  0x37   :  { %7322 = sst [smem:[#allocation62_spill]] %s6531_s30 }
  0x38   :  { %s6536_s12 = sld [smem:[%s7284_s0 + %s6327_s7]]   ;;  %s6331_s7 = smov 38  }
  0x39   :  { %7321 = sst [smem:[#allocation61_spill]] %s6526_s25 }
  0x3a   :  { %s6546_s25 = sld [smem:[%s7284_s0 + %s6329_s22]]  }
  0x3b   :  { %7324 = sst [smem:[#allocation64_spill]] %s6541_s17 }
  0x3c   :  { %s6551_s30 = sld [smem:[%s7284_s0 + %s6330_s28]]  }
  0x3d   :  { %s6561_s17 = sld [smem:[%s7284_s0 + %s6332_s15]]  }
  0x3e   :  { %7323 = sst [smem:[#allocation63_spill]] %s6536_s12 }
  0x3f   :  { %s6556_s12 = sld [smem:[%s7284_s0 + %s6331_s7]]  }
  0x40   :  { %84 = vsyncpa [#allocation3], 0 }
  0x41   :  { %85 = vsyncpa [#allocation6], 0 }
  0x42   :  { %86 = vsyncpa [#allocation9], 0 }
  0x43   :  { %87 = vsyncpa [#allocation12], 0 }
  0x44   :  { %88 = vsyncpa [#allocation15], 0 }
  0x45   :  { %89 = vsyncpa [#allocation18], 0 }
  0x46   :  { %90 = vsyncpa [#allocation21], 0 }
  0x47   :  { %91 = vsyncpa [#allocation24], 0 }
  0x48   :  { %92 = vsyncpa [#allocation27], 0 }
  0x49   :  { %93 = vsyncpa [#allocation30], 0 }
  0x4a   :  { %94 = vsyncpa [#allocation4], 0  ;;  %s6333_s22 = smov [#allocation5]   ;;  %s6334_s26 = smov [#allocation8]  }
  0x4b   :  { %s115_s23 = sshll.u32 %s6333_s22, 4  ;;  %s139_s28 = sshll.u32 %s6334_s26, 4  ;;  %s116_s23 = int_to_ptr.vmem [resolvable:$true] %s115_s23  ;;  %s140_s28 = int_to_ptr.vmem [resolvable:$true] %s139_s28 }
  0x4c   :  { %s5900_s1 = scalar_lea.vmem %s116_s23, 16  ;;  %s5904_s0 = scalar_lea.vmem %s116_s23, 32 }
  0x4d   :  { %p5901_p0 = scmp.ne.s32.totalorder %s116_s23, %s5900_s1  ;;  %p5905_p1 = scmp.lt.s32.totalorder %s116_s23, %s116_s23 }
  0x4e   :  { %p5906_p2 = scmp.lt.s32.totalorder %s5904_s0, %s5900_s1 }
  0x50   :  { %p5907_p3 = por %p5906_p2, %p5905_p1 }
  0x52   :  { %p5908_p4 = pnand %p5907_p3, %p5901_p0 }
  0x54   :  { %5911 = shalt.err (!%p5908_p4)
}
  0x55   :  { %118 = dma.hbm_to_vmem [thread:$0]  %s6376_s13, 16, %s116_s23, [#allocation6]  }
  0x56   :  { %s5920_s2 = scalar_lea.vmem %s140_s28, 64  ;;  %p5925_p6 = scmp.lt.s32.totalorder %s140_s28, %s140_s28 }
  0x57   :  { %p5921_p5 = scmp.ne.s32.totalorder %s140_s28, %s5920_s2  ;;  %p5926_p7 = scmp.lt.s32.totalorder %s5920_s2, %s5920_s2 }
  0x59   :  { %p5927_p8 = por %p5926_p7, %p5925_p6 }
  0x5b   :  { %p5928_p9 = pnand %p5927_p8, %p5921_p5 }
  0x5d   :  { %5931 = shalt.err (!%p5928_p9)
}
  0x5e   :  { %142 = dma.hbm_to_vmem [thread:$0]  %s6396_s29, 64, %s140_s28, [#allocation9]  }
  0x5f   :  { %s6335_s7 = smov [#allocation11]   ;;  %s6336_s11 = smov [#allocation14]  }
  0x60   :  { %s161_s10 = sshll.u32 %s6335_s7, 4  ;;  %s183_s15 = sshll.u32 %s6336_s11, 4  ;;  %s162_s10 = int_to_ptr.vmem [resolvable:$true] %s161_s10  ;;  %s184_s15 = int_to_ptr.vmem [resolvable:$true] %s183_s15 }
  0x61   :  { %s5940_s16 = scalar_lea.vmem %s162_s10, 64  ;;  %p5945_p11 = scmp.lt.s32.totalorder %s162_s10, %s162_s10 }
  0x62   :  { %p5941_p10 = scmp.ne.s32.totalorder %s162_s10, %s5940_s16  ;;  %p5946_p12 = scmp.lt.s32.totalorder %s5940_s16, %s5940_s16 }
  0x64   :  { %p5947_p13 = por %p5946_p12, %p5945_p11 }
  0x66   :  { %p5948_p0 = pnand %p5947_p13, %p5941_p10 }
  0x68   :  { %5951 = shalt.err (!%p5948_p0)
}
  0x69   :  { %164 = dma.hbm_to_vmem [thread:$0]  %s6406_s8, 64, %s162_s10, [#allocation12]  }
  0x6a   :  { %s5960_s13 = scalar_lea.vmem %s184_s15, 64  ;;  %p5965_p2 = scmp.lt.s32.totalorder %s184_s15, %s184_s15 }
  0x6b   :  { %p5961_p1 = scmp.ne.s32.totalorder %s184_s15, %s5960_s13  ;;  %p5966_p3 = scmp.lt.s32.totalorder %s5960_s13, %s5960_s13 }
  0x6d   :  { %p5967_p4 = por %p5966_p3, %p5965_p2 }
  0x6f   :  { %p5968_p5 = pnand %p5967_p4, %p5961_p1 }
  0x71   :  { %5971 = shalt.err (!%p5968_p5)
}
  0x72   :  { %186 = dma.hbm_to_vmem [thread:$0]  %s6421_s24, 64, %s184_s15, [#allocation15]  }
  0x73   :  { %s6337_s29 = smov [#allocation17]   ;;  %s6338_s22 = smov [#allocation20]  }
  0x74   :  { %s206_s18 = sshll.u32 %s6337_s29, 4  ;;  %s230_s23 = sshll.u32 %s6338_s22, 4  ;;  %s207_s18 = int_to_ptr.vmem [resolvable:$true] %s206_s18  ;;  %s231_s23 = int_to_ptr.vmem [resolvable:$true] %s230_s23 }
  0x75   :  { %s5980_s26 = scalar_lea.vmem %s207_s18, 512  ;;  %p5985_p7 = scmp.lt.s32.totalorder %s207_s18, %s207_s18 }
  0x76   :  { %p5981_p6 = scmp.ne.s32.totalorder %s207_s18, %s5980_s26  ;;  %p5986_p8 = scmp.lt.s32.totalorder %s5980_s26, %s5980_s26 }
  0x78   :  { %p5987_p9 = por %p5986_p8, %p5985_p7 }
  0x7a   :  { %p5988_p10 = pnand %p5987_p9, %p5981_p6 }
  0x7c   :  { %5991 = shalt.err (!%p5988_p10)
}
  0x7d   :  { %s6339_s8 = smov 128   ;;  %s6340_s28 = smov 8  }
  0x7e   :  { %212 = dma.hbm_to_vmem [thread:$0]  %s6441_s20, 512, %s207_s18, [#allocation18], %s6339_s8, %s6339_s8, %s6340_s28  }
  0x7f   :  { %s6000_s24 = scalar_lea.vmem %s231_s23, 512  ;;  %p6005_p12 = scmp.lt.s32.totalorder %s231_s23, %s231_s23 }
  0x80   :  { %p6001_p11 = scmp.ne.s32.totalorder %s231_s23, %s6000_s24  ;;  %p6006_p13 = scmp.lt.s32.totalorder %s6000_s24, %s6000_s24 }
  0x82   :  { %p6007_p0 = por %p6006_p13, %p6005_p12 }
  0x84   :  { %p6008_p1 = pnand %p6007_p0, %p6001_p11 }
  0x86   :  { %6011 = shalt.err (!%p6008_p1)
}
  0x87   :  { %236 = dma.hbm_to_vmem [thread:$0]  %s6451_s4, 512, %s231_s23, [#allocation21], %s6339_s8, %s6339_s8, %s6340_s28  }
  0x88   :  { %s6341_s1 = smov [#allocation23]   ;;  %s6342_s2 = smov [#allocation26]  }
  0x89   :  { %s257_s0 = sshll.u32 %s6341_s1, 4  ;;  %s281_s7 = sshll.u32 %s6342_s2, 4  ;;  %s258_s0 = int_to_ptr.vmem [resolvable:$true] %s257_s0  ;;  %s282_s7 = int_to_ptr.vmem [resolvable:$true] %s281_s7 }
  0x8a   :  { %s6020_s10 = scalar_lea.vmem %s258_s0, 128  ;;  %p6025_p3 = scmp.lt.s32.totalorder %s258_s0, %s258_s0 }
  0x8b   :  { %p6021_p2 = scmp.ne.s32.totalorder %s258_s0, %s6020_s10  ;;  %p6026_p4 = scmp.lt.s32.totalorder %s6020_s10, %s6020_s10 }
  0x8d   :  { %p6027_p5 = por %p6026_p4, %p6025_p3 }
  0x8f   :  { %p6028_p6 = pnand %p6027_p5, %p6021_p2 }
  0x91   :  { %6031 = shalt.err (!%p6028_p6)
}
  0x92   :  { %260 = dma.hbm_to_vmem [thread:$0]  %s6471_s19, 128, %s258_s0, [#allocation24]  }
  0x93   :  { %s6040_s20 = scalar_lea.vmem %s282_s7, 64  ;;  %p6045_p8 = scmp.lt.s32.totalorder %s282_s7, %s282_s7 }
  0x94   :  { %p6041_p7 = scmp.ne.s32.totalorder %s282_s7, %s6040_s20  ;;  %p6046_p9 = scmp.lt.s32.totalorder %s6040_s20, %s6040_s20 }
  0x96   :  { %p6047_p10 = por %p6046_p9, %p6045_p8 }
  0x98   :  { %p6048_p11 = pnand %p6047_p10, %p6041_p7 }
  0x9a   :  { %6051 = shalt.err (!%p6048_p11)
}
  0x9b   :  { %284 = dma.hbm_to_vmem [thread:$0]  %s6491_s9, 64, %s282_s7, [#allocation27]  }
  0x9c   :  { %s6343_s4 = smov [#allocation2]   ;;  %s6344_s15 = smov [#allocation7]  }
  0x9d   :  { %s100_s11 = sshll.u32 %s6343_s4, 4  ;;  %s127_s16 = sshll.u32 %s6344_s15, 4  ;;  %s101_s11 = int_to_ptr.vmem [resolvable:$true] %s100_s11  ;;  %s128_s16 = int_to_ptr.vmem [resolvable:$true] %s127_s16 }
  0x9e   :  { %s6060_s13 = scalar_lea.vmem %s101_s11, 512  ;;  %p6065_p13 = scmp.lt.s32.totalorder %s101_s11, %s101_s11 }
  0x9f   :  { %p6061_p12 = scmp.ne.s32.totalorder %s101_s11, %s6060_s13  ;;  %p6066_p0 = scmp.lt.s32.totalorder %s6060_s13, %s6060_s13 }
  0xa1   :  { %p6067_p1 = por %p6066_p0, %p6065_p13 }
  0xa3   :  { %p6068_p2 = pnand %p6067_p1, %p6061_p12 }
  0xa5   :  { %6071 = shalt.err (!%p6068_p2)
}
  0xa6   :  { %106 = dma.hbm_to_vmem [thread:$0]  %s6366_s5, 512, %s101_s11, [#allocation3], %s6339_s8, %s6339_s8, %s6340_s28  }
  0xa7   :  { %s6080_s19 = scalar_lea.vmem %s128_s16, 64  ;;  %p6085_p4 = scmp.lt.s32.totalorder %s128_s16, %s128_s16 }
  0xa8   :  { %p6081_p3 = scmp.ne.s32.totalorder %s128_s16, %s6080_s19  ;;  %p6086_p5 = scmp.lt.s32.totalorder %s6080_s19, %s6080_s19 }
  0xaa   :  { %p6087_p6 = por %p6086_p5, %p6085_p4 }
  0xac   :  { %p6088_p7 = pnand %p6087_p6, %p6081_p3 }
  0xae   :  { %6091 = shalt.err (!%p6088_p7)
}
  0xaf   :  { %130 = dma.hbm_to_vmem [thread:$0]  %s6386_s21, 64, %s128_s16, [#allocation6]  }
  0xb0   :  { %s6345_s9 = smov [#allocation10]   ;;  %s6346_s18 = smov [#allocation13]  }
  0xb1   :  { %s148_s29 = sshll.u32 %s6345_s9, 4  ;;  %s171_s22 = sshll.u32 %s6346_s18, 4  ;;  %s149_s29 = int_to_ptr.vmem [resolvable:$true] %s148_s29  ;;  %s172_s22 = int_to_ptr.vmem [resolvable:$true] %s171_s22 }
  0xb2   :  { %s6100_s23 = scalar_lea.vmem %s149_s29, 768  ;;  %p6105_p9 = scmp.lt.s32.totalorder %s149_s29, %s149_s29 }
  0xb3   :  { %p6101_p8 = scmp.ne.s32.totalorder %s149_s29, %s6100_s23  ;;  %p6106_p10 = scmp.lt.s32.totalorder %s6100_s23, %s6100_s23 }
  0xb5   :  { %p6107_p11 = por %p6106_p10, %p6105_p9 }
  0xb7   :  { %p6108_p12 = pnand %p6107_p11, %p6101_p8 }
  0xb9   :  { %6111 = shalt.err (!%p6108_p12)
}
  0xba   :  { %154 = dma.hbm_to_vmem [thread:$0]  %s6401_s3, 768, %s149_s29, [#allocation9], %s6339_s8, %s6339_s8, %s6340_s28  }
  0xbb   :  { %s6120_s5 = scalar_lea.vmem %s172_s22, 128  ;;  %p6125_p0 = scmp.lt.s32.totalorder %s172_s22, %s172_s22 }
  0xbc   :  { %p6121_p13 = scmp.ne.s32.totalorder %s172_s22, %s6120_s5  ;;  %p6126_p1 = scmp.lt.s32.totalorder %s6120_s5, %s6120_s5 }
  0xbe   :  { %p6127_p2 = por %p6126_p1, %p6125_p0 }
  0xc0   :  { %p6128_p3 = pnand %p6127_p2, %p6121_p13 }
  0xc2   :  { %6131 = shalt.err (!%p6128_p3)
}
  0xc3   :  { %174 = dma.hbm_to_vmem [thread:$0]  %s6411_s14, 128, %s172_s22, [#allocation12]  }
  0xc4   :  { %s6347_s21 = smov [#allocation16]   ;;  %s6348_s24 = smov [#allocation19]  }
  0xc5   :  { %s195_s26 = sshll.u32 %s6347_s21, 4  ;;  %s218_s1 = sshll.u32 %s6348_s24, 4  ;;  %s196_s26 = int_to_ptr.vmem [resolvable:$true] %s195_s26  ;;  %s219_s1 = int_to_ptr.vmem [resolvable:$true] %s218_s1 }
  0xc6   :  { %s6140_s0 = scalar_lea.vmem %s196_s26, 32  ;;  %p6145_p5 = scmp.lt.s32.totalorder %s196_s26, %s196_s26 }
  0xc7   :  { %p6141_p4 = scmp.ne.s32.totalorder %s196_s26, %s6140_s0  ;;  %p6146_p6 = scmp.lt.s32.totalorder %s6140_s0, %s6140_s0 }
  0xc9   :  { %p6147_p7 = por %p6146_p6, %p6145_p5 }
  0xcb   :  { %p6148_p8 = pnand %p6147_p7, %p6141_p4 }
  0xcd   :  { %6151 = shalt.err (!%p6148_p8)
}
  0xce   :  { %198 = dma.hbm_to_vmem [thread:$0]  %s6431_s6, 32, %s196_s26, [#allocation15]  }
  0xcf   :  { %s6160_s3 = scalar_lea.vmem %s219_s1, 512  ;;  %p6165_p10 = scmp.lt.s32.totalorder %s219_s1, %s219_s1 }
  0xd0   :  { %p6161_p9 = scmp.ne.s32.totalorder %s219_s1, %s6160_s3  ;;  %p6166_p11 = scmp.lt.s32.totalorder %s6160_s3, %s6160_s3 }
  0xd2   :  { %p6167_p12 = por %p6166_p11, %p6165_p10 }
  0xd4   :  { %p6168_p13 = pnand %p6167_p12, %p6161_p9 }
  0xd6   :  { %6171 = shalt.err (!%p6168_p13)
}
  0xd7   :  { %224 = dma.hbm_to_vmem [thread:$0]  %s6446_s27, 512, %s219_s1, [#allocation18], %s6339_s8, %s6339_s8, %s6340_s28  }
  0xd8   :  { %s6349_s14 = smov [#allocation22]   ;;  %s6350_s7 = smov [#allocation25]  }
  0xd9   :  { %s245_s2 = sshll.u32 %s6349_s14, 4  ;;  %s269_s10 = sshll.u32 %s6350_s7, 4  ;;  %s246_s2 = int_to_ptr.vmem [resolvable:$true] %s245_s2  ;;  %s270_s10 = int_to_ptr.vmem [resolvable:$true] %s269_s10 }
  0xda   :  { %s6180_s20 = scalar_lea.vmem %s246_s2, 16  ;;  %s6184_s6 = scalar_lea.vmem %s246_s2, 32 }
  0xdb   :  { %p6181_p0 = scmp.ne.s32.totalorder %s246_s2, %s6180_s20  ;;  %p6185_p1 = scmp.lt.s32.totalorder %s246_s2, %s246_s2 }
  0xdc   :  { %p6186_p2 = scmp.lt.s32.totalorder %s6184_s6, %s6180_s20 }
  0xde   :  { %p6187_p3 = por %p6186_p2, %p6185_p1 }
  0xe0   :  { %p6188_p4 = pnand %p6187_p3, %p6181_p0 }
  0xe2   :  { %6191 = shalt.err (!%p6188_p4)
}
  0xe3   :  { %s7325_s4 = sld [smem:[#allocation50_spill]]  ;;  %s6200_s11 = scalar_lea.vmem %s270_s10, 64 }
  0xe4   :  { %p6201_p5 = scmp.ne.s32.totalorder %s270_s10, %s6200_s11  ;;  %p6205_p6 = scmp.lt.s32.totalorder %s270_s10, %s270_s10 }
  0xe5   :  { %p6206_p7 = scmp.lt.s32.totalorder %s6200_s11, %s6200_s11 }
  0xe7   :  { %p6207_p8 = por %p6206_p7, %p6205_p6 }
  0xe9   :  { %248 = dma.hbm_to_vmem [thread:$0]  %s7325_s4, 16, %s246_s2, [#allocation21]  }
  0xea   :  { %p6208_p9 = pnand %p6207_p8, %p6201_p5 }
  0xec   :  { %6211 = shalt.err (!%p6208_p9)
}
  0xed   :  { %s7326_s27 = sld [smem:[#allocation53_spill]]  ;;  %s6351_s15 = smov [#allocation28]  }
  0xee   :  { %s293_s16 = sshll.u32 %s6351_s15, 4  ;;  %s6352_s13 = smov [#allocation29]   ;;  %s294_s16 = int_to_ptr.vmem [resolvable:$true] %s293_s16 }
  0xef   :  { %s305_s19 = sshll.u32 %s6352_s13, 4  ;;  %s6220_s9 = scalar_lea.vmem %s294_s16, 64  ;;  %s306_s19 = int_to_ptr.vmem [resolvable:$true] %s305_s19 }
  0xf0   :  { %p6221_p10 = scmp.ne.s32.totalorder %s294_s16, %s6220_s9  ;;  %p6225_p11 = scmp.lt.s32.totalorder %s294_s16, %s294_s16 }
  0xf1   :  { %p6226_p12 = scmp.lt.s32.totalorder %s6220_s9, %s6220_s9 }
  0xf3   :  { %272 = dma.hbm_to_vmem [thread:$0]  %s7326_s27, 64, %s270_s10, [#allocation24]  }
  0xf4   :  { %p6227_p13 = por %p6226_p12, %p6225_p11 }
  0xf6   :  { %p6228_p0 = pnand %p6227_p13, %p6221_p10 }
  0xf8   :  { %6231 = shalt.err (!%p6228_p0)
}
  0xf9   :  { %s7327_s29 = sld [smem:[#allocation56_spill]]  ;;  %s6240_s18 = scalar_lea.vmem %s306_s19, 16 }
  0xfa   :  { %p6241_p1 = scmp.ne.s32.totalorder %s306_s19, %s6240_s18  ;;  %s6244_s22 = scalar_lea.vmem %s306_s19, 32 }
  0xfb   :  { %p6245_p2 = scmp.lt.s32.totalorder %s306_s19, %s306_s19  ;;  %p6246_p3 = scmp.lt.s32.totalorder %s6244_s22, %s6240_s18 }
  0xfd   :  { %p6247_p4 = por %p6246_p3, %p6245_p2 }
  0xff   :  { %296 = dma.hbm_to_vmem [thread:$0]  %s7327_s29, 64, %s294_s16, [#allocation27]  }
 0x100   :  { %p6248_p5 = pnand %p6247_p4, %p6241_p1 }
 0x102   :  { %6251 = shalt.err (!%p6248_p5)
}
 0x103   :  { %s7328_s23 = sld [smem:[#allocation58_spill]] }
 0x109   :  { %308 = dma.hbm_to_vmem [thread:$0]  %s7328_s23, 16, %s306_s19, [#allocation30]  }
 0x10a   :  { %6272 = dma.done.wait [#allocation3], 512  }
 0x10b   :  { %6273 = vsyncadd [#allocation3], 4294966784 }
 0x10c   :  { %6274 = dma.done.wait [#allocation6], 80  }
 0x10d   :  { %6275 = vsyncadd [#allocation6], 4294967216 }
 0x10e   :  { %6276 = dma.done.wait [#allocation9], 832  }
 0x10f   :  { %6277 = vsyncadd [#allocation9], 4294966464 }
 0x110   :  { %6278 = dma.done.wait [#allocation12], 192  }
 0x111   :  { %6279 = vsyncadd [#allocation12], 4294967104 }
 0x112   :  { %6280 = dma.done.wait [#allocation15], 96  }
 0x113   :  { %6281 = vsyncadd [#allocation15], 4294967200 }
 0x114   :  { %6282 = dma.done.wait [#allocation18], 1024  }
 0x115   :  { %6283 = vsyncadd [#allocation18], 4294966272 }
 0x116   :  { %6284 = dma.done.wait [#allocation21], 528  }
 0x117   :  { %6285 = vsyncadd [#allocation21], 4294966768 }
 0x118   :  { %6286 = dma.done.wait [#allocation24], 192  }
 0x119   :  { %6287 = vsyncadd [#allocation24], 4294967104 }
 0x11a   :  { %6288 = dma.done.wait [#allocation27], 128  }
 0x11b   :  { %6289 = vsyncadd [#allocation27], 4294967168 }
 0x11c   :  { %6290 = dma.done.wait [#allocation30], 16  }
 0x11d   :  { %6291 = vsyncadd [#allocation30], 4294967280  ;;  %s7329_s5 = sld [smem:[#allocation43_spill]]  ;;  %v384_v0 = vld [vmem:[#allocation2 + $0x10] sm:$0xff]  ;;  %s6353_s21 = smov 16   ;;  %v385_v3 = vld [vmem:[#allocation2 + $0x18] sm:$0xff]  ;;  %v938_v60 = vlaneseq }
 0x11e   :  { %388 = vrot.lane.b32.xlu0 %v384_v0, %s6353_s21  ;;  %v381_v7 = vld [vmem:[#allocation2] sm:$0xff]  ;;  %vm394_vm0 = vcmask 130048   ;;  %vm420_vm1 = vcmask 261120   ;;  %v382_v11 = vld [vmem:[#allocation2 + $0x8] sm:$0xff]  ;;  %vm399_vm2 = vcmask 1040384   ;;  %vm405_vm3 = vcmask 1046528  }
 0x11f   :  { %s7330_s26 = sld [smem:[#allocation44_spill]]  ;;  %v4755_v39 = vld [vmem:[#allocation5] ss:$0 sm:$0xff]  ;;  %v968_v55 = vld [vmem:[#allocation17 + $0x18] sm:$0xff]  ;;  %v6354_v56 = vmov 0.0   ;;  %vm6355_vm4 = vmmov 0  }
 0x120   :  { %v967_v57 = vld [vmem:[#allocation17 + $0x10] sm:$0xff]  ;;  %v966_v58 = vld [vmem:[#allocation17 + $0x8] sm:$0xff]  ;;  %v965_v59 = vld [vmem:[#allocation17] sm:$0xff]  ;;  %v6648_v61 = vshrl.u32 %v938_v60, 7  ;;  %s7331_s24 = sld [smem:[#allocation46_spill]]  ;;  %vm1086_vm7 = vcmask 121856  }
 0x121   :  { %v937_v0 = vld [vmem:[#allocation7] sm:$0x7]  ;;  %s7332_s1 = sld [smem:[#allocation45_spill]]  ;;  %s6356_s0 = smov 127   ;;  %vm1172_vm8 = vcmask 252928   ;;  %vm1615_vm10 = vcmask 56320  }
 0x122   :  { %390 = vrot.lane.b32.xlu0 %v385_v3, %s6353_s21  ;;  %v6651_v63 = vsub.s32 0, %v6648_v61  ;;  %s7333_s3 = sld [smem:[#allocation47_spill]]  ;;  %vm1783_vm11 = vcmask 1042432   ;;  %vm2018_vm12 = vcmask 257024   ;;  %vm2145_vm14 = vcmask 23552  }
 0x123   :  { %v4744_v1 = vld [vmem:[%s7329_s5 + $0x38] sm:$0xff]  ;;  %v4743_v2 = vld [vmem:[%s7329_s5 + $0x30] sm:$0xff]  ;;  %v4742_v4 = vld [vmem:[%s7329_s5 + $0x28] sm:$0xff]  ;;  %s7334_s14 = sld [smem:[#allocation48_spill]]  ;;  %vm2441_vm15 = vcmask 64512  }
 0x124   :  { %5220 = vmatprep.subr.mxu0 %v4744_v1  ;;  %v4741_v5 = vld [vmem:[%s7329_s5 + $0x20] sm:$0xff]  ;;  %v414_v6 = vld [vmem:[%s7329_s5 + $0x18] sm:$0xff]  ;;  %v413_v14 = vld [vmem:[%s7329_s5 + $0x10] sm:$0xff]  ;;  %s7335_s2 = sld [smem:[#allocation49_spill]] }
 0x125   :  { %5221 = vmatpush3.msra.mxu0 %v4744_v1  ;;  %v412_v16 = vld [vmem:[%s7329_s5 + $0x8] sm:$0xff]  ;;  %v411_v18 = vld [vmem:[%s7329_s5] sm:$0xff]  ;;  %v4752_v20 = vld [vmem:[%s7329_s5 + $0x58] sm:$0xff]  ;;  %s7336_s7 = sld [smem:[#allocation51_spill]] }
 0x126   :  { %5222 = vmatprep.subr.mxu0 %v4743_v2  ;;  %v4751_v23 = vld [vmem:[%s7329_s5 + $0x50] sm:$0xff]  ;;  %v4750_v25 = vld [vmem:[%s7329_s5 + $0x48] sm:$0xff]  ;;  %v4749_v26 = vld [vmem:[%s7329_s5 + $0x40] sm:$0xff]  ;;  %s7337_s10 = sld [smem:[#allocation52_spill]] }
 0x127   :  { %5223 = vmatpush3.msra.mxu0 %v4743_v2  ;;  %v4757_v28 = vld [vmem:[%s7330_s26 + $0x18] sm:$0xff]  ;;  %v4756_v29 = vld [vmem:[%s7330_s26 + $0x10] sm:$0xff]  ;;  %v689_v30 = vld [vmem:[%s7330_s26 + $0x8] sm:$0xff]  ;;  %s7340_s20 = sld [smem:[#allocation59_spill]] }
 0x128   :  { %5224 = vmatprep.subr.mxu0 %v4742_v4  ;;  %5260 = vmatprep.subr.mxu1 %v689_v30  ;;  %v4763_v31 = vld [vmem:[%s7330_s26 + $0x28] sm:$0xff]  ;;  %v688_v32 = vld [vmem:[%s7330_s26] sm:$0xff]  ;;  %s7341_s6 = sld [smem:[#allocation63_spill]] }
 0x129   :  { %5225 = vmatpush3.msra.mxu0 %v4742_v4  ;;  %5261 = vmatpush3.msra.mxu1 %v689_v30  ;;  %v4762_v50 = vld [vmem:[%s7330_s26 + $0x20] sm:$0xff]  ;;  %v941_v4 = vrot.slane %v937_v0, %v6651_v63  ;;  %s7342_s4 = sld [smem:[#allocation62_spill]] }
 0x12a   :  { %5226 = vmatprep.subr.mxu0 %v4741_v5  ;;  %5262 = vmatprep.subr.mxu1 %v688_v32  ;;  %s7343_s11 = sld [smem:[#allocation54_spill]] }
 0x12b   :  { %5227 = vmatpush3.msra.mxu0 %v4741_v5  ;;  %5263 = vmatpush3.msra.mxu1 %v688_v32  ;;  %s7344_s27 = sld [smem:[#allocation60_spill]] }
 0x12c   :  { %5231 = vmatprep.subr.mxu0 %v414_v6  ;;  %5274 = vmatprep.subr.mxu1 %v6354_v56  ;;  %s7346_s15 = sld [smem:[#allocation55_spill]] }
 0x12d   :  { %s7347_s16 = sld [smem:[#allocation61_spill]] }
 0x190   :  { %v389_v8 = vpop.permute.xlu0 %388 }
 0x191   :  { %v395_v9 = vsel %vm394_vm0, %v381_v7, %v389_v8 }
 0x192   :  { %v400_v10 = vrot.slane %v395_v9, 7  ;;  %5228 = vmatprep.mubr.msk.f32.mxu0 %vm420_vm1, %v395_v9  ;;  %v406_v21 = vrot.slane %v395_v9, 1 }
 0x194   :  { %v391_v12 = vpop.permute.xlu0 %390  ;;  %v404_v15 = vsel %vm399_vm2, 0.0, %v400_v10 }
 0x195   :  { %v396_v13 = vsel %vm394_vm0, %v382_v11, %v391_v12 }
 0x196   :  { %5229 = vmatmul.mubr.msk.f32.vlgmr.msra.gmra.mxu0 %vm420_vm1, %v396_v13  ;;  %v401_v17 = vrot.slane %v396_v13, 7  ;;  %v407_v19 = vrot.slane %v396_v13, 1 }
 0x197   :  { %5232 = vmatpush3.msra.mxu0 %v414_v6  ;;  %5239 = vmatprep.mubr.msk.f32.mxu0 %vm420_vm1, %v404_v15 }
 0x198   :  { %5233 = vmatprep.subr.mxu0 %v413_v14  ;;  %v402_v22 = vsel %vm399_vm2, %v400_v10, %v401_v17  ;;  %v408_v24 = vsel %vm405_vm3, %v406_v21, %v407_v19  ;;  %v410_v27 = vsel %vm405_vm3, %v407_v19, 0.0 }
 0x199   :  { %5234 = vmatpush3.msra.mxu0 %v413_v14 }
 0x19a   :  { %5235 = vmatprep.subr.mxu0 %v412_v16 }
 0x19b   :  { %5236 = vmatpush3.msra.mxu0 %v412_v16 }
 0x19c   :  { %5237 = vmatprep.subr.mxu0 %v411_v18 }
 0x19d   :  { %5238 = vmatpush3.msra.mxu0 %v411_v18 }
 0x19e   :  { %5240 = vmatmul.mubr.msk.f32.vlgmr.msra.gmra.mxu0 %vm420_vm1, %v402_v22  ;;  %5242 = vmatprep.subr.mxu0 %v4752_v20 }
 0x19f   :  { %5243 = vmatpush3.msra.mxu0 %v4752_v20  ;;  %5250 = vmatprep.mubr.msk.f32.mxu0 %vm420_vm1, %v408_v24 }
 0x1a0   :  { %5244 = vmatprep.subr.mxu0 %v4751_v23 }
 0x1a1   :  { %5245 = vmatpush3.msra.mxu0 %v4751_v23 }
 0x1a2   :  { %5246 = vmatprep.subr.mxu0 %v4750_v25 }
 0x1a3   :  { %5247 = vmatpush3.msra.mxu0 %v4750_v25 }
 0x1a4   :  { %5248 = vmatprep.subr.mxu0 %v4749_v26 }
 0x1a5   :  { %5249 = vmatpush3.msra.mxu0 %v4749_v26 }
 0x1a6   :  { %5251 = vmatmul.mubr.msk.f32.vlgmr.msra.gmra.mxu0 %vm420_vm1, %v410_v27  ;;  %5253 = vmatprep.subr.mxu0 %v4757_v28 }
 0x1a7   :  { %5254 = vmatpush3.msra.mxu0 %v4757_v28 }
 0x1a8   :  { %5255 = vmatprep.subr.mxu0 %v4756_v29 }
 0x1a9   :  { %5256 = vmatpush3.msra.mxu0 %v4756_v29 }
 0x1aa   :  { %5267 = vmatprep.subr.mxu0 %v4763_v31 }
 0x256   :  { %v5230_v33 = vpop.f32.mrf.mxu0 }
 0x258   :  { %v491_v34 = vpop.f32.mrf.mxu0 }
 0x25e   :  { %v5241_v35 = vpop.f32.mrf.mxu0 }
 0x25f   :  { %v577_v37 = vadd.f32 %v5241_v35, %v5230_v33 }
 0x260   :  { %v571_v36 = vpop.f32.mrf.mxu0 }
 0x261   :  { %v572_v40 = vadd.f32 %v571_v36, %v491_v34 }
 0x266   :  { %v5252_v38 = vpop.f32.mrf.mxu0 }
 0x267   :  { %v666_v41 = vadd.f32 %v5252_v38, %v577_v37 }
 0x268   :  { %v656_v42 = vpop.f32.mrf.mxu0 }
 0x269   :  { %v675_v43 = vadd.f32 %v4755_v39, %v666_v41  ;;  %v665_v44 = vadd.f32 %v656_v42, %v572_v40  ;;  %v6663_v42 = vsub.s32 2, %v6648_v61 }
 0x26b   :  { %v674_v45 = vadd.f32 %v4755_v39, %v665_v44  ;;  %v679_v46 = vrot.slane %v675_v43, 7  ;;  %v684_v47 = vrot.slane %v675_v43, 1  ;;  %v6667_v44 = vsub.s32 1, %v6648_v61 }
 0x26d   :  { %v683_v48 = vrot.slane %v674_v45, 1  ;;  %5257 = vmatprep.mubr.msk.f32.mxu0 %vm394_vm0, %v674_v45  ;;  %v678_v49 = vrot.slane %v674_v45, 7  ;;  %v687_v54 = vsel %vm405_vm3, %v684_v47, 0.0 }
 0x26e   :  { %5258 = vmatmul.mubr.msk.f32.vlgmr.msra.gmra.mxu0 %vm394_vm0, %v675_v43 }
 0x26f   :  { %5268 = vmatpush3.msra.mxu0 %v4763_v31  ;;  %v682_v51 = vsel %vm399_vm2, 0.0, %v678_v49  ;;  %v685_v52 = vsel %vm405_vm3, %v683_v48, %v684_v47  ;;  %v680_v53 = vsel %vm399_vm2, %v678_v49, %v679_v46  ;;  %v1067_v47 = vrot.slane %v937_v0, %v6663_v42 }
 0x270   :  { %5264 = vmatprep.mubr.msk.f32.mxu1 %vm394_vm0, %v682_v51  ;;  %5269 = vmatprep.subr.mxu0 %v4762_v50 }
 0x271   :  { %5271 = vmatprep.mubr.msk.f32.mxu0 %vm394_vm0, %v685_v52  ;;  %5265 = vmatmul.mubr.msk.f32.vlgmr.msra.gmra.mxu1 %vm394_vm0, %v680_v53 }
 0x272   :  { %5270 = vmatpush3.msra.mxu0 %v4762_v50  ;;  %5282 = vmatprep.mubr.msk.f32.mxu1 %vm6355_vm4, %v6354_v56 }
 0x273   :  { %5272 = vmatmul.mubr.msk.f32.vlgmr.msra.gmra.mxu0 %vm394_vm0, %v687_v54  ;;  %5275 = vmatpush3.msra.mxu1 %v968_v55 }
 0x274   :  { %5285 = vmatprep.subr.mxu0 %v6354_v56  ;;  %5276 = vmatprep.subr.mxu1 %v6354_v56 }
 0x275   :  { %5289 = vmatprep.mubr.msk.f32.mxu0 %vm6355_vm4, %v6354_v56  ;;  %5277 = vmatpush3.msra.mxu1 %v967_v57 }
 0x276   :  { %5278 = vmatprep.subr.mxu1 %v6354_v56 }
 0x277   :  { %5279 = vmatpush3.msra.mxu1 %v966_v58 }
 0x278   :  { %5280 = vmatprep.subr.mxu1 %v6354_v56 }
 0x279   :  { %5281 = vmatpush3.msra.mxu1 %v965_v59 }
 0x27a   :  { %5303 = vmatprep.subr.mxu1 %v6354_v56 }
 0x32e   :  { %v5259_v62 = vpop.f32.mrf.mxu0 }
 0x330   :  { %v763_v1 = vpop.f32.mrf.mxu0 }
 0x331   :  { %v5266_v2 = vpop.f32.mrf.mxu1 }
 0x332   :  { %v849_v3 = vadd.f32 %v5266_v2, %v5259_v62 }
 0x333   :  { %v5273_v5 = vpop.f32.mrf.mxu0  ;;  %v843_v6 = vpop.f32.mrf.mxu1 }
 0x334   :  { %v936_v7 = vadd.f32 %v5273_v5, %v849_v3  ;;  %v844_v8 = vadd.f32 %v843_v6, %v763_v1  ;;  %v1085_v3 = vld [vmem:[#allocation13] sm:$0xff]  ;;  %v1170_v5 = vld [vmem:[%s7331_s24 + $0x10] sm:$0xff]  ;;  %v1169_v6 = vld [vmem:[%s7331_s24 + $0x8] sm:$0xff] }
 0x335   :  { %v926_v9 = vpop.f32.mrf.mxu0 }
 0x336   :  { %v943_v10 = vadd.f32 %v941_v4, %v936_v7  ;;  %v935_v11 = vadd.f32 %v926_v9, %v844_v8  ;;  %v1168_v7 = vld [vmem:[%s7331_s24] sm:$0xff]  ;;  %v4772_v8 = vld [vmem:[%s7332_s1 + $0x18] sm:$0xff] }
 0x338   :  { %v954_v12 = vmul.f32 %v943_v10, %v943_v10  ;;  %v942_v13 = vadd.f32 %v941_v4, %v935_v11  ;;  %v945_v14 = vsel %vm420_vm1, %v943_v10, 0.0  ;;  %v1171_v4 = vld [vmem:[%s7331_s24 + $0x18] sm:$0x7f] }
 0x33a   :  { %v944_v15 = vsel %vm420_vm1, %v942_v13, 0.0  ;;  %v953_v16 = vmul.f32 %v942_v13, %v942_v13  ;;  %v956_v18 = vsel %vm420_vm1, %v954_v12, 0.0 }
 0x33b   :  { %v946_v17 = vadd.f32 %v945_v14, %v944_v15  ;;  %v4776_v14 = vld [vmem:[%s7332_s1 + $0x28] sm:$0xff]  ;;  %v4775_v15 = vld [vmem:[%s7332_s1 + $0x20] sm:$0xff] }
 0x33c   :  { %v955_v19 = vsel %vm420_vm1, %v953_v16, 0.0  ;;  %v1257_v16 = vld [vmem:[%s7332_s1 + $0x8] sm:$0xff] }
 0x33d   :  { %v947_v20 = vrot.slane %v946_v17, 4  ;;  %v957_v21 = vadd.f32 %v956_v18, %v955_v19 }
 0x33f   :  { %v948_v22 = vadd.f32 %v947_v20, %v946_v17  ;;  %v958_v23 = vrot.slane %v957_v21, 4  ;;  %v1256_v20 = vld [vmem:[%s7332_s1] sm:$0xff] }
 0x341   :  { %v949_v24 = vrot.slane %v948_v22, 2  ;;  %v959_v25 = vadd.f32 %v958_v23, %v957_v21 }
 0x343   :  { %v950_v26 = vadd.f32 %v949_v24, %v948_v22  ;;  %v960_v27 = vrot.slane %v959_v25, 2  ;;  %v1508_v24 = vld [vmem:[#allocation19 + $0x18] sm:$0xff] }
 0x345   :  { %v951_v28 = vrot.slane %v950_v26, 1  ;;  %v961_v29 = vadd.f32 %v960_v27, %v959_v25  ;;  %v1507_v25 = vld [vmem:[#allocation19 + $0x10] sm:$0xff]  ;;  %v1505_v27 = vld [vmem:[#allocation19] sm:$0xff] }
 0x347   :  { %v962_v30 = vrot.slane %v961_v29, 1  ;;  %v952_v31 = vadd.f32 %v951_v28, %v950_v26  ;;  %v1506_v26 = vld [vmem:[#allocation19 + $0x8] sm:$0xff] }
 0x349   :  { %v963_v32 = vadd.f32 %v962_v30, %v961_v29  ;;  %v1483_v30 = vld [vmem:[#allocation8] sm:$0x7] }
 0x34b   :  { %v964_v33 = vsel %vm399_vm2, %v952_v31, %v963_v32 }
 0x34c   :  { %5283 = vmatmul.mubr.msk.f32.vlgmr.msra.gmra.mxu1 %vm420_vm1, %v964_v33 }
 0x34d   :  { %5307 = vmatprep.mubr.msk.f32.mxu1 %vm6355_vm4, %v6354_v56  ;;  %5304 = vmatpush3.msra.mxu1 %v4772_v8 }
 0x34e   :  { %5305 = vmatprep.subr.mxu1 %v6354_v56 }
 0x40c   :  { %v1038_v34 = vpop.f32.mrf.mxu1 }
 0x40d   :  { %v1042_v35 = vmul.f32 0.00390625, %v1038_v34  ;;  %v1487_v34 = vrot.slane %v1483_v30, %v6651_v63 }
 0x40e   :  { %v5284_v36 = vpop.f32.mrf.mxu1 }
 0x40f   :  { %v1043_v37 = vmul.f32 %v1042_v35, %v1042_v35  ;;  %v1052_v43 = vrot.slane %v1042_v35, %v6651_v63 }
 0x411   :  { %v1045_v38 = vrot.slane %v1043_v37, 7  ;;  %v1053_v48 = vsub.f32 %v942_v13, %v1052_v43  ;;  %v1054_v49 = vsub.f32 %v943_v10, %v1052_v43  ;;  %v4771_v13 = vld [vmem:[%s7332_s1 + $0x10] sm:$0xff] }
 0x412   :  { %5306 = vmatpush3.msra.mxu1 %v4771_v13 }
 0x413   :  { %v1047_v39 = vsub.f32 %v1042_v35, %v1045_v38  ;;  %5310 = vmatprep.subr.mxu1 %v6354_v56 }
 0x415   :  { %v1048_v40 = vmax.f32 %v1047_v39, 0.0 }
 0x417   :  { %v1055_v41 = vadd.f32 1e-05, %v1048_v40 }
 0x419   :  { %5848 = vrsqrt.f32 %v1055_v41 }
 0x426   :  { %v5849_v45 = vpop.eup %5848 }
 0x427   :  { %v1057_v46 = vmul.f32 %v5849_v45, %v937_v0 }
 0x429   :  { %v1061_v50 = vrot.slane %v1057_v46, %v6667_v44 }
 0x42b   :  { %v1062_v51 = vmul.f32 %v1061_v50, %v1053_v48  ;;  %v1063_v52 = vmul.f32 %v1061_v50, %v1054_v49 }
 0x42d   :  { %v1068_v53 = vadd.f32 %v1067_v47, %v1062_v51  ;;  %v1069_v54 = vadd.f32 %v1067_v47, %v1063_v52 }
 0x42f   :  { %v1073_v55 = vmul.f32 0.1, %v1069_v54  ;;  %vm1071_vm5 = vcmp.ge.f32.partialorder %v1069_v54, 0.0  ;;  %vm1070_vm6 = vcmp.ge.f32.partialorder %v1068_v53, 0.0  ;;  %v1072_v57 = vmul.f32 0.1, %v1068_v53 }
 0x431   :  { %v1075_v58 = vsel %vm1071_vm5, %v1069_v54, %v1073_v55  ;;  %v1074_v59 = vsel %vm1070_vm6, %v1068_v53, %v1072_v57  ;;  %vm2751_vm5 = vcmask 1041408   ;;  %vm2754_vm6 = vcmask 1043456  }
 0x432   :  { %v1079_v60 = vrot.slane %v1075_v58, 1  ;;  %v1078_v62 = vrot.slane %v1074_v59, 1 }
 0x434   :  { %v1084_v0 = vmax.f32 %v1075_v58, %v1079_v60  ;;  %v1080_v1 = vsel %vm405_vm3, %v1078_v62, %v1079_v60 }
 0x435   :  { %v1083_v2 = vmax.f32 %v1074_v59, %v1080_v1 }
 0x436   :  { %5286 = vmatpush3.msk.msra.mxu0 %vm405_vm3, %v1084_v0 }
 0x437   :  { %5287 = vmatprep.subr.mxu0 %v6354_v56 }
 0x438   :  { %5288 = vmatpush3.msra.mxu0 %v1083_v2 }
 0x439   :  { %5290 = vmatmul.mubr.msk.f32.vlgmr.msra.gmra.mxu0 %vm1086_vm7, %v1085_v3  ;;  %5292 = vmatprep.subr.mxu0 %v6354_v56  ;;  %vm2756_vm7 = vcmask 1044480  }
 0x43a   :  { %5300 = vmatprep.mubr.msk.f32.mxu0 %vm6355_vm4, %v6354_v56  ;;  %5293 = vmatpush3.msk.msra.mxu0 %vm405_vm3, %v1171_v4 }
 0x43b   :  { %5294 = vmatprep.subr.mxu0 %v6354_v56 }
 0x43c   :  { %5295 = vmatpush3.msra.mxu0 %v1170_v5 }
 0x43d   :  { %5296 = vmatprep.subr.mxu0 %v6354_v56 }
 0x43e   :  { %5297 = vmatpush3.msra.mxu0 %v1169_v6 }
 0x43f   :  { %5298 = vmatprep.subr.mxu0 %v6354_v56 }
 0x440   :  { %5299 = vmatpush3.msra.mxu0 %v1168_v7  ;;  %v1605_v7 = vrot.slane %v1483_v30, %v6663_v42 }
 0x441   :  { %5317 = vmatprep.subr.mxu0 %v6354_v56 }
 0x4f9   :  { %v1159_v9 = vpop.f32.mrf.mxu0 }
 0x4fa   :  { %1164 = vrot.lane.b32.xlu1 %v1159_v9, %s6356_s0 }
 0x4fb   :  { %v5291_v10 = vpop.f32.mrf.mxu0 }
 0x56c   :  { %v1165_v11 = vpop.permute.xlu1 %1164 }
 0x56d   :  { %v1167_v12 = vmax.f32 %v1159_v9, %v1165_v11 }
 0x56f   :  { %5301 = vmatmul.mubr.msk.f32.vlgmr.msra.gmra.mxu0 %vm1172_vm8, %v1167_v12 }
 0x570   :  { %5321 = vmatprep.mubr.msk.f32.mxu0 %vm6355_vm4, %v6354_v56  ;;  %5318 = vmatpush3.msra.mxu0 %v4776_v14 }
 0x571   :  { %5319 = vmatprep.subr.mxu0 %v6354_v56 }
 0x572   :  { %5320 = vmatpush3.msra.mxu0 %v4775_v15 }
 0x573   :  { %5335 = vmatprep.subr.mxu0 %v6354_v56 }
 0x62f   :  { %v1245_v17 = vpop.f32.mrf.mxu0 }
 0x630   :  { %v1250_v18 = vrot.slane %v1245_v17, 7  ;;  %v1253_v19 = vrot.slane %v1245_v17, 1  ;;  %5308 = vmatmul.mubr.msk.f32.vlgmr.msra.gmra.mxu1 %vm394_vm0, %v1245_v17  ;;  %v1700_v17 = vld [vmem:[%s7333_s3 + $0x18] sm:$0x7f] }
 0x631   :  { %v5302_v21 = vpop.f32.mrf.mxu0  ;;  %5311 = vmatpush3.msra.mxu1 %v1257_v16  ;;  %5314 = vmatprep.mubr.msk.f32.mxu1 %vm6355_vm4, %v6354_v56  ;;  %v1614_v16 = vld [vmem:[#allocation14] sm:$0xf] }
 0x632   :  { %v1252_v22 = vsel %vm399_vm2, 0.0, %v1250_v18  ;;  %v1255_v23 = vsel %vm405_vm3, %v1253_v19, 0.0  ;;  %5312 = vmatprep.subr.mxu1 %v6354_v56  ;;  %v1699_v18 = vld [vmem:[%s7333_s3 + $0x10] sm:$0xff]  ;;  %v1698_v19 = vld [vmem:[%s7333_s3 + $0x8] sm:$0xff] }
 0x633   :  { %5313 = vmatpush3.msra.mxu1 %v1256_v20  ;;  %5322 = vmatmul.mubr.msk.f32.vlgmr.msra.gmra.mxu0 %vm394_vm0, %v1255_v23  ;;  %v1697_v20 = vld [vmem:[%s7333_s3] sm:$0xff] }
 0x634   :  { %5315 = vmatmul.mubr.msk.f32.vlgmr.msra.gmra.mxu1 %vm394_vm0, %v1252_v22  ;;  %5324 = vmatprep.subr.mxu1 %v6354_v56  ;;  %v1789_v21 = vld [vmem:[#allocation10 + $0x18] sm:$0xff] }
 0x635   :  { %5332 = vmatprep.mubr.msk.f32.mxu1 %vm6355_vm4, %v6354_v56  ;;  %5337 = vmatprep.mubr.msk.f32.mxu0 %vm6355_vm4, %v6354_v56 }
 0x636   :  { %5325 = vmatpush3.msra.mxu1 %v1508_v24 }
 0x637   :  { %5326 = vmatprep.subr.mxu1 %v6354_v56 }
 0x638   :  { %5327 = vmatpush3.msra.mxu1 %v1507_v25 }
 0x639   :  { %5328 = vmatprep.subr.mxu1 %v6354_v56 }
 0x63a   :  { %5329 = vmatpush3.msra.mxu1 %v1506_v26  ;;  %v1788_v26 = vld [vmem:[#allocation10 + $0x10] sm:$0xff] }
 0x63b   :  { %5330 = vmatprep.subr.mxu1 %v6354_v56 }
 0x63c   :  { %5331 = vmatpush3.msra.mxu1 %v1505_v27  ;;  %v1937_v27 = vld [vmem:[#allocation10 + $0x28] sm:$0xff] }
 0x63d   :  { %5351 = vmatprep.subr.mxu1 %v6354_v56 }
 0x6f0   :  { %v1329_v28 = vpop.f32.mrf.mxu1 }
 0x6f2   :  { %v5309_v29 = vpop.f32.mrf.mxu1 }
 0x6f3   :  { %v1478_v31 = vpop.f32.mrf.mxu0  ;;  %v1786_v29 = vld [vmem:[#allocation10 + $0x8] sm:$0xff] }
 0x6f4   :  { %v1402_v32 = vpop.f32.mrf.mxu1 }
 0x6f5   :  { %v1403_v33 = vadd.f32 %v1402_v32, %v1329_v28  ;;  %v5323_v35 = vpop.f32.mrf.mxu0  ;;  %v1936_v28 = vld [vmem:[#allocation10 + $0x20] sm:$0xff] }
 0x6f6   :  { %v5316_v36 = vpop.f32.mrf.mxu1 }
 0x6f7   :  { %v1482_v37 = vadd.f32 %v1478_v31, %v1403_v33  ;;  %v1785_v33 = vld [vmem:[#allocation10] sm:$0xff] }
 0x6f9   :  { %v1488_v38 = vadd.f32 %v1487_v34, %v1482_v37  ;;  %v2038_v37 = vld [vmem:[#allocation20 + $0x18] sm:$0xff] }
 0x6fb   :  { %v1489_v39 = vsel %vm420_vm1, %v1488_v38, 0.0  ;;  %v1496_v40 = vmul.f32 %v1488_v38, %v1488_v38 }
 0x6fc   :  { %v1490_v41 = vrot.slane %v1489_v39, 4 }
 0x6fd   :  { %v1497_v43 = vsel %vm420_vm1, %v1496_v40, 0.0  ;;  %v2035_v40 = vld [vmem:[#allocation20] sm:$0xff] }
 0x6fe   :  { %v1491_v45 = vadd.f32 %v1490_v41, %v1489_v39  ;;  %v1498_v46 = vrot.slane %v1497_v43, 4  ;;  %v2036_v39 = vld [vmem:[#allocation20 + $0x8] sm:$0xff] }
 0x700   :  { %v1492_v47 = vrot.slane %v1491_v45, 2  ;;  %v1499_v48 = vadd.f32 %v1498_v46, %v1497_v43 }
 0x702   :  { %v1493_v49 = vadd.f32 %v1492_v47, %v1491_v45  ;;  %v1500_v50 = vrot.slane %v1499_v48, 2  ;;  %v2012_v45 = vld [vmem:[#allocation11] sm:$0x7] }
 0x704   :  { %v1494_v51 = vrot.slane %v1493_v49, 1  ;;  %v1501_v52 = vadd.f32 %v1500_v50, %v1499_v48 }
 0x706   :  { %v1502_v53 = vrot.slane %v1501_v52, 1  ;;  %v1495_v54 = vadd.f32 %v1494_v51, %v1493_v49  ;;  %v2016_v49 = vrot.slane %v2012_v45, %v6651_v63 }
 0x708   :  { %v1503_v55 = vadd.f32 %v1502_v53, %v1501_v52 }
 0x70a   :  { %v1504_v57 = vsel %vm399_vm2, %v1495_v54, %v1503_v55 }
 0x70b   :  { %5333 = vmatmul.mubr.msk.f32.vlgmr.msra.gmra.mxu1 %vm420_vm1, %v1504_v57 }
 0x70c   :  { %5355 = vmatprep.mubr.msk.f32.mxu1 %vm6355_vm4, %v6354_v56  ;;  %5352 = vmatpush3.msra.mxu1 %v1789_v21 }
 0x70d   :  { %5353 = vmatprep.subr.mxu1 %v6354_v56 }
 0x70e   :  { %5354 = vmatpush3.msra.mxu1 %v1788_v26 }
 0x70f   :  { %5358 = vmatprep.subr.mxu1 %v6354_v56 }
 0x7cb   :  { %v1578_v58 = vpop.f32.mrf.mxu1 }
 0x7cc   :  { %v1582_v59 = vmul.f32 0.015625, %v1578_v58 }
 0x7cd   :  { %v5334_v60 = vpop.f32.mrf.mxu1 }
 0x7ce   :  { %v1583_v62 = vmul.f32 %v1582_v59, %v1582_v59  ;;  %v1592_v4 = vrot.slane %v1582_v59, %v6651_v63 }
 0x7d0   :  { %v1585_v0 = vrot.slane %v1583_v62, 7  ;;  %v1593_v8 = vsub.f32 %v1488_v38, %v1592_v4  ;;  %v2037_v38 = vld [vmem:[#allocation20 + $0x10] sm:$0xff] }
 0x7d2   :  { %v1587_v1 = vsub.f32 %v1582_v59, %v1585_v0 }
 0x7d4   :  { %v1588_v2 = vmax.f32 %v1587_v1, 0.0 }
 0x7d6   :  { %v1594_v3 = vadd.f32 1e-05, %v1588_v2 }
 0x7d8   :  { %5850 = vrsqrt.f32 %v1594_v3 }
 0x7e5   :  { %v5851_v5 = vpop.eup %5850 }
 0x7e6   :  { %v1596_v6 = vmul.f32 %v5851_v5, %v1483_v30 }
 0x7e8   :  { %v1600_v9 = vrot.slane %v1596_v6, %v6667_v44 }
 0x7ea   :  { %v1601_v10 = vmul.f32 %v1600_v9, %v1593_v8 }
 0x7ec   :  { %v1606_v11 = vadd.f32 %v1605_v7, %v1601_v10 }
 0x7ee   :  { %v1608_v12 = vmul.f32 0.1, %v1606_v11  ;;  %vm1607_vm9 = vcmp.ge.f32.partialorder %v1606_v11, 0.0 }
 0x7f0   :  { %v1609_v13 = vsel %vm1607_vm9, %v1606_v11, %v1608_v12  ;;  %vm6896_vm9 = vmneg %vm399_vm2 }
 0x7f1   :  { %v1611_v14 = vrot.slane %v1609_v13, 1 }
 0x7f3   :  { %v1613_v15 = vmax.f32 %v1609_v13, %v1611_v14 }
 0x7f5   :  { %5336 = vmatpush3.msk.msra.mxu0 %vm405_vm3, %v1613_v15 }
 0x7f6   :  { %5338 = vmatmul.mubr.msk.f32.vlgmr.msra.gmra.mxu0 %vm1615_vm10, %v1614_v16  ;;  %5340 = vmatprep.subr.mxu0 %v6354_v56  ;;  %vm3035_vm10 = vcmask 523264  }
 0x7f7   :  { %5348 = vmatprep.mubr.msk.f32.mxu0 %vm6355_vm4, %v6354_v56  ;;  %5341 = vmatpush3.msk.msra.mxu0 %vm405_vm3, %v1700_v17 }
 0x7f8   :  { %5342 = vmatprep.subr.mxu0 %v6354_v56 }
 0x7f9   :  { %5343 = vmatpush3.msra.mxu0 %v1699_v18 }
 0x7fa   :  { %5344 = vmatprep.subr.mxu0 %v6354_v56 }
 0x7fb   :  { %5345 = vmatpush3.msra.mxu0 %v1698_v19 }
 0x7fc   :  { %5346 = vmatprep.subr.mxu0 %v6354_v56 }
 0x7fd   :  { %5347 = vmatpush3.msra.mxu0 %v1697_v20  ;;  %v2135_v20 = vrot.slane %v2012_v45, %v6663_v42 }
 0x7fe   :  { %5365 = vmatprep.subr.mxu0 %v6354_v56 }
 0x8b6   :  { %v1688_v22 = vpop.f32.mrf.mxu0 }
 0x8b7   :  { %1693 = vrot.lane.b32.xlu1 %v1688_v22, %s6356_s0 }
 0x8b8   :  { %v5339_v23 = vpop.f32.mrf.mxu0 }
 0x929   :  { %v1694_v24 = vpop.permute.xlu1 %1693 }
 0x92a   :  { %v1696_v25 = vmax.f32 %v1688_v22, %v1694_v24 }
 0x92c   :  { %5349 = vmatmul.mubr.msk.f32.vlgmr.msra.gmra.mxu0 %vm1172_vm8, %v1696_v25 }
 0x92d   :  { %5369 = vmatprep.mubr.msk.f32.mxu0 %vm6355_vm4, %v6354_v56  ;;  %5366 = vmatpush3.msra.mxu0 %v1937_v27 }
 0x92e   :  { %5367 = vmatprep.subr.mxu0 %v6354_v56 }
 0x92f   :  { %5368 = vmatpush3.msra.mxu0 %v1936_v28 }
 0x930   :  { %5383 = vmatprep.subr.mxu0 %v6354_v56 }
 0x9ec   :  { %v1773_v30 = vpop.f32.mrf.mxu0 }
 0x9ed   :  { %v1778_v31 = vrot.slane %v1773_v30, 7  ;;  %v1781_v32 = vrot.slane %v1773_v30, 1  ;;  %5356 = vmatmul.mubr.msk.f32.vlgmr.msra.gmra.mxu1 %vm394_vm0, %v1773_v30  ;;  %v2230_v30 = vld [vmem:[%s7334_s14 + $0x18] sm:$0x7f] }
 0x9ee   :  { %v5350_v34 = vpop.f32.mrf.mxu0  ;;  %5359 = vmatpush3.msra.mxu1 %v1786_v29  ;;  %5362 = vmatprep.mubr.msk.f32.mxu1 %vm6355_vm4, %v6354_v56  ;;  %v2144_v29 = vld [vmem:[#allocation16] sm:$0x3] }
 0x9ef   :  { %v1780_v35 = vsel %vm399_vm2, 0.0, %v1778_v31  ;;  %v1784_v36 = vsel %vm1783_vm11, %v1781_v32, 0.0  ;;  %5360 = vmatprep.subr.mxu1 %v6354_v56  ;;  %v2229_v31 = vld [vmem:[%s7334_s14 + $0x10] sm:$0xff]  ;;  %v2228_v32 = vld [vmem:[%s7334_s14 + $0x8] sm:$0xff] }
 0x9f0   :  { %5361 = vmatpush3.msra.mxu1 %v1785_v33  ;;  %5370 = vmatmul.mubr.msk.f32.vlgmr.msra.gmra.mxu0 %vm394_vm0, %v1784_v36  ;;  %v2227_v33 = vld [vmem:[%s7334_s14] sm:$0xff] }
 0x9f1   :  { %5363 = vmatmul.mubr.msk.f32.vlgmr.msra.gmra.mxu1 %vm394_vm0, %v1780_v35  ;;  %5372 = vmatprep.subr.mxu1 %v6354_v56 }
 0x9f2   :  { %5380 = vmatprep.mubr.msk.f32.mxu1 %vm6355_vm4, %v6354_v56  ;;  %5385 = vmatprep.mubr.msk.f32.mxu0 %vm6355_vm4, %v6354_v56 }
 0x9f3   :  { %5373 = vmatpush3.msra.mxu1 %v2038_v37 }
 0x9f4   :  { %5374 = vmatprep.subr.mxu1 %v6354_v56 }
 0x9f5   :  { %5375 = vmatpush3.msra.mxu1 %v2037_v38  ;;  %v2316_v38 = vld [vmem:[%s7335_s2 + $0x18] sm:$0xff] }
 0x9f6   :  { %5376 = vmatprep.subr.mxu1 %v6354_v56 }
 0x9f7   :  { %5377 = vmatpush3.msra.mxu1 %v2036_v39  ;;  %v2315_v39 = vld [vmem:[%s7335_s2 + $0x10] sm:$0xff] }
 0x9f8   :  { %5378 = vmatprep.subr.mxu1 %v6354_v56 }
 0x9f9   :  { %5379 = vmatpush3.msra.mxu1 %v2035_v40  ;;  %v2314_v40 = vld [vmem:[%s7335_s2 + $0x8] sm:$0xff] }
 0x9fa   :  { %5399 = vmatprep.subr.mxu1 %v6354_v56 }
 0xaad   :  { %v1858_v41 = vpop.f32.mrf.mxu1 }
 0xaaf   :  { %v5357_v43 = vpop.f32.mrf.mxu1 }
 0xab0   :  { %v2007_v46 = vpop.f32.mrf.mxu0 }
 0xab1   :  { %v1931_v47 = vpop.f32.mrf.mxu1 }
 0xab2   :  { %v1932_v48 = vadd.f32 %v1931_v47, %v1858_v41  ;;  %v5371_v50 = vpop.f32.mrf.mxu0  ;;  %v2313_v41 = vld [vmem:[%s7335_s2] sm:$0xff] }
 0xab3   :  { %v5364_v51 = vpop.f32.mrf.mxu1  ;;  %v2394_v50 = vld [vmem:[%s7336_s7 + $0x18] sm:$0xff] }
 0xab4   :  { %v2011_v52 = vadd.f32 %v2007_v46, %v1932_v48  ;;  %v2391_v51 = vld [vmem:[%s7336_s7] sm:$0xff] }
 0xab6   :  { %v2017_v53 = vadd.f32 %v2016_v49, %v2011_v52  ;;  %v2392_v49 = vld [vmem:[%s7336_s7 + $0x8] sm:$0xff]  ;;  %v2393_v52 = vld [vmem:[%s7336_s7 + $0x10] sm:$0xff] }
 0xab8   :  { %v2019_v54 = vsel %vm2018_vm12, %v2017_v53, 0.0  ;;  %v2026_v55 = vmul.f32 %v2017_v53, %v2017_v53 }
 0xab9   :  { %v2020_v57 = vrot.slane %v2019_v54, 4 }
 0xaba   :  { %v2027_v58 = vsel %vm2018_vm12, %v2026_v55, 0.0  ;;  %v2317_v55 = vld [vmem:[#allocation22] sm:$0x1] }
 0xabb   :  { %v2021_v59 = vadd.f32 %v2020_v57, %v2019_v54  ;;  %v2028_v60 = vrot.slane %v2027_v58, 4  ;;  %v2398_v54 = vld [vmem:[%s7336_s7 + $0x38] sm:$0xff] }
 0xabd   :  { %v2022_v62 = vrot.slane %v2021_v59, 2  ;;  %v2029_v0 = vadd.f32 %v2028_v60, %v2027_v58 }
 0xabf   :  { %v2023_v1 = vadd.f32 %v2022_v62, %v2021_v59  ;;  %v2030_v2 = vrot.slane %v2029_v0, 2  ;;  %v2395_v59 = vld [vmem:[%s7336_s7 + $0x20] sm:$0xff]  ;;  %v2397_v62 = vld [vmem:[%s7336_s7 + $0x30] sm:$0xff] }
 0xac1   :  { %v2024_v3 = vrot.slane %v2023_v1, 1  ;;  %v2031_v4 = vadd.f32 %v2030_v2, %v2029_v0  ;;  %v4811_v0 = vld [vmem:[%s7337_s10 + $0xf8] sm:$0xff]  ;;  %v4810_v2 = vld [vmem:[%s7337_s10 + $0xf0] sm:$0xff] }
 0xac3   :  { %v2032_v5 = vrot.slane %v2031_v4, 1  ;;  %v2025_v6 = vadd.f32 %v2024_v3, %v2023_v1  ;;  %v2783_v1 = vld [vmem:[%s7337_s10 + $0x78] sm:$0xff]  ;;  %v2782_v3 = vld [vmem:[%s7337_s10 + $0x70] sm:$0xff] }
 0xac5   :  { %v2033_v7 = vadd.f32 %v2032_v5, %v2031_v4  ;;  %v4809_v4 = vld [vmem:[%s7337_s10 + $0xe8] sm:$0xff] }
 0xac6   :  { %v2781_v5 = vld [vmem:[%s7337_s10 + $0x68] sm:$0xff] }
 0xac7   :  { %v2034_v8 = vsel %vm399_vm2, %v2025_v6, %v2033_v7  ;;  %v4808_v6 = vld [vmem:[%s7337_s10 + $0xe0] sm:$0xff] }
 0xac8   :  { %5381 = vmatmul.mubr.msk.f32.vlgmr.msra.gmra.mxu1 %vm420_vm1, %v2034_v8  ;;  %v2780_v7 = vld [vmem:[%s7337_s10 + $0x60] sm:$0xff]  ;;  %v4807_v8 = vld [vmem:[%s7337_s10 + $0xd8] sm:$0xff] }
 0xac9   :  { %5407 = vmatprep.mubr.msk.f32.mxu1 %vm6355_vm4, %v6354_v56  ;;  %5400 = vmatpush3.msra.mxu1 %v2316_v38 }
 0xaca   :  { %5401 = vmatprep.subr.mxu1 %v6354_v56 }
 0xacb   :  { %5402 = vmatpush3.msra.mxu1 %v2315_v39  ;;  %v2423_v39 = vsub.s32 5, %v6648_v61 }
 0xacc   :  { %5403 = vmatprep.subr.mxu1 %v6354_v56 }
 0xacd   :  { %5404 = vmatpush3.msra.mxu1 %v2314_v40 }
 0xace   :  { %5405 = vmatprep.subr.mxu1 %v6354_v56 }
 0xacf   :  { %5406 = vmatpush3.msra.mxu1 %v2313_v41 }
 0xad0   :  { %2546 = vmatprep.subr.mxu1 %v2394_v50 }
 0xb88   :  { %v2108_v9 = vpop.f32.mrf.mxu1 }
 0xb89   :  { %v2112_v10 = vmul.f32 0.0625, %v2108_v9  ;;  %v2779_v9 = vld [vmem:[%s7337_s10 + $0x58] sm:$0xff] }
 0xb8a   :  { %v5382_v11 = vpop.f32.mrf.mxu1 }
 0xb8b   :  { %v2113_v12 = vmul.f32 %v2112_v10, %v2112_v10  ;;  %v2122_v17 = vrot.slane %v2112_v10, %v6651_v63  ;;  %v2778_v11 = vld [vmem:[%s7337_s10 + $0x50] sm:$0xff] }
 0xb8d   :  { %v2115_v13 = vrot.slane %v2113_v12, 7  ;;  %v2123_v21 = vsub.f32 %v2017_v53, %v2122_v17  ;;  %v2396_v53 = vld [vmem:[%s7336_s7 + $0x28] sm:$0xff]  ;;  %v4802_v17 = vld [vmem:[%s7337_s10 + $0xb0] sm:$0xff] }
 0xb8e   :  { %v4805_v12 = vld [vmem:[%s7337_s10 + $0xc8] sm:$0xff] }
 0xb8f   :  { %v2117_v14 = vsub.f32 %v2112_v10, %v2115_v13  ;;  %v4806_v10 = vld [vmem:[%s7337_s10 + $0xd0] sm:$0xff]  ;;  %v2777_v13 = vld [vmem:[%s7337_s10 + $0x48] sm:$0xff] }
 0xb91   :  { %v2118_v15 = vmax.f32 %v2117_v14, 0.0  ;;  %v4804_v14 = vld [vmem:[%s7337_s10 + $0xc0] sm:$0xff] }
 0xb93   :  { %v2124_v16 = vadd.f32 1e-05, %v2118_v15  ;;  %v2776_v15 = vld [vmem:[%s7337_s10 + $0x40] sm:$0xff] }
 0xb95   :  { %5852 = vrsqrt.f32 %v2124_v16  ;;  %v4803_v16 = vld [vmem:[%s7337_s10 + $0xb8] sm:$0xff] }
 0xba2   :  { %v5853_v18 = vpop.eup %5852 }
 0xba3   :  { %v2126_v19 = vmul.f32 %v5853_v18, %v2012_v45  ;;  %v2775_v18 = vld [vmem:[%s7337_s10 + $0x38] sm:$0xff] }
 0xba5   :  { %v2130_v22 = vrot.slane %v2126_v19, %v6667_v44  ;;  %v4801_v19 = vld [vmem:[%s7337_s10 + $0xa8] sm:$0xff] }
 0xba7   :  { %v2131_v23 = vmul.f32 %v2130_v22, %v2123_v21  ;;  %v4800_v21 = vld [vmem:[%s7337_s10 + $0xa0] sm:$0xff]  ;;  %v2773_v22 = vld [vmem:[%s7337_s10 + $0x28] sm:$0xff] }
 0xba9   :  { %v2136_v24 = vadd.f32 %v2135_v20, %v2131_v23  ;;  %v2774_v20 = vld [vmem:[%s7337_s10 + $0x30] sm:$0xff]  ;;  %v4799_v23 = vld [vmem:[%s7337_s10 + $0x98] sm:$0xff] }
 0xbab   :  { %v2138_v25 = vmul.f32 0.1, %v2136_v24  ;;  %vm2137_vm13 = vcmp.ge.f32.partialorder %v2136_v24, 0.0 }
 0xbad   :  { %v2139_v26 = vsel %vm2137_vm13, %v2136_v24, %v2138_v25  ;;  %v2772_v24 = vld [vmem:[%s7337_s10 + $0x20] sm:$0xff]  ;;  %v4798_v25 = vld [vmem:[%s7337_s10 + $0x90] sm:$0xff] }
 0xbae   :  { %v2141_v27 = vrot.slane %v2139_v26, 1 }
 0xbb0   :  { %v2143_v28 = vmax.f32 %v2139_v26, %v2141_v27  ;;  %v2771_v26 = vld [vmem:[%s7337_s10 + $0x18] sm:$0xff]  ;;  %v4797_v27 = vld [vmem:[%s7337_s10 + $0x88] sm:$0xff] }
 0xbb2   :  { %5384 = vmatpush3.msk.msra.mxu0 %vm1783_vm11, %v2143_v28  ;;  %v2770_v28 = vld [vmem:[%s7337_s10 + $0x10] sm:$0xff] }
 0xbb3   :  { %5386 = vmatmul.mubr.msk.f32.vlgmr.msra.gmra.mxu0 %vm2145_vm14, %v2144_v29  ;;  %5388 = vmatprep.subr.mxu0 %v6354_v56  ;;  %v4796_v29 = vld [vmem:[%s7337_s10 + $0x80] sm:$0xff] }
 0xbb4   :  { %5396 = vmatprep.mubr.msk.f32.mxu0 %vm6355_vm4, %v6354_v56  ;;  %5389 = vmatpush3.msk.msra.mxu0 %vm405_vm3, %v2230_v30  ;;  %v2769_v30 = vld [vmem:[%s7337_s10 + $0x8] sm:$0xff] }
 0xbb5   :  { %5390 = vmatprep.subr.mxu0 %v6354_v56 }
 0xbb6   :  { %5391 = vmatpush3.msra.mxu0 %v2229_v31  ;;  %v2768_v31 = vld [vmem:[%s7337_s10] sm:$0xff] }
 0xbb7   :  { %5392 = vmatprep.subr.mxu0 %v6354_v56 }
 0xbb8   :  { %5393 = vmatpush3.msra.mxu0 %v2228_v32  ;;  %v2399_v32 = vld [vmem:[#allocation23] sm:$0xff] }
 0xbb9   :  { %5394 = vmatprep.subr.mxu0 %v6354_v56 }
 0xbba   :  { %5395 = vmatpush3.msra.mxu0 %v2227_v33  ;;  %v2415_v33 = vsub.s32 3, %v6648_v61 }
 0xbbb   :  { %2475 = vmatprep.subr.mxu0 %v2392_v49 }
 0xbbc   :  { %v2416_v38 = vrot.slane %v2399_v32, %v2415_v33  ;;  %v4814_v33 = vld [vmem:[%s7337_s10 + $0x100] sm:$0xff] }
 0xc73   :  { %v2218_v34 = vpop.f32.mrf.mxu0 }
 0xc74   :  { %2223 = vrot.lane.b32.xlu0 %v2218_v34, %s6356_s0 }
 0xc75   :  { %v5387_v35 = vpop.f32.mrf.mxu0 }
 0xc76   :  { %v2412_v35 = vrot.slane %v2399_v32, %v6663_v42 }
 0xce6   :  { %v2224_v36 = vpop.permute.xlu0 %2223 }
 0xce7   :  { %v2226_v37 = vmax.f32 %v2218_v34, %v2224_v36  ;;  %v2419_v34 = vsub.s32 4, %v6648_v61  ;;  %v2427_v36 = vsub.s32 6, %v6648_v61 }
 0xce9   :  { %5397 = vmatmul.mubr.msk.f32.vlgmr.msra.gmra.mxu0 %vm1172_vm8, %v2226_v37  ;;  %v2408_v37 = vrot.slane %v2399_v32, %v6667_v44  ;;  %v2428_v50 = vrot.slane %v2399_v32, %v2427_v36  ;;  %vm2758_vm8 = vcmask 1045504   ;;  %v3058_v36 = vld [vmem:[%s7340_s20 + $0x30] sm:$0xff] }
 0xcea   :  { %2509 = vmatprep.mubr.f32.mxu0 %v6354_v56  ;;  %2476 = vmatpush1.msra.mxu0 %v2391_v51 }
 0xceb   :  { %2617 = vmatprep.subr.mxu0 %v2396_v53  ;;  %v2424_v53 = vrot.slane %v2399_v32, %v2423_v39  ;;  %v3055_v39 = vld [vmem:[%s7340_s20 + $0x18] sm:$0xff] }
 0xda9   :  { %v2303_v43 = vpop.f32.mrf.mxu0 }
 0xdaa   :  { %v2308_v45 = vrot.slane %v2303_v43, 1 }
 0xdab   :  { %v5398_v46 = vpop.f32.mrf.mxu0 }
 0xdac   :  { %2309 = vrot.lane.b32.xlu1 %v2308_v45, %s6353_s21  ;;  %v2404_v45 = vrot.slane %v2399_v32, %v6651_v63  ;;  %v2420_v46 = vrot.slane %v2399_v32, %v2419_v34 }
 0xe1e   :  { %v2310_v47 = vpop.permute.xlu1 %2309 }
 0xe1f   :  { %v2312_v48 = vsel %vm394_vm0, %v2303_v43, %v2310_v47  ;;  %v2431_v43 = vsub.s32 7, %v6648_v61 }
 0xe20   :  { %5408 = vmatmul.mubr.msk.f32.vlgmr.msra.gmra.mxu1 %vm420_vm1, %v2312_v48 }
 0xe21   :  { %2580 = vmatprep.mubr.f32.mxu1 %v6354_v56  ;;  %2547 = vmatpush1.msra.mxu1 %v2393_v52 }
 0xe22   :  { %2688 = vmatprep.subr.mxu1 %v2398_v54 }
 0xee0   :  { %v2387_v57 = vpop.f32.mrf.mxu1 }
 0xee1   :  { %v2388_v58 = vadd.f32 %v2387_v57, %v2317_v55  ;;  %v2432_v57 = vrot.slane %v2399_v32, %v2431_v43  ;;  %v4815_v32 = vld [vmem:[%s7337_s10 + $0x108] sm:$0xff]  ;;  %v3052_v43 = vld [vmem:[%s7340_s20] sm:$0xff] }
 0xee2   :  { %v5409_v60 = vpop.f32.mrf.mxu1 }
 0xee3   :  { %4792 = vmatmul.mubr.msk.f32.vlgmr.msra.gmra.mxu0 %vm2441_vm15, %v2388_v58  ;;  %4793 = vmatmul.mubr.msk.f32.vlgmr.msra.gmra.mxu1 %vm2441_vm15, %v2388_v58 }
 0xee4   :  { %2618 = vmatpush1.msra.mxu0 %v2395_v59  ;;  %2651 = vmatprep.mubr.f32.mxu0 %v6354_v56 }
 0xee5   :  { %2689 = vmatpush1.msra.mxu1 %v2397_v62  ;;  %2722 = vmatprep.mubr.f32.mxu1 %v6354_v56 }
 0xee6   :  { %5410 = vmatprep.subr.mxu0 %v6354_v56  ;;  %5445 = vmatprep.subr.mxu1 %v6354_v56 }
 0xee7   :  { %4794 = vmatmul.mubr.msk.f32.vlgmr.msra.gmra.mxu0 %vm2441_vm15, %v2388_v58  ;;  %4795 = vmatmul.mubr.msk.f32.vlgmr.msra.gmra.mxu1 %vm2441_vm15, %v2388_v58 }
 0xee8   :  { %5411 = vmatpush3.msra.mxu0 %v4811_v0  ;;  %5446 = vmatpush3.msra.mxu1 %v2783_v1 }
 0xee9   :  { %5412 = vmatprep.subr.mxu0 %v6354_v56  ;;  %5447 = vmatprep.subr.mxu1 %v6354_v56 }
 0xeea   :  { %5413 = vmatpush3.msra.mxu0 %v4810_v2  ;;  %5448 = vmatpush3.msra.mxu1 %v2782_v3 }
 0xeeb   :  { %5414 = vmatprep.subr.mxu0 %v6354_v56  ;;  %5449 = vmatprep.subr.mxu1 %v6354_v56 }
 0xeec   :  { %5415 = vmatpush3.msra.mxu0 %v4809_v4  ;;  %5450 = vmatpush3.msra.mxu1 %v2781_v5 }
 0xeed   :  { %5416 = vmatprep.subr.mxu0 %v6354_v56  ;;  %5451 = vmatprep.subr.mxu1 %v6354_v56 }
 0xeee   :  { %5417 = vmatpush3.msra.mxu0 %v4808_v6  ;;  %5452 = vmatpush3.msra.mxu1 %v2780_v7 }
 0xeef   :  { %5418 = vmatprep.subr.mxu0 %v6354_v56  ;;  %5453 = vmatprep.subr.mxu1 %v6354_v56 }
 0xef0   :  { %5419 = vmatpush3.msra.mxu0 %v4807_v8  ;;  %5454 = vmatpush3.msra.mxu1 %v2779_v9 }
 0xef1   :  { %5420 = vmatprep.subr.mxu0 %v6354_v56  ;;  %5455 = vmatprep.subr.mxu1 %v6354_v56 }
 0xef2   :  { %5421 = vmatpush3.msra.mxu0 %v4806_v10  ;;  %5456 = vmatpush3.msra.mxu1 %v2778_v11 }
 0xef3   :  { %5422 = vmatprep.subr.mxu0 %v6354_v56  ;;  %5457 = vmatprep.subr.mxu1 %v6354_v56 }
 0xef4   :  { %5423 = vmatpush3.msra.mxu0 %v4805_v12  ;;  %5458 = vmatpush3.msra.mxu1 %v2777_v13 }
 0xef5   :  { %5424 = vmatprep.subr.mxu0 %v6354_v56  ;;  %5459 = vmatprep.subr.mxu1 %v6354_v56 }
 0xef6   :  { %5425 = vmatpush3.msra.mxu0 %v4804_v14  ;;  %5460 = vmatpush3.msra.mxu1 %v2776_v15  ;;  %v4829_v15 = vld [vmem:[%s7337_s10 + $0x178] sm:$0xff] }
 0xef7   :  { %5426 = vmatprep.subr.mxu0 %v6354_v56  ;;  %5461 = vmatprep.subr.mxu1 %v6354_v56 }
 0xef8   :  { %5427 = vmatpush3.msra.mxu0 %v4803_v16  ;;  %5442 = vmatprep.mubr.msk.f32.mxu0 %vm6355_vm4, %v6354_v56 }
 0xef9   :  { %5428 = vmatprep.subr.mxu0 %v6354_v56  ;;  %5477 = vmatprep.mubr.msk.f32.mxu1 %vm6355_vm4, %v6354_v56 }
 0xefa   :  { %5429 = vmatpush3.msra.mxu0 %v4802_v17  ;;  %5462 = vmatpush3.msra.mxu1 %v2775_v18  ;;  %v4864_v17 = vld [vmem:[%s7343_s11 + $0x158] sm:$0xff] }
 0xefb   :  { %5430 = vmatprep.subr.mxu0 %v6354_v56  ;;  %5463 = vmatprep.subr.mxu1 %v6354_v56 }
 0xefc   :  { %5431 = vmatpush3.msra.mxu0 %v4801_v19  ;;  %5464 = vmatpush3.msra.mxu1 %v2774_v20  ;;  %v4828_v19 = vld [vmem:[%s7337_s10 + $0x170] sm:$0xff]  ;;  %v4827_v20 = vld [vmem:[%s7337_s10 + $0x168] sm:$0xff] }
 0xefd   :  { %5432 = vmatprep.subr.mxu0 %v6354_v56  ;;  %5465 = vmatprep.subr.mxu1 %v6354_v56 }
 0xefe   :  { %5433 = vmatpush3.msra.mxu0 %v4800_v21  ;;  %5466 = vmatpush3.msra.mxu1 %v2773_v22  ;;  %v4826_v21 = vld [vmem:[%s7337_s10 + $0x160] sm:$0xff]  ;;  %v4825_v22 = vld [vmem:[%s7337_s10 + $0x158] sm:$0xff] }
 0xeff   :  { %5434 = vmatprep.subr.mxu0 %v6354_v56  ;;  %5467 = vmatprep.subr.mxu1 %v6354_v56 }
 0xf00   :  { %5435 = vmatpush3.msra.mxu0 %v4799_v23  ;;  %5468 = vmatpush3.msra.mxu1 %v2772_v24  ;;  %v4824_v23 = vld [vmem:[%s7337_s10 + $0x150] sm:$0xff]  ;;  %v4823_v24 = vld [vmem:[%s7337_s10 + $0x148] sm:$0xff] }
 0xf01   :  { %5436 = vmatprep.subr.mxu0 %v6354_v56  ;;  %5469 = vmatprep.subr.mxu1 %v6354_v56 }
 0xf02   :  { %5437 = vmatpush3.msra.mxu0 %v4798_v25  ;;  %5470 = vmatpush3.msra.mxu1 %v2771_v26  ;;  %v4822_v25 = vld [vmem:[%s7337_s10 + $0x140] sm:$0xff]  ;;  %v4821_v26 = vld [vmem:[%s7337_s10 + $0x138] sm:$0xff] }
 0xf03   :  { %5438 = vmatprep.subr.mxu0 %v6354_v56  ;;  %5471 = vmatprep.subr.mxu1 %v6354_v56 }
 0xf04   :  { %5439 = vmatpush3.msra.mxu0 %v4797_v27  ;;  %5472 = vmatpush3.msra.mxu1 %v2770_v28  ;;  %v4820_v27 = vld [vmem:[%s7337_s10 + $0x130] sm:$0xff]  ;;  %v4819_v28 = vld [vmem:[%s7337_s10 + $0x128] sm:$0xff] }
 0xf05   :  { %5440 = vmatprep.subr.mxu0 %v6354_v56  ;;  %5473 = vmatprep.subr.mxu1 %v6354_v56 }
 0xf06   :  { %5441 = vmatpush3.msra.mxu0 %v4796_v29  ;;  %5474 = vmatpush3.msra.mxu1 %v2769_v30  ;;  %v4818_v29 = vld [vmem:[%s7337_s10 + $0x120] sm:$0xff]  ;;  %v4817_v30 = vld [vmem:[%s7337_s10 + $0x118] sm:$0xff] }
 0xf07   :  { %5480 = vmatprep.subr.mxu0 %v6354_v56  ;;  %5475 = vmatprep.subr.mxu1 %v6354_v56 }
 0xf08   :  { %5476 = vmatpush3.msra.mxu1 %v2768_v31  ;;  %v4816_v31 = vld [vmem:[%s7337_s10 + $0x110] sm:$0xff] }
 0xf09   :  { %5515 = vmatprep.subr.mxu1 %v6354_v56 }
 0xfa3   :  { %v2511_v40 = vpop.f32.mrf.mxu0  ;;  %v2582_v41 = vpop.f32.mrf.mxu1 }
 0xfa4   :  { %v2583_v47 = vadd.f32 %v2582_v41, %v2412_v35  ;;  %v2512_v58 = vadd.f32 %v2511_v40, %v2404_v45  ;;  %v3059_v35 = vld [vmem:[%s7340_s20 + $0x38] sm:$0xff]  ;;  %v3054_v40 = vld [vmem:[%s7340_s20 + $0x10] sm:$0xff]  ;;  %v3053_v41 = vld [vmem:[%s7340_s20 + $0x8] sm:$0xff] }
 0xfa5   :  { %v2513_v48 = vpop.f32.mrf.mxu0  ;;  %v2584_v49 = vpop.f32.mrf.mxu1 }
 0xfa6   :  { %v2514_v51 = vadd.f32 %v2513_v48, %v2408_v37  ;;  %v2585_v52 = vadd.f32 %v2584_v49, %v2416_v38  ;;  %v2733_v62 = vrot.slane %v2583_v47, 6  ;;  %v3057_v37 = vld [vmem:[%s7340_s20 + $0x28] sm:$0xff]  ;;  %v3056_v38 = vld [vmem:[%s7340_s20 + $0x20] sm:$0xff]  ;;  %v6953_v49 = vld [vmem:[#allocation25] sm:$0x7] }
 0xfa7   :  { %v2653_v54 = vpop.f32.mrf.mxu0  ;;  %v2724_v55 = vpop.f32.mrf.mxu1 }
 0xfa8   :  { %v2730_v59 = vrot.slane %v2514_v51, 7  ;;  %v2654_v60 = vadd.f32 %v2653_v54, %v2420_v46  ;;  %v2725_v61 = vadd.f32 %v2724_v55, %v2428_v50  ;;  %v2736_v3 = vrot.slane %v2585_v52, 5 }
 0xfa9   :  { %v2655_v0 = vpop.f32.mrf.mxu0  ;;  %v2726_v1 = vpop.f32.mrf.mxu1  ;;  %v3033_v51 = vrot.slane %v6953_v49, %v6651_v63 }
 0xfaa   :  { %v2750_v2 = vsel %vm399_vm2, %v2512_v58, %v2730_v59  ;;  %v2739_v4 = vrot.slane %v2654_v60, 4  ;;  %v2656_v5 = vadd.f32 %v2655_v0, %v2424_v53  ;;  %v2727_v7 = vadd.f32 %v2726_v1, %v2432_v57 }
 0xfab   :  { %v2752_v6 = vsel %vm2751_vm5, %v2750_v2, %v2733_v62  ;;  %v2745_v11 = vrot.slane %v2725_v61, 2 }
 0xfac   :  { %v2753_v8 = vsel %vm1783_vm11, %v2752_v6, %v2736_v3  ;;  %v2742_v9 = vrot.slane %v2656_v5, 3  ;;  %v2748_v13 = vrot.slane %v2727_v7, 1 }
 0xfad   :  { %v2755_v10 = vsel %vm2754_vm6, %v2753_v8, %v2739_v4 }
 0xfae   :  { %v2757_v12 = vsel %vm2756_vm7, %v2755_v10, %v2742_v9  ;;  %v3168_v10 = vld [vmem:[%s7341_s6 + $0x38] sm:$0xff] }
 0xfaf   :  { %v2759_v14 = vsel %vm2758_vm8, %v2757_v12, %v2745_v11  ;;  %v3167_v11 = vld [vmem:[%s7341_s6 + $0x30] sm:$0xff]  ;;  %v3166_v12 = vld [vmem:[%s7341_s6 + $0x28] sm:$0xff] }
 0xfb0   :  { %v2760_v16 = vsel %vm405_vm3, %v2759_v14, %v2748_v13  ;;  %v3165_v13 = vld [vmem:[%s7341_s6 + $0x20] sm:$0xff]  ;;  %v3164_v14 = vld [vmem:[%s7341_s6 + $0x18] sm:$0xff] }
 0xfb1   :  { %v2762_v18 = vrot.slane %v2760_v16, 7  ;;  %5443 = vmatmul.mubr.f32.vlgmr.msra.gmra.mxu0 %v2760_v16  ;;  %v2765_v34 = vrot.slane %v2760_v16, 1  ;;  %v3162_v16 = vld [vmem:[%s7341_s6 + $0x8] sm:$0xff] }
 0xfb2   :  { %5481 = vmatpush3.msra.mxu0 %v4829_v15  ;;  %5512 = vmatprep.mubr.msk.f32.mxu0 %vm6355_vm4, %v6354_v56  ;;  %v3163_v15 = vld [vmem:[%s7341_s6 + $0x10] sm:$0xff] }
 0xfb3   :  { %5482 = vmatprep.subr.mxu0 %v6354_v56  ;;  %5478 = vmatmul.mubr.msk.f32.vlgmr.msra.gmra.mxu1 %vm6896_vm9, %v2762_v18  ;;  %v3161_v18 = vld [vmem:[%s7341_s6] sm:$0xff] }
 0xfb4   :  { %5483 = vmatpush3.msra.mxu0 %v4828_v19  ;;  %5531 = vmatprep.mubr.msk.f32.mxu1 %vm6355_vm4, %v6354_v56 }
 0xfb5   :  { %5484 = vmatprep.subr.mxu0 %v6354_v56  ;;  %5516 = vmatpush3.msra.mxu1 %v3059_v35 }
 0xfb6   :  { %5485 = vmatpush3.msra.mxu0 %v4827_v20  ;;  %5517 = vmatprep.subr.mxu1 %v6354_v56 }
 0xfb7   :  { %5486 = vmatprep.subr.mxu0 %v6354_v56  ;;  %5518 = vmatpush3.msra.mxu1 %v3058_v36 }
 0xfb8   :  { %5487 = vmatpush3.msra.mxu0 %v4826_v21  ;;  %5519 = vmatprep.subr.mxu1 %v6354_v56 }
 0xfb9   :  { %5488 = vmatprep.subr.mxu0 %v6354_v56  ;;  %5520 = vmatpush3.msra.mxu1 %v3057_v37  ;;  %v3242_v37 = vld [vmem:[%s7342_s4] sm:$0xff] }
 0xfba   :  { %5489 = vmatpush3.msra.mxu0 %v4825_v22  ;;  %5521 = vmatprep.subr.mxu1 %v6354_v56 }
 0xfbb   :  { %5490 = vmatprep.subr.mxu0 %v6354_v56  ;;  %5522 = vmatpush3.msra.mxu1 %v3056_v38  ;;  %v4850_v38 = vld [vmem:[%s7343_s11 + $0xf8] sm:$0xff] }
 0xfbc   :  { %5491 = vmatpush3.msra.mxu0 %v4824_v23  ;;  %5523 = vmatprep.subr.mxu1 %v6354_v56 }
 0xfbd   :  { %5492 = vmatprep.subr.mxu0 %v6354_v56  ;;  %5524 = vmatpush3.msra.mxu1 %v3055_v39  ;;  %v4849_v39 = vld [vmem:[%s7343_s11 + $0xf0] sm:$0xff] }
 0xfbe   :  { %5493 = vmatpush3.msra.mxu0 %v4823_v24  ;;  %5525 = vmatprep.subr.mxu1 %v6354_v56 }
 0xfbf   :  { %5494 = vmatprep.subr.mxu0 %v6354_v56  ;;  %5526 = vmatpush3.msra.mxu1 %v3054_v40  ;;  %v4848_v40 = vld [vmem:[%s7343_s11 + $0xe8] sm:$0xff] }
 0xfc0   :  { %5495 = vmatpush3.msra.mxu0 %v4822_v25  ;;  %5527 = vmatprep.subr.mxu1 %v6354_v56 }
 0xfc1   :  { %5496 = vmatprep.subr.mxu0 %v6354_v56  ;;  %5528 = vmatpush3.msra.mxu1 %v3053_v41  ;;  %v4847_v41 = vld [vmem:[%s7343_s11 + $0xe0] sm:$0xff] }
 0xfc2   :  { %5497 = vmatpush3.msra.mxu0 %v4821_v26  ;;  %5529 = vmatprep.subr.mxu1 %v6354_v56 }
 0xfc3   :  { %5498 = vmatprep.subr.mxu0 %v6354_v56  ;;  %5530 = vmatpush3.msra.mxu1 %v3052_v43  ;;  %v4846_v43 = vld [vmem:[%s7343_s11 + $0xd8] sm:$0xff] }
 0xfc4   :  { %5499 = vmatpush3.msra.mxu0 %v4820_v27  ;;  %5534 = vmatprep.subr.mxu1 %v6354_v56 }
 0xfc5   :  { %5500 = vmatprep.subr.mxu0 %v6354_v56 }
 0xfc6   :  { %5501 = vmatpush3.msra.mxu0 %v4819_v28 }
 0xfc7   :  { %5502 = vmatprep.subr.mxu0 %v6354_v56 }
 0xfc8   :  { %5503 = vmatpush3.msra.mxu0 %v4818_v29 }
 0xfc9   :  { %5504 = vmatprep.subr.mxu0 %v6354_v56 }
 0xfca   :  { %5505 = vmatpush3.msra.mxu0 %v4817_v30  ;;  %v3156_v30 = vrot.slane %v6953_v49, %v6663_v42 }
 0xfcb   :  { %5506 = vmatprep.subr.mxu0 %v6354_v56 }
 0xfcc   :  { %5507 = vmatpush3.msra.mxu0 %v4816_v31 }
 0xfcd   :  { %5508 = vmatprep.subr.mxu0 %v6354_v56 }
 0xfce   :  { %5509 = vmatpush3.msra.mxu0 %v4815_v32 }
 0xfcf   :  { %5510 = vmatprep.subr.mxu0 %v6354_v56 }
 0xfd0   :  { %5511 = vmatpush3.msra.mxu0 %v4814_v33 }
 0xfd1   :  { %5513 = vmatmul.mubr.msk.f32.vlgmr.msra.gmra.mxu0 %vm405_vm3, %v2765_v34 }
 0xfd2   :  { %5555 = vmatprep.mubr.msk.f32.mxu0 %vm2441_vm15, %v3242_v37  ;;  %v3651_v37 = vld [vmem:[%s7344_s27 + $0x38] sm:$0xff] }
0x1071   :  { %v2867_v45 = vpop.f32.mrf.mxu0 }
0x1073   :  { %v5444_v46 = vpop.f32.mrf.mxu0  ;;  %v2937_v47 = vpop.f32.mrf.mxu1 }
0x1074   :  { %v2938_v50 = vadd.f32 %v2937_v47, %v2867_v45  ;;  %v4845_v45 = vld [vmem:[%s7343_s11 + $0xd0] sm:$0xff]  ;;  %v4844_v46 = vld [vmem:[%s7343_s11 + $0xc8] sm:$0xff]  ;;  %v4843_v47 = vld [vmem:[%s7343_s11 + $0xc0] sm:$0xff] }
0x1075   :  { %v5479_v48 = vpop.f32.mrf.mxu1 }
0x1076   :  { %v4842_v48 = vld [vmem:[%s7343_s11 + $0xb8] sm:$0xff] }
0x1091   :  { %v3024_v52 = vpop.f32.mrf.mxu0 }
0x1092   :  { %v3028_v53 = vadd.f32 %v3024_v52, %v2938_v50  ;;  %v4840_v50 = vld [vmem:[%s7343_s11 + $0xa8] sm:$0xff]  ;;  %v4838_v52 = vld [vmem:[%s7343_s11 + $0x98] sm:$0xff] }
0x1093   :  { %v5514_v54 = vpop.f32.mrf.mxu0 }
0x1094   :  { %v3034_v55 = vadd.f32 %v3033_v51, %v3028_v53  ;;  %v4839_v51 = vld [vmem:[%s7343_s11 + $0xa0] sm:$0xff]  ;;  %v4837_v53 = vld [vmem:[%s7343_s11 + $0x90] sm:$0xff]  ;;  %v4836_v54 = vld [vmem:[%s7343_s11 + $0x88] sm:$0xff] }
0x1096   :  { %v3036_v57 = vsel %vm3035_vm10, %v3034_v55, 0.0  ;;  %v3043_v58 = vmul.f32 %v3034_v55, %v3034_v55 }
0x1097   :  { %v3037_v59 = vrot.slane %v3036_v57, 4 }
0x1098   :  { %v3044_v60 = vsel %vm3035_vm10, %v3043_v58, 0.0  ;;  %v3354_v58 = vld [vmem:[%s7343_s11 + $0x78] sm:$0xff] }
0x1099   :  { %v3038_v62 = vadd.f32 %v3037_v59, %v3036_v57  ;;  %v3045_v61 = vrot.slane %v3044_v60, 4  ;;  %v3243_v57 = vld [vmem:[%s7342_s4 + $0x8] sm:$0xff] }
0x109b   :  { %v3039_v0 = vrot.slane %v3038_v62, 2  ;;  %v3046_v1 = vadd.f32 %v3045_v61, %v3044_v60  ;;  %v3353_v60 = vld [vmem:[%s7343_s11 + $0x70] sm:$0xff]  ;;  %v3351_v61 = vld [vmem:[%s7343_s11 + $0x60] sm:$0xff] }
0x109d   :  { %v3040_v2 = vadd.f32 %v3039_v0, %v3038_v62  ;;  %v3047_v3 = vrot.slane %v3046_v1, 2  ;;  %v3352_v62 = vld [vmem:[%s7343_s11 + $0x68] sm:$0xff]  ;;  %v3350_v0 = vld [vmem:[%s7343_s11 + $0x58] sm:$0xff] }
0x109f   :  { %v3041_v4 = vrot.slane %v3040_v2, 1  ;;  %v3048_v5 = vadd.f32 %v3047_v3, %v3046_v1  ;;  %v3349_v1 = vld [vmem:[%s7343_s11 + $0x50] sm:$0xff]  ;;  %v3347_v3 = vld [vmem:[%s7343_s11 + $0x40] sm:$0xff] }
0x10a1   :  { %v3049_v6 = vrot.slane %v3048_v5, 1  ;;  %v3042_v7 = vadd.f32 %v3041_v4, %v3040_v2  ;;  %v3348_v2 = vld [vmem:[%s7343_s11 + $0x48] sm:$0xff]  ;;  %v3346_v4 = vld [vmem:[%s7343_s11 + $0x38] sm:$0xff] }
0x10a3   :  { %v3050_v8 = vadd.f32 %v3049_v6, %v3048_v5  ;;  %v3345_v5 = vld [vmem:[%s7343_s11 + $0x30] sm:$0xff]  ;;  %v3344_v6 = vld [vmem:[%s7343_s11 + $0x28] sm:$0xff] }
0x10a5   :  { %v3051_v9 = vsel %vm399_vm2, %v3042_v7, %v3050_v8  ;;  %v3343_v7 = vld [vmem:[%s7343_s11 + $0x20] sm:$0xff]  ;;  %v3342_v8 = vld [vmem:[%s7343_s11 + $0x18] sm:$0xff] }
0x10a6   :  { %5532 = vmatmul.mubr.msk.f32.vlgmr.msra.gmra.mxu1 %vm3035_vm10, %v3051_v9  ;;  %v3341_v9 = vld [vmem:[%s7343_s11 + $0x10] sm:$0xff] }
0x10a7   :  { %5550 = vmatprep.mubr.msk.f32.mxu1 %vm6355_vm4, %v6354_v56  ;;  %5535 = vmatpush3.msra.mxu1 %v3168_v10  ;;  %v4835_v10 = vld [vmem:[%s7343_s11 + $0x80] sm:$0xff] }
0x10a8   :  { %5536 = vmatprep.subr.mxu1 %v6354_v56 }
0x10a9   :  { %5537 = vmatpush3.msra.mxu1 %v3167_v11  ;;  %v3340_v11 = vld [vmem:[%s7343_s11 + $0x8] sm:$0xff] }
0x10aa   :  { %5538 = vmatprep.subr.mxu1 %v6354_v56 }
0x10ab   :  { %5539 = vmatpush3.msra.mxu1 %v3166_v12  ;;  %v4868_v12 = vld [vmem:[%s7343_s11 + $0x178] sm:$0xff] }
0x10ac   :  { %5540 = vmatprep.subr.mxu1 %v6354_v56 }
0x10ad   :  { %5541 = vmatpush3.msra.mxu1 %v3165_v13  ;;  %v3339_v13 = vld [vmem:[%s7343_s11] sm:$0xff] }
0x10ae   :  { %5542 = vmatprep.subr.mxu1 %v6354_v56 }
0x10af   :  { %5543 = vmatpush3.msra.mxu1 %v3164_v14 }
0x10b0   :  { %5544 = vmatprep.subr.mxu1 %v6354_v56 }
0x10b1   :  { %5545 = vmatpush3.msra.mxu1 %v3163_v15 }
0x10b2   :  { %5546 = vmatprep.subr.mxu1 %v6354_v56 }
0x10b3   :  { %5547 = vmatpush3.msra.mxu1 %v3162_v16 }
0x10b4   :  { %5548 = vmatprep.subr.mxu1 %v6354_v56 }
0x10b5   :  { %5549 = vmatpush3.msra.mxu1 %v3161_v18 }
0x10b6   :  { %5558 = vmatprep.subr.mxu1 %v4850_v38 }
0x1166   :  { %v3129_v19 = vpop.f32.mrf.mxu1 }
0x1167   :  { %v3133_v20 = vmul.f32 0.0078125, %v3129_v19 }
0x1168   :  { %v5533_v21 = vpop.f32.mrf.mxu1 }
0x1169   :  { %v3134_v22 = vmul.f32 %v3133_v20, %v3133_v20  ;;  %v3143_v27 = vrot.slane %v3133_v20, %v6651_v63  ;;  %v4867_v21 = vld [vmem:[%s7343_s11 + $0x170] sm:$0xff] }
0x116b   :  { %v3136_v23 = vrot.slane %v3134_v22, 7  ;;  %v3144_v31 = vsub.f32 %v3034_v55, %v3143_v27  ;;  %v4862_v27 = vld [vmem:[%s7343_s11 + $0x148] sm:$0xff] }
0x116d   :  { %v3138_v24 = vsub.f32 %v3133_v20, %v3136_v23 }
0x116f   :  { %v3139_v25 = vmax.f32 %v3138_v24, 0.0  ;;  %v4866_v24 = vld [vmem:[%s7343_s11 + $0x168] sm:$0xff] }
0x1171   :  { %v3145_v26 = vadd.f32 1e-05, %v3139_v25  ;;  %v4865_v25 = vld [vmem:[%s7343_s11 + $0x160] sm:$0xff] }
0x1173   :  { %5854 = vrsqrt.f32 %v3145_v26  ;;  %v4863_v26 = vld [vmem:[%s7343_s11 + $0x150] sm:$0xff] }
0x1180   :  { %v5855_v28 = vpop.eup %5854 }
0x1181   :  { %v3147_v29 = vmul.f32 %v5855_v28, %v6953_v49  ;;  %v4841_v49 = vld [vmem:[%s7343_s11 + $0xb0] sm:$0xff]  ;;  %v4861_v28 = vld [vmem:[%s7343_s11 + $0x140] sm:$0xff] }
0x1183   :  { %v3151_v32 = vrot.slane %v3147_v29, %v6667_v44  ;;  %v4860_v29 = vld [vmem:[%s7343_s11 + $0x138] sm:$0xff] }
0x1185   :  { %v3152_v33 = vmul.f32 %v3151_v32, %v3144_v31  ;;  %v4858_v31 = vld [vmem:[%s7343_s11 + $0x128] sm:$0xff]  ;;  %v4857_v32 = vld [vmem:[%s7343_s11 + $0x120] sm:$0xff] }
0x1187   :  { %v3157_v34 = vadd.f32 %v3156_v30, %v3152_v33  ;;  %v4859_v30 = vld [vmem:[%s7343_s11 + $0x130] sm:$0xff]  ;;  %v4856_v33 = vld [vmem:[%s7343_s11 + $0x118] sm:$0xff] }
0x1189   :  { %vm3158_vm11 = vcmp.ge.f32.partialorder %v3157_v34, 0.0  ;;  %v3159_v35 = vmul.f32 0.1, %v3157_v34 }
0x118b   :  { %v3160_v36 = vsel %vm3158_vm11, %v3157_v34, %v3159_v35  ;;  %v4855_v34 = vld [vmem:[%s7343_s11 + $0x110] sm:$0xff]  ;;  %v4854_v35 = vld [vmem:[%s7343_s11 + $0x108] sm:$0xff] }
0x118c   :  { %5551 = vmatmul.mubr.msk.f32.vlgmr.msra.gmra.mxu1 %vm3035_vm10, %v3160_v36  ;;  %v4853_v36 = vld [vmem:[%s7343_s11 + $0x100] sm:$0xff] }
0x118d   :  { %5559 = vmatpush3.msra.mxu1 %v4850_v38  ;;  %v3650_v38 = vld [vmem:[%s7344_s27 + $0x30] sm:$0xff] }
0x118e   :  { %5560 = vmatprep.subr.mxu1 %v4849_v39 }
0x118f   :  { %5561 = vmatpush3.msra.mxu1 %v4849_v39  ;;  %v3649_v39 = vld [vmem:[%s7344_s27 + $0x28] sm:$0xff] }
0x1190   :  { %5562 = vmatprep.subr.mxu1 %v4848_v40 }
0x1191   :  { %5563 = vmatpush3.msra.mxu1 %v4848_v40  ;;  %v3648_v40 = vld [vmem:[%s7344_s27 + $0x20] sm:$0xff] }
0x1192   :  { %5564 = vmatprep.subr.mxu1 %v4847_v41 }
0x1193   :  { %5565 = vmatpush3.msra.mxu1 %v4847_v41  ;;  %v3647_v41 = vld [vmem:[%s7344_s27 + $0x18] sm:$0xff] }
0x1194   :  { %5566 = vmatprep.subr.mxu1 %v4846_v43 }
0x1195   :  { %5567 = vmatpush3.msra.mxu1 %v4846_v43  ;;  %v3646_v43 = vld [vmem:[%s7344_s27 + $0x10] sm:$0xff] }
0x1196   :  { %5568 = vmatprep.subr.mxu1 %v4845_v45 }
0x1197   :  { %5569 = vmatpush3.msra.mxu1 %v4845_v45  ;;  %v3645_v45 = vld [vmem:[%s7344_s27 + $0x8] sm:$0xff] }
0x1198   :  { %5570 = vmatprep.subr.mxu1 %v4844_v46 }
0x1199   :  { %5571 = vmatpush3.msra.mxu1 %v4844_v46  ;;  %v3644_v46 = vld [vmem:[%s7344_s27] sm:$0xff] }
0x119a   :  { %5572 = vmatprep.subr.mxu1 %v4843_v47 }
0x119b   :  { %5573 = vmatpush3.msra.mxu1 %v4843_v47 }
0x119c   :  { %5574 = vmatprep.subr.mxu1 %v4842_v48 }
0x119d   :  { %5575 = vmatpush3.msra.mxu1 %v4842_v48 }
0x119e   :  { %5576 = vmatprep.subr.mxu1 %v4841_v49 }
0x119f   :  { %5577 = vmatpush3.msra.mxu1 %v4841_v49  ;;  %v7059_v49 = vld [vmem:[#allocation26] sm:$0x7] }
0x11a0   :  { %5578 = vmatprep.subr.mxu1 %v4840_v50 }
0x11a1   :  { %5579 = vmatpush3.msra.mxu1 %v4840_v50 }
0x11a2   :  { %5580 = vmatprep.subr.mxu1 %v4839_v51 }
0x11a3   :  { %5581 = vmatpush3.msra.mxu1 %v4839_v51 }
0x11a4   :  { %5582 = vmatprep.subr.mxu1 %v4838_v52 }
0x11a5   :  { %5583 = vmatpush3.msra.mxu1 %v4838_v52 }
0x11a6   :  { %5584 = vmatprep.subr.mxu1 %v4837_v53 }
0x11a7   :  { %5585 = vmatpush3.msra.mxu1 %v4837_v53  ;;  %v3620_v53 = vrot.slane %v7059_v49, %v6651_v63 }
0x11a8   :  { %5586 = vmatprep.subr.mxu1 %v4836_v54 }
0x11a9   :  { %5587 = vmatpush3.msra.mxu1 %v4836_v54 }
0x11aa   :  { %5588 = vmatprep.subr.mxu1 %v4835_v10 }
0x11ab   :  { %5589 = vmatpush3.msra.mxu1 %v4835_v10 }
0x11ac   :  { %5628 = vmatprep.subr.mxu1 %v4868_v12 }
0x124c   :  { %v3238_v55 = vpop.f32.mrf.mxu1 }
0x124d   :  { %5553 = vmatprep.subr.mxu0 %v3238_v55 }
0x124e   :  { %v5552_v59 = vpop.f32.mrf.mxu1  ;;  %5554 = vmatpush3.msra.mxu0 %v3238_v55 }
0x124f   :  { %5556 = vmatmul.mubr.msk.f32.vlgmr.msra.gmra.mxu0 %vm2441_vm15, %v3243_v57  ;;  %5593 = vmatprep.subr.mxu0 %v3354_v58 }
0x1250   :  { %5594 = vmatpush3.msra.mxu0 %v3354_v58 }
0x1251   :  { %5595 = vmatprep.subr.mxu0 %v3353_v60 }
0x1252   :  { %5596 = vmatpush3.msra.mxu0 %v3353_v60 }
0x1253   :  { %5597 = vmatprep.subr.mxu0 %v3352_v62 }
0x1254   :  { %5598 = vmatpush3.msra.mxu0 %v3352_v62 }
0x1255   :  { %5599 = vmatprep.subr.mxu0 %v3351_v61 }
0x1256   :  { %5600 = vmatpush3.msra.mxu0 %v3351_v61 }
0x1257   :  { %5601 = vmatprep.subr.mxu0 %v3350_v0 }
0x1258   :  { %5602 = vmatpush3.msra.mxu0 %v3350_v0 }
0x1259   :  { %5603 = vmatprep.subr.mxu0 %v3349_v1 }
0x125a   :  { %5604 = vmatpush3.msra.mxu0 %v3349_v1 }
0x125b   :  { %5605 = vmatprep.subr.mxu0 %v3348_v2 }
0x125c   :  { %5606 = vmatpush3.msra.mxu0 %v3348_v2 }
0x125d   :  { %5607 = vmatprep.subr.mxu0 %v3347_v3 }
0x125e   :  { %5608 = vmatpush3.msra.mxu0 %v3347_v3 }
0x125f   :  { %5609 = vmatprep.subr.mxu0 %v3346_v4 }
0x1260   :  { %5610 = vmatpush3.msra.mxu0 %v3346_v4 }
0x1261   :  { %5611 = vmatprep.subr.mxu0 %v3345_v5 }
0x1262   :  { %5612 = vmatpush3.msra.mxu0 %v3345_v5 }
0x1263   :  { %5613 = vmatprep.subr.mxu0 %v3344_v6 }
0x1264   :  { %5614 = vmatpush3.msra.mxu0 %v3344_v6 }
0x1265   :  { %5615 = vmatprep.subr.mxu0 %v3343_v7 }
0x1266   :  { %5616 = vmatpush3.msra.mxu0 %v3343_v7 }
0x1267   :  { %5617 = vmatprep.subr.mxu0 %v3342_v8 }
0x1268   :  { %5618 = vmatpush3.msra.mxu0 %v3342_v8 }
0x1269   :  { %5619 = vmatprep.subr.mxu0 %v3341_v9 }
0x126a   :  { %5620 = vmatpush3.msra.mxu0 %v3341_v9 }
0x126b   :  { %5621 = vmatprep.subr.mxu0 %v3340_v11 }
0x126c   :  { %5622 = vmatpush3.msra.mxu0 %v3340_v11 }
0x126d   :  { %5623 = vmatprep.subr.mxu0 %v3339_v13 }
0x126e   :  { %5624 = vmatpush3.msra.mxu0 %v3339_v13 }
0x126f   :  { %5663 = vmatprep.subr.mxu0 %v6354_v56 }
0x130f   :  { %v5557_v14 = vpop.f32.mrf.mxu0 }
0x1310   :  { %v3328_v16 = vrot.slane %v5557_v14, 7  ;;  %v3334_v18 = vrot.slane %v5557_v14, 1 }
0x1311   :  { %v3316_v15 = vpop.f32.mrf.mxu0 }
0x1312   :  { %v3327_v19 = vrot.slane %v3316_v15, 7  ;;  %v3333_v20 = vrot.slane %v3316_v15, 1  ;;  %5590 = vmatprep.mubr.f32.mxu1 %v3316_v15 }
0x1313   :  { %5591 = vmatmul.mubr.f32.vlgmr.msra.gmra.mxu1 %v5557_v14 }
0x1314   :  { %5629 = vmatpush3.msra.mxu1 %v4868_v12  ;;  %5625 = vmatprep.mubr.msk.f32.mxu0 %vm6896_vm9, %v3327_v19  ;;  %v3329_v22 = vsel %vm399_vm2, %v3327_v19, %v3328_v16  ;;  %v3335_v23 = vsel %vm405_vm3, %v3333_v20, %v3334_v18 }
0x1315   :  { %5630 = vmatprep.subr.mxu1 %v4867_v21  ;;  %5626 = vmatmul.mubr.f32.vlgmr.msra.gmra.mxu0 %v3329_v22  ;;  %v3765_v22 = vld [vmem:[%s6546_s25 + $0x30] sm:$0xff] }
0x1316   :  { %5631 = vmatpush3.msra.mxu1 %v4867_v21  ;;  %5660 = vmatprep.mubr.f32.mxu1 %v3335_v23  ;;  %v3766_v21 = vld [vmem:[%s6546_s25 + $0x38] sm:$0xff]  ;;  %v3764_v23 = vld [vmem:[%s6546_s25 + $0x28] sm:$0xff] }
0x1317   :  { %5632 = vmatprep.subr.mxu1 %v4866_v24  ;;  %5679 = vmatprep.mubr.msk.f32.mxu0 %vm6355_vm4, %v6354_v56 }
0x1318   :  { %5633 = vmatpush3.msra.mxu1 %v4866_v24  ;;  %5664 = vmatpush3.msra.mxu0 %v3651_v37  ;;  %v3763_v24 = vld [vmem:[%s6546_s25 + $0x20] sm:$0xff] }
0x1319   :  { %5634 = vmatprep.subr.mxu1 %v4865_v25  ;;  %5665 = vmatprep.subr.mxu0 %v6354_v56 }
0x131a   :  { %5635 = vmatpush3.msra.mxu1 %v4865_v25  ;;  %5666 = vmatpush3.msra.mxu0 %v3650_v38  ;;  %v3762_v25 = vld [vmem:[%s6546_s25 + $0x18] sm:$0xff] }
0x131b   :  { %5636 = vmatprep.subr.mxu1 %v4864_v17  ;;  %5667 = vmatprep.subr.mxu0 %v6354_v56 }
0x131c   :  { %5637 = vmatpush3.msra.mxu1 %v4864_v17  ;;  %5668 = vmatpush3.msra.mxu0 %v3649_v39  ;;  %v3761_v17 = vld [vmem:[%s6546_s25 + $0x10] sm:$0xff]  ;;  %v3750_v39 = vrot.slane %v7059_v49, %v6663_v42 }
0x131d   :  { %5638 = vmatprep.subr.mxu1 %v4863_v26  ;;  %5669 = vmatprep.subr.mxu0 %v6354_v56 }
0x131e   :  { %5639 = vmatpush3.msra.mxu1 %v4863_v26  ;;  %5670 = vmatpush3.msra.mxu0 %v3648_v40  ;;  %v3760_v26 = vld [vmem:[%s6546_s25 + $0x8] sm:$0xff] }
0x131f   :  { %5640 = vmatprep.subr.mxu1 %v4862_v27  ;;  %5671 = vmatprep.subr.mxu0 %v6354_v56 }
0x1320   :  { %5641 = vmatpush3.msra.mxu1 %v4862_v27  ;;  %5672 = vmatpush3.msra.mxu0 %v3647_v41  ;;  %v3759_v27 = vld [vmem:[%s6546_s25] sm:$0xff]  ;;  %s7345_s25 = sld [smem:[#allocation64_spill]] }
0x1321   :  { %5642 = vmatprep.subr.mxu1 %v4861_v28  ;;  %5673 = vmatprep.subr.mxu0 %v6354_v56 }
0x1322   :  { %5643 = vmatpush3.msra.mxu1 %v4861_v28  ;;  %5674 = vmatpush3.msra.mxu0 %v3646_v43 }
0x1323   :  { %5644 = vmatprep.subr.mxu1 %v4860_v29  ;;  %5675 = vmatprep.subr.mxu0 %v6354_v56 }
0x1324   :  { %5645 = vmatpush3.msra.mxu1 %v4860_v29  ;;  %5676 = vmatpush3.msra.mxu0 %v3645_v45 }
0x1325   :  { %5646 = vmatprep.subr.mxu1 %v4859_v30  ;;  %5677 = vmatprep.subr.mxu0 %v6354_v56 }
0x1326   :  { %5647 = vmatpush3.msra.mxu1 %v4859_v30  ;;  %5678 = vmatpush3.msra.mxu0 %v3644_v46 }
0x1327   :  { %5648 = vmatprep.subr.mxu1 %v4858_v31  ;;  %5682 = vmatprep.subr.mxu0 %v3766_v21 }
0x1328   :  { %5649 = vmatpush3.msra.mxu1 %v4858_v31 }
0x1329   :  { %5650 = vmatprep.subr.mxu1 %v4857_v32 }
0x132a   :  { %5651 = vmatpush3.msra.mxu1 %v4857_v32 }
0x132b   :  { %5652 = vmatprep.subr.mxu1 %v4856_v33 }
0x132c   :  { %5653 = vmatpush3.msra.mxu1 %v4856_v33 }
0x132d   :  { %5654 = vmatprep.subr.mxu1 %v4855_v34 }
0x132e   :  { %5655 = vmatpush3.msra.mxu1 %v4855_v34 }
0x132f   :  { %5656 = vmatprep.subr.mxu1 %v4854_v35 }
0x1330   :  { %5657 = vmatpush3.msra.mxu1 %v4854_v35 }
0x1331   :  { %5658 = vmatprep.subr.mxu1 %v4853_v36 }
0x1332   :  { %5659 = vmatpush3.msra.mxu1 %v4853_v36 }
0x1333   :  { %5661 = vmatmul.mubr.msk.f32.vlgmr.msra.gmra.mxu1 %vm405_vm3, %v3334_v18 }
0x13d3   :  { %v5592_v47 = vpop.f32.mrf.mxu1 }
0x13d5   :  { %v5627_v48 = vpop.f32.mrf.mxu0  ;;  %v3438_v50 = vpop.f32.mrf.mxu1 }
0x13d6   :  { %v3519_v52 = vadd.f32 %v5627_v48, %v5592_v47 }
0x13d7   :  { %v3513_v51 = vpop.f32.mrf.mxu0 }
0x13d8   :  { %v3514_v55 = vadd.f32 %v3513_v51, %v3438_v50 }
0x13f3   :  { %v5662_v54 = vpop.f32.mrf.mxu1 }
0x13f4   :  { %v3615_v57 = vadd.f32 %v5662_v54, %v3519_v52  ;;  %v3964_v54 = vld [vmem:[%s7346_s15 + $0x78] sm:$0xff] }
0x13f5   :  { %v3605_v58 = vpop.f32.mrf.mxu1 }
0x13f6   :  { %v7063_v59 = vadd.f32 %v3620_v53, %v3615_v57  ;;  %v3614_v60 = vadd.f32 %v3605_v58, %v3514_v55  ;;  %v3963_v55 = vld [vmem:[%s7346_s15 + $0x70] sm:$0xff]  ;;  %v3962_v57 = vld [vmem:[%s7346_s15 + $0x68] sm:$0xff]  ;;  %v3961_v58 = vld [vmem:[%s7346_s15 + $0x60] sm:$0xff] }
0x13f8   :  { %v3633_v62 = vmul.f32 %v7063_v59, %v7063_v59  ;;  %v7067_v61 = vadd.f32 %v3620_v53, %v3614_v60  ;;  %v3624_v0 = vsel %vm3035_vm10, %v7063_v59, 0.0  ;;  %v3848_v53 = vld [vmem:[%s7345_s25] sm:$0xff]  ;;  %v3959_v60 = vld [vmem:[%s7346_s15 + $0x50] sm:$0xff] }
0x13f9   :  { %5705 = vmatprep.mubr.msk.f32.mxu1 %vm394_vm0, %v3848_v53 }
0x13fa   :  { %v3623_v1 = vsel %vm3035_vm10, %v7067_v61, 0.0  ;;  %v3632_v2 = vmul.f32 %v7067_v61, %v7067_v61  ;;  %v3635_v4 = vsel %vm3035_vm10, %v3633_v62, 0.0  ;;  %v3958_v62 = vld [vmem:[%s7346_s15 + $0x48] sm:$0xff] }
0x13fb   :  { %v3625_v3 = vadd.f32 %v3624_v0, %v3623_v1  ;;  %v3956_v0 = vld [vmem:[%s7346_s15 + $0x38] sm:$0xff]  ;;  %v3955_v1 = vld [vmem:[%s7346_s15 + $0x30] sm:$0xff] }
0x13fc   :  { %v3634_v5 = vsel %vm3035_vm10, %v3632_v2, 0.0  ;;  %v3954_v2 = vld [vmem:[%s7346_s15 + $0x28] sm:$0xff] }
0x13fd   :  { %v3626_v6 = vrot.slane %v3625_v3, 4  ;;  %v3636_v7 = vadd.f32 %v3635_v4, %v3634_v5  ;;  %v3952_v4 = vld [vmem:[%s7346_s15 + $0x18] sm:$0xff]  ;;  %v3951_v5 = vld [vmem:[%s7346_s15 + $0x10] sm:$0xff] }
0x13ff   :  { %v3627_v8 = vadd.f32 %v3626_v6, %v3625_v3  ;;  %v3637_v9 = vrot.slane %v3636_v7, 4  ;;  %v3953_v3 = vld [vmem:[%s7346_s15 + $0x20] sm:$0xff] }
0x1401   :  { %v3628_v10 = vrot.slane %v3627_v8, 2  ;;  %v3638_v11 = vadd.f32 %v3637_v9, %v3636_v7  ;;  %v3850_v9 = vld [vmem:[%s7345_s25 + $0x10] sm:$0xff] }
0x1403   :  { %v3629_v12 = vadd.f32 %v3628_v10, %v3627_v8  ;;  %v3639_v13 = vrot.slane %v3638_v11, 2  ;;  %v3849_v8 = vld [vmem:[%s7345_s25 + $0x8] sm:$0xff]  ;;  %v3851_v10 = vld [vmem:[%s7345_s25 + $0x18] sm:$0xff] }
0x1405   :  { %v3630_v14 = vrot.slane %v3629_v12, 1  ;;  %v3640_v15 = vadd.f32 %v3639_v13, %v3638_v11  ;;  %v3950_v11 = vld [vmem:[%s7346_s15 + $0x8] sm:$0xff]  ;;  %v4093_v13 = vld [vmem:[%s7347_s16 + $0x78] sm:$0xff] }
0x1407   :  { %v3641_v16 = vrot.slane %v3640_v15, 1  ;;  %v3631_v18 = vadd.f32 %v3630_v14, %v3629_v12  ;;  %v3949_v12 = vld [vmem:[%s7346_s15] sm:$0xff]  ;;  %v4092_v14 = vld [vmem:[%s7347_s16 + $0x70] sm:$0xff] }
0x1409   :  { %v3642_v19 = vadd.f32 %v3641_v16, %v3640_v15 }
0x140b   :  { %v3643_v20 = vsel %vm399_vm2, %v3631_v18, %v3642_v19 }
0x140c   :  { %5680 = vmatmul.mubr.msk.f32.vlgmr.msra.gmra.mxu0 %vm3035_vm10, %v3643_v20  ;;  %v4091_v20 = vld [vmem:[%s7347_s16 + $0x68] sm:$0xff] }
0x140d   :  { %5683 = vmatpush3.msra.mxu0 %v3766_v21  ;;  %v4090_v21 = vld [vmem:[%s7347_s16 + $0x60] sm:$0xff] }
0x140e   :  { %5684 = vmatprep.subr.mxu0 %v3765_v22 }
0x140f   :  { %5685 = vmatpush3.msra.mxu0 %v3765_v22  ;;  %v4089_v22 = vld [vmem:[%s7347_s16 + $0x58] sm:$0xff] }
0x1410   :  { %5686 = vmatprep.subr.mxu0 %v3764_v23 }
0x1411   :  { %5687 = vmatpush3.msra.mxu0 %v3764_v23  ;;  %v4088_v23 = vld [vmem:[%s7347_s16 + $0x50] sm:$0xff] }
0x1412   :  { %5688 = vmatprep.subr.mxu0 %v3763_v24 }
0x1413   :  { %5689 = vmatpush3.msra.mxu0 %v3763_v24  ;;  %v4087_v24 = vld [vmem:[%s7347_s16 + $0x48] sm:$0xff] }
0x1414   :  { %5690 = vmatprep.subr.mxu0 %v3762_v25 }
0x1415   :  { %5691 = vmatpush3.msra.mxu0 %v3762_v25  ;;  %v4086_v25 = vld [vmem:[%s7347_s16 + $0x40] sm:$0xff] }
0x1416   :  { %5692 = vmatprep.subr.mxu0 %v3761_v17 }
0x1417   :  { %5693 = vmatpush3.msra.mxu0 %v3761_v17  ;;  %v4085_v17 = vld [vmem:[%s7347_s16 + $0x38] sm:$0xff] }
0x1418   :  { %5694 = vmatprep.subr.mxu0 %v3760_v26 }
0x1419   :  { %5695 = vmatpush3.msra.mxu0 %v3760_v26  ;;  %v4084_v26 = vld [vmem:[%s7347_s16 + $0x30] sm:$0xff] }
0x141a   :  { %5696 = vmatprep.subr.mxu0 %v3759_v27 }
0x141b   :  { %5697 = vmatpush3.msra.mxu0 %v3759_v27  ;;  %v4083_v27 = vld [vmem:[%s7347_s16 + $0x28] sm:$0xff] }
0x141c   :  { %5711 = vmatprep.subr.mxu0 %v3964_v54 }
0x14cc   :  { %v3721_v28 = vpop.f32.mrf.mxu0 }
0x14cd   :  { %v3725_v29 = vmul.f32 0.001953125, %v3721_v28  ;;  %v4082_v28 = vld [vmem:[%s7347_s16 + $0x20] sm:$0xff] }
0x14ce   :  { %v5681_v30 = vpop.f32.mrf.mxu0 }
0x14cf   :  { %v3726_v31 = vmul.f32 %v3725_v29, %v3725_v29  ;;  %v3735_v36 = vrot.slane %v3725_v29, %v6651_v63  ;;  %v4080_v30 = vld [vmem:[%s7347_s16 + $0x10] sm:$0xff] }
0x14d1   :  { %v3728_v32 = vrot.slane %v3726_v31, 7  ;;  %v3736_v40 = vsub.f32 %v7067_v61, %v3735_v36  ;;  %v3737_v41 = vsub.f32 %v7063_v59, %v3735_v36  ;;  %v3960_v59 = vld [vmem:[%s7346_s15 + $0x58] sm:$0xff]  ;;  %v3957_v61 = vld [vmem:[%s7346_s15 + $0x40] sm:$0xff]  ;;  %v4079_v31 = vld [vmem:[%s7347_s16 + $0x8] sm:$0xff] }
0x14d3   :  { %v3730_v33 = vsub.f32 %v3725_v29, %v3728_v32  ;;  %v4081_v29 = vld [vmem:[%s7347_s16 + $0x18] sm:$0xff]  ;;  %v4078_v32 = vld [vmem:[%s7347_s16] sm:$0xff] }
0x14d5   :  { %v3731_v34 = vmax.f32 %v3730_v33, 0.0  ;;  %v7155_v33 = vld [vmem:[#allocation28] sm:$0x7] }
0x14d7   :  { %v3738_v35 = vadd.f32 1e-05, %v3731_v34  ;;  %v3969_v34 = vrot.slane %v7155_v33, %v6651_v63 }
0x14d9   :  { %5856 = vrsqrt.f32 %v3738_v35 }
0x14e6   :  { %v5857_v37 = vpop.eup %5856 }
0x14e7   :  { %v3740_v38 = vmul.f32 %v5857_v37, %v7059_v49 }
0x14e9   :  { %v3744_v43 = vrot.slane %v3740_v38, %v6667_v44 }
0x14eb   :  { %v3745_v45 = vmul.f32 %v3744_v43, %v3736_v40  ;;  %v3746_v46 = vmul.f32 %v3744_v43, %v3737_v41 }
0x14ed   :  { %v3751_v47 = vadd.f32 %v3750_v39, %v3745_v45  ;;  %v3752_v48 = vadd.f32 %v3750_v39, %v3746_v46 }
0x14ef   :  { %vm3753_vm3 = vcmp.ge.f32.partialorder %v3751_v47, 0.0  ;;  %v3755_v50 = vmul.f32 0.1, %v3751_v47  ;;  %vm3754_vm12 = vcmp.ge.f32.partialorder %v3752_v48, 0.0  ;;  %v3756_v51 = vmul.f32 0.1, %v3752_v48 }
0x14f1   :  { %v3757_v49 = vsel %vm3753_vm3, %v3751_v47, %v3755_v50  ;;  %v3758_v52 = vsel %vm3754_vm12, %v3752_v48, %v3756_v51 }
0x14f2   :  { %5698 = vmatprep.mubr.msk.f32.mxu0 %vm3035_vm10, %v3757_v49 }
0x14f3   :  { %5699 = vmatmul.mubr.msk.f32.vlgmr.msra.gmra.mxu0 %vm3035_vm10, %v3758_v52 }
0x14f4   :  { %5712 = vmatpush3.msra.mxu0 %v3964_v54 }
0x14f5   :  { %5713 = vmatprep.subr.mxu0 %v3963_v55 }
0x14f6   :  { %5714 = vmatpush3.msra.mxu0 %v3963_v55 }
0x14f7   :  { %5715 = vmatprep.subr.mxu0 %v3962_v57 }
0x14f8   :  { %5716 = vmatpush3.msra.mxu0 %v3962_v57 }
0x14f9   :  { %5717 = vmatprep.subr.mxu0 %v3961_v58 }
0x14fa   :  { %5718 = vmatpush3.msra.mxu0 %v3961_v58 }
0x14fb   :  { %5719 = vmatprep.subr.mxu0 %v3960_v59 }
0x14fc   :  { %5720 = vmatpush3.msra.mxu0 %v3960_v59 }
0x14fd   :  { %5721 = vmatprep.subr.mxu0 %v3959_v60 }
0x14fe   :  { %5722 = vmatpush3.msra.mxu0 %v3959_v60 }
0x14ff   :  { %5723 = vmatprep.subr.mxu0 %v3958_v62 }
0x1500   :  { %5724 = vmatpush3.msra.mxu0 %v3958_v62 }
0x1501   :  { %5725 = vmatprep.subr.mxu0 %v3957_v61 }
0x1502   :  { %5726 = vmatpush3.msra.mxu0 %v3957_v61 }
0x1503   :  { %5727 = vmatprep.subr.mxu0 %v3956_v0 }
0x1504   :  { %5728 = vmatpush3.msra.mxu0 %v3956_v0 }
0x1505   :  { %5729 = vmatprep.subr.mxu0 %v3955_v1 }
0x1506   :  { %5730 = vmatpush3.msra.mxu0 %v3955_v1 }
0x1507   :  { %5731 = vmatprep.subr.mxu0 %v3954_v2 }
0x1508   :  { %5732 = vmatpush3.msra.mxu0 %v3954_v2 }
0x1509   :  { %5733 = vmatprep.subr.mxu0 %v3953_v3 }
0x150a   :  { %5734 = vmatpush3.msra.mxu0 %v3953_v3 }
0x150b   :  { %5735 = vmatprep.subr.mxu0 %v3952_v4 }
0x150c   :  { %5736 = vmatpush3.msra.mxu0 %v3952_v4 }
0x150d   :  { %5737 = vmatprep.subr.mxu0 %v3951_v5 }
0x150e   :  { %5738 = vmatpush3.msra.mxu0 %v3951_v5 }
0x150f   :  { %5739 = vmatprep.subr.mxu0 %v3950_v11 }
0x1510   :  { %5740 = vmatpush3.msra.mxu0 %v3950_v11  ;;  %v4236_v11 = vld [vmem:[%s6556_s12 + $0xd0] sm:$0xff] }
0x1511   :  { %5741 = vmatprep.subr.mxu0 %v3949_v12 }
0x1512   :  { %5742 = vmatpush3.msra.mxu0 %v3949_v12  ;;  %v4235_v12 = vld [vmem:[%s6556_s12 + $0xc8] sm:$0xff] }
0x15b3   :  { %v5700_v6 = vpop.f32.mrf.mxu0 }
0x15b4   :  { %5701 = vmatprep.subr.mxu1 %v5700_v6 }
0x15b5   :  { %v3839_v7 = vpop.f32.mrf.mxu0  ;;  %5702 = vmatpush3.msra.mxu1 %v5700_v6  ;;  %v4241_v6 = vld [vmem:[%s6556_s12 + $0xf8] sm:$0xff] }
0x15b6   :  { %5703 = vmatprep.subr.mxu1 %v3839_v7  ;;  %4242 = vmatprep.subr.mxu0 %v4241_v6 }
0x15b7   :  { %5704 = vmatpush3.msra.mxu1 %v3839_v7  ;;  %v4240_v7 = vld [vmem:[%s6556_s12 + $0xf0] sm:$0xff] }
0x15b8   :  { %5706 = vmatmul.mubr.msk.f32.vlgmr.msra.gmra.mxu1 %vm394_vm0, %v3849_v8  ;;  %5749 = vmatprep.subr.mxu1 %v6354_v56  ;;  %v4239_v8 = vld [vmem:[%s6556_s12 + $0xe8] sm:$0xff] }
0x15b9   :  { %5708 = vmatprep.mubr.msk.f32.mxu1 %vm394_vm0, %v3850_v9  ;;  %5750 = vmatpush3.msra.mxu1 %v4093_v13  ;;  %v4238_v9 = vld [vmem:[%s6556_s12 + $0xe0] sm:$0xff] }
0x15ba   :  { %5751 = vmatprep.subr.mxu1 %v6354_v56  ;;  %v4234_v13 = vld [vmem:[%s6556_s12 + $0xc0] sm:$0xff] }
0x15bb   :  { %5752 = vmatpush3.msra.mxu1 %v4092_v14  ;;  %v4233_v14 = vld [vmem:[%s6556_s12 + $0xb8] sm:$0xff] }
0x15bc   :  { %5709 = vmatmul.mubr.msk.f32.gmra.mxu1 %vm394_vm0, %v3851_v10  ;;  %5753 = vmatprep.subr.mxu1 %v6354_v56  ;;  %v4237_v10 = vld [vmem:[%s6556_s12 + $0xd8] sm:$0xff] }
0x15bd   :  { %5781 = vmatprep.mubr.msk.f32.mxu1 %vm6355_vm4, %v6354_v56  ;;  %5754 = vmatpush3.msra.mxu1 %v4091_v20  ;;  %v4228_v20 = vld [vmem:[%s6556_s12 + $0x90] sm:$0xff] }
0x15be   :  { %5755 = vmatprep.subr.mxu1 %v6354_v56 }
0x15bf   :  { %5756 = vmatpush3.msra.mxu1 %v4090_v21  ;;  %v4227_v21 = vld [vmem:[%s6556_s12 + $0x88] sm:$0xff] }
0x15c0   :  { %5757 = vmatprep.subr.mxu1 %v6354_v56 }
0x15c1   :  { %5758 = vmatpush3.msra.mxu1 %v4089_v22  ;;  %v4226_v22 = vld [vmem:[%s6556_s12 + $0x80] sm:$0xff] }
0x15c2   :  { %5759 = vmatprep.subr.mxu1 %v6354_v56 }
0x15c3   :  { %5760 = vmatpush3.msra.mxu1 %v4088_v23  ;;  %v4225_v23 = vld [vmem:[%s6556_s12 + $0x78] sm:$0xff] }
0x15c4   :  { %5761 = vmatprep.subr.mxu1 %v6354_v56 }
0x15c5   :  { %5762 = vmatpush3.msra.mxu1 %v4087_v24  ;;  %v4224_v24 = vld [vmem:[%s6556_s12 + $0x70] sm:$0xff] }
0x15c6   :  { %5763 = vmatprep.subr.mxu1 %v6354_v56 }
0x15c7   :  { %5764 = vmatpush3.msra.mxu1 %v4086_v25  ;;  %v4223_v25 = vld [vmem:[%s6556_s12 + $0x68] sm:$0xff] }
0x15c8   :  { %5765 = vmatprep.subr.mxu1 %v6354_v56 }
0x15c9   :  { %5766 = vmatpush3.msra.mxu1 %v4085_v17  ;;  %v4222_v17 = vld [vmem:[%s6556_s12 + $0x60] sm:$0xff] }
0x15ca   :  { %5767 = vmatprep.subr.mxu1 %v6354_v56 }
0x15cb   :  { %5768 = vmatpush3.msra.mxu1 %v4084_v26  ;;  %v4221_v26 = vld [vmem:[%s6556_s12 + $0x58] sm:$0xff] }
0x15cc   :  { %5769 = vmatprep.subr.mxu1 %v6354_v56 }
0x15cd   :  { %5770 = vmatpush3.msra.mxu1 %v4083_v27  ;;  %v4220_v27 = vld [vmem:[%s6556_s12 + $0x50] sm:$0xff] }
0x15ce   :  { %5771 = vmatprep.subr.mxu1 %v6354_v56 }
0x15cf   :  { %5772 = vmatpush3.msra.mxu1 %v4082_v28  ;;  %v4219_v28 = vld [vmem:[%s6556_s12 + $0x48] sm:$0xff] }
0x15d0   :  { %5773 = vmatprep.subr.mxu1 %v6354_v56 }
0x15d1   :  { %5774 = vmatpush3.msra.mxu1 %v4081_v29  ;;  %v4218_v29 = vld [vmem:[%s6556_s12 + $0x40] sm:$0xff] }
0x15d2   :  { %5775 = vmatprep.subr.mxu1 %v6354_v56 }
0x15d3   :  { %5776 = vmatpush3.msra.mxu1 %v4080_v30  ;;  %v4217_v30 = vld [vmem:[%s6556_s12 + $0x38] sm:$0xff] }
0x15d4   :  { %5777 = vmatprep.subr.mxu1 %v6354_v56 }
0x15d5   :  { %5778 = vmatpush3.msra.mxu1 %v4079_v31  ;;  %v4216_v31 = vld [vmem:[%s6556_s12 + $0x30] sm:$0xff] }
0x15d6   :  { %5779 = vmatprep.subr.mxu1 %v6354_v56 }
0x15d7   :  { %5780 = vmatpush3.msra.mxu1 %v4078_v32  ;;  %v4215_v32 = vld [vmem:[%s6556_s12 + $0x28] sm:$0xff] }
0x1678   :  { %v5707_v15 = vpop.f32.mrf.mxu1 }
0x167a   :  { %v3930_v16 = vpop.f32.mrf.mxu1 }
0x167b   :  { %5743 = vmatprep.mubr.f32.mxu0 %v3930_v16  ;;  %v4231_v16 = vld [vmem:[%s6556_s12 + $0xa8] sm:$0xff] }
0x167c   :  { %v5710_v18 = vpop.f32.mrf.mxu1  ;;  %5744 = vmatmul.mubr.f32.vlgmr.msra.gmra.mxu0 %v5707_v15  ;;  %v4232_v15 = vld [vmem:[%s6556_s12 + $0xb0] sm:$0xff] }
0x167d   :  { %4243 = vmatpush1.msra.mxu0 %v4240_v7 }
0x167e   :  { %v3940_v19 = vpop.f32.mrf.mxu1  ;;  %4244 = vmatprep.subr.mxu0 %v4239_v8 }
0x167f   :  { %5746 = vmatprep.mubr.f32.mxu0 %v3940_v19  ;;  %4245 = vmatpush1.msra.mxu0 %v4238_v9  ;;  %v4229_v19 = vld [vmem:[%s6556_s12 + $0x98] sm:$0xff] }
0x1680   :  { %5747 = vmatmul.mubr.f32.gmra.mxu0 %v5710_v18  ;;  %4246 = vmatprep.subr.mxu0 %v4237_v10  ;;  %v4230_v18 = vld [vmem:[%s6556_s12 + $0xa0] sm:$0xff] }
0x1681   :  { %4306 = vmatprep.mubr.f32.mxu0 %v6354_v56  ;;  %4247 = vmatpush1.msra.mxu0 %v4236_v11 }
0x1682   :  { %4248 = vmatprep.subr.mxu0 %v4235_v12 }
0x1683   :  { %4249 = vmatpush1.msra.mxu0 %v4234_v13 }
0x1684   :  { %4250 = vmatprep.subr.mxu0 %v4233_v14 }
0x1685   :  { %4251 = vmatpush1.msra.mxu0 %v4232_v15 }
0x1686   :  { %4252 = vmatprep.subr.mxu0 %v4231_v16  ;;  %v4331_v16 = vld [vmem:[%s6551_s30] sm:$0xff] }
0x1687   :  { %4253 = vmatpush1.msra.mxu0 %v4230_v18 }
0x1688   :  { %4254 = vmatprep.subr.mxu0 %v4229_v19 }
0x1689   :  { %4255 = vmatpush1.msra.mxu0 %v4228_v20 }
0x168a   :  { %4256 = vmatprep.subr.mxu0 %v4227_v21 }
0x168b   :  { %4257 = vmatpush1.msra.mxu0 %v4226_v22  ;;  %v4332_v22 = vld [vmem:[%s6551_s30 + $0x8] sm:$0xff] }
0x168c   :  { %4258 = vmatprep.subr.mxu0 %v4225_v23 }
0x168d   :  { %4259 = vmatpush1.msra.mxu0 %v4224_v24 }
0x168e   :  { %4260 = vmatprep.subr.mxu0 %v4223_v25 }
0x168f   :  { %4261 = vmatpush1.msra.mxu0 %v4222_v17 }
0x1690   :  { %4262 = vmatprep.subr.mxu0 %v4221_v26  ;;  %v4333_v26 = vld [vmem:[%s6551_s30 + $0x10] sm:$0xff] }
0x1691   :  { %4263 = vmatpush1.msra.mxu0 %v4220_v27 }
0x1692   :  { %4264 = vmatprep.subr.mxu0 %v4219_v28 }
0x1693   :  { %4265 = vmatpush1.msra.mxu0 %v4218_v29 }
0x1694   :  { %4266 = vmatprep.subr.mxu0 %v4217_v30 }
0x1695   :  { %4267 = vmatpush1.msra.mxu0 %v4216_v31  ;;  %v4334_v31 = vld [vmem:[%s6551_s30 + $0x18] sm:$0xff] }
0x1696   :  { %4268 = vmatprep.subr.mxu0 %v4215_v32 }
0x173c   :  { %v5745_v35 = vpop.f32.mrf.mxu0 }
0x173d   :  { %v7159_v37 = vadd.f32 %v5745_v35, %v3969_v34  ;;  %v4213_v35 = vld [vmem:[%s6556_s12 + $0x18] sm:$0xff] }
0x173e   :  { %v4036_v36 = vpop.f32.mrf.mxu0 }
0x173f   :  { %v7161_v38 = vadd.f32 %v4036_v36, %v3969_v34  ;;  %v4065_v43 = vmul.f32 %v7159_v37, %v7159_v37  ;;  %v4212_v36 = vld [vmem:[%s6556_s12 + $0x10] sm:$0xff] }
0x1740   :  { %v5748_v39 = vpop.f32.mrf.mxu0 }
0x1741   :  { %v4064_v40 = vmul.f32 %v7161_v38, %v7161_v38  ;;  %v4055_v45 = vadd.f32 %v7159_v37, %v7161_v38  ;;  %v7169_v46 = vadd.f32 %v5748_v39, %v3969_v34  ;;  %v4211_v39 = vld [vmem:[%s6556_s12 + $0x8] sm:$0xff] }
0x1742   :  { %v4046_v41 = vpop.f32.mrf.mxu0 }
0x1743   :  { %v7171_v47 = vadd.f32 %v4046_v41, %v3969_v34  ;;  %v4068_v48 = vadd.f32 %v4065_v43, %v4064_v40  ;;  %v4067_v49 = vmul.f32 %v7169_v46, %v7169_v46  ;;  %v4214_v34 = vld [vmem:[%s6556_s12 + $0x20] sm:$0xff] }
0x1744   :  { %4269 = vmatpush1.msra.mxu0 %v4214_v34  ;;  %v4210_v40 = vld [vmem:[%s6556_s12] sm:$0xff]  ;;  %s7348_s12 = sld [smem:[#allocation57_spill]] }
0x1745   :  { %v4056_v50 = vadd.f32 %v4055_v45, %v7171_v47  ;;  %v4066_v51 = vmul.f32 %v7171_v47, %v7171_v47  ;;  %4270 = vmatprep.subr.mxu0 %v4213_v35 }
0x1746   :  { %4271 = vmatpush1.msra.mxu0 %v4212_v36 }
0x1747   :  { %v4057_v52 = vadd.f32 %v4056_v50, %v7169_v46  ;;  %v4069_v53 = vadd.f32 %v4068_v48, %v4066_v51  ;;  %4272 = vmatprep.subr.mxu0 %v4211_v39  ;;  %v4335_v39 = vld [vmem:[%s6551_s30 + $0x20] sm:$0xff] }
0x1748   :  { %4273 = vmatpush1.msra.mxu0 %v4210_v40 }
0x1749   :  { %v4058_v54 = vrot.slane %v4057_v52, 4  ;;  %v4070_v55 = vadd.f32 %v4069_v53, %v4067_v49 }
0x174a   :  { %v4507_v18 = vld [vmem:[%s7348_s12 + $0xf8] sm:$0xff]  ;;  %v4506_v20 = vld [vmem:[%s7348_s12 + $0xf0] sm:$0xff]  ;;  %v4505_v23 = vld [vmem:[%s7348_s12 + $0xe8] sm:$0xff] }
0x174b   :  { %v4059_v57 = vadd.f32 %v4058_v54, %v4057_v52  ;;  %v4071_v58 = vrot.slane %v4070_v55, 4  ;;  %v4491_v19 = vld [vmem:[%s7348_s12 + $0x78] sm:$0xff]  ;;  %v4490_v21 = vld [vmem:[%s7348_s12 + $0x70] sm:$0xff]  ;;  %v4489_v24 = vld [vmem:[%s7348_s12 + $0x68] sm:$0xff] }
0x174c   :  { %v4504_v25 = vld [vmem:[%s7348_s12 + $0xe0] sm:$0xff]  ;;  %v4503_v27 = vld [vmem:[%s7348_s12 + $0xd8] sm:$0xff]  ;;  %v4502_v29 = vld [vmem:[%s7348_s12 + $0xd0] sm:$0xff] }
0x174d   :  { %v4060_v59 = vrot.slane %v4059_v57, 2  ;;  %v4072_v60 = vadd.f32 %v4071_v58, %v4070_v55  ;;  %v4488_v17 = vld [vmem:[%s7348_s12 + $0x60] sm:$0xff]  ;;  %v4487_v28 = vld [vmem:[%s7348_s12 + $0x58] sm:$0xff]  ;;  %v4486_v30 = vld [vmem:[%s7348_s12 + $0x50] sm:$0xff] }
0x174e   :  { %v4501_v32 = vld [vmem:[%s7348_s12 + $0xc8] sm:$0xff]  ;;  %v4500_v35 = vld [vmem:[%s7348_s12 + $0xc0] sm:$0xff]  ;;  %v4499_v40 = vld [vmem:[%s7348_s12 + $0xb8] sm:$0xff] }
0x174f   :  { %v4061_v62 = vadd.f32 %v4060_v59, %v4059_v57  ;;  %v4073_v61 = vrot.slane %v4072_v60, 2  ;;  %v4193_v57 = vrot.slane %v7155_v33, %v6663_v42  ;;  %v4485_v34 = vld [vmem:[%s7348_s12 + $0x48] sm:$0xff]  ;;  %v4484_v36 = vld [vmem:[%s7348_s12 + $0x40] sm:$0xff] }
0x1751   :  { %v4062_v0 = vrot.slane %v4061_v62, 1  ;;  %v4074_v1 = vadd.f32 %v4073_v61, %v4072_v60 }
0x1753   :  { %v4075_v2 = vrot.slane %v4074_v1, 1  ;;  %v4063_v3 = vadd.f32 %v4062_v0, %v4061_v62 }
0x1755   :  { %v4076_v4 = vadd.f32 %v4075_v2, %v4074_v1 }
0x1757   :  { %v4077_v5 = vsel %vm399_vm2, %v4063_v3, %v4076_v4 }
0x1758   :  { %5782 = vmatmul.mubr.f32.vlgmr.msra.gmra.mxu1 %v4077_v5 }
0x1759   :  { %4427 = vmatprep.mubr.f32.mxu1 %v6354_v56 }
0x1818   :  { %v4160_v41 = vpop.f32.mrf.mxu1 }
0x1819   :  { %v4164_v43 = vmul.f32 0.00048828125, %v4160_v41  ;;  %v4483_v41 = vld [vmem:[%s7348_s12 + $0x38] sm:$0xff] }
0x181a   :  { %v5783_v45 = vpop.f32.mrf.mxu1 }
0x181b   :  { %v4165_v48 = vmul.f32 %v4164_v43, %v4164_v43  ;;  %v4174_v53 = vrot.slane %v4164_v43, %v6651_v63  ;;  %v4482_v45 = vld [vmem:[%s7348_s12 + $0x30] sm:$0xff] }
0x181d   :  { %v4167_v50 = vrot.slane %v4165_v48, 7  ;;  %v4175_v58 = vsub.f32 %v7161_v38, %v4174_v53  ;;  %v4176_v60 = vsub.f32 %v7159_v37, %v4174_v53  ;;  %v4177_v0 = vsub.f32 %v7171_v47, %v4174_v53  ;;  %v4336_v48 = vld [vmem:[%s6551_s30 + $0x28] sm:$0xff] }
0x181e   :  { %v4178_v4 = vsub.f32 %v7169_v46, %v4174_v53  ;;  %v4337_v53 = vld [vmem:[%s6551_s30 + $0x30] sm:$0xff] }
0x181f   :  { %v4169_v51 = vsub.f32 %v4164_v43, %v4167_v50  ;;  %v4498_v43 = vld [vmem:[%s7348_s12 + $0xb0] sm:$0xff]  ;;  %v4497_v50 = vld [vmem:[%s7348_s12 + $0xa8] sm:$0xff] }
0x1821   :  { %v4170_v49 = vmax.f32 %v4169_v51, 0.0  ;;  %v4481_v51 = vld [vmem:[%s7348_s12 + $0x28] sm:$0xff] }
0x1823   :  { %v4179_v52 = vadd.f32 1e-05, %v4170_v49  ;;  %v4496_v49 = vld [vmem:[%s7348_s12 + $0xa0] sm:$0xff] }
0x1825   :  { %5858 = vrsqrt.f32 %v4179_v52  ;;  %v4480_v52 = vld [vmem:[%s7348_s12 + $0x20] sm:$0xff] }
0x1832   :  { %v5859_v54 = vpop.eup %5858 }
0x1833   :  { %v4181_v55 = vmul.f32 %v5859_v54, %v7155_v33  ;;  %v4495_v54 = vld [vmem:[%s7348_s12 + $0x98] sm:$0xff] }
0x1835   :  { %v4185_v59 = vrot.slane %v4181_v55, %v6667_v44  ;;  %v4479_v55 = vld [vmem:[%s7348_s12 + $0x18] sm:$0xff] }
0x1837   :  { %v4186_v62 = vmul.f32 %v4185_v59, %v4175_v58  ;;  %v4187_v61 = vmul.f32 %v4185_v59, %v4176_v60  ;;  %v4188_v3 = vmul.f32 %v4185_v59, %v4177_v0  ;;  %v4189_v33 = vmul.f32 %v4185_v59, %v4178_v4  ;;  %v4478_v58 = vld [vmem:[%s7348_s12 + $0x10] sm:$0xff]  ;;  %v4338_v59 = vld [vmem:[%s6551_s30 + $0x38] sm:$0xff]  ;;  %v4493_v60 = vld [vmem:[%s7348_s12 + $0x88] sm:$0xff]  ;;  %s6357_s30 = smov [#allocation31]  }
0x1838   :  { %v4476_v0 = vld [vmem:[%s7348_s12] sm:$0xff]  ;;  %s4681_s13 = sshll.u32 %s6357_s30, 4  ;;  %s4682_s13 = int_to_ptr.vmem [resolvable:$true] %s4681_s13 }
0x1839   :  { %v4194_v1 = vadd.f32 %v4193_v57, %v4186_v62  ;;  %v4195_v2 = vadd.f32 %v4193_v57, %v4187_v61  ;;  %v4196_v42 = vadd.f32 %v4193_v57, %v4188_v3  ;;  %v4197_v38 = vadd.f32 %v4193_v57, %v4189_v33  ;;  %v4494_v57 = vld [vmem:[%s7348_s12 + $0x90] sm:$0xff]  ;;  %v4477_v62 = vld [vmem:[%s7348_s12 + $0x8] sm:$0xff]  ;;  %v4492_v61 = vld [vmem:[%s7348_s12 + $0x80] sm:$0xff]  ;;  %s6252_s19 = scalar_lea.vmem %s4682_s13, 1024  ;;  %p6257_p7 = scmp.lt.s32.totalorder %s4682_s13, %s4682_s13 }
0x183a   :  { %p6253_p6 = scmp.ne.s32.totalorder %s4682_s13, %s6252_s19  ;;  %p6258_p8 = scmp.lt.s32.totalorder %s6252_s19, %s6252_s19 }
0x183b   :  { %vm4198_vm0 = vcmp.ge.f32.partialorder %v4194_v1, 0.0  ;;  %v4202_v63 = vmul.f32 0.1, %v4194_v1  ;;  %v4203_v6 = vmul.f32 0.1, %v4195_v2  ;;  %vm4199_vm2 = vcmp.ge.f32.partialorder %v4195_v2, 0.0 }
0x183c   :  { %v4204_v37 = vmul.f32 0.1, %v4196_v42  ;;  %vm4200_vm4 = vcmp.ge.f32.partialorder %v4196_v42, 0.0  ;;  %v4205_v7 = vmul.f32 0.1, %v4197_v38  ;;  %vm4201_vm13 = vcmp.ge.f32.partialorder %v4197_v38, 0.0  ;;  %p6259_p9 = por %p6258_p8, %p6257_p7 }
0x183d   :  { %v4206_v5 = vsel %vm4198_vm0, %v4194_v1, %v4202_v63  ;;  %v4207_v44 = vsel %vm4199_vm2, %v4195_v2, %v4203_v6 }
0x183e   :  { %4307 = vmatmul.mubr.f32.vlgmr.msra.gmra.mxu0 %v4206_v5  ;;  %v4208_v47 = vsel %vm4200_vm4, %v4196_v42, %v4204_v37  ;;  %v4209_v46 = vsel %vm4201_vm13, %v4197_v38, %v4205_v7  ;;  %p6260_p10 = pnand %p6259_p9, %p6253_p6 }
0x183f   :  { %4312 = vmatprep.mubr.f32.mxu0 %v6354_v56 }
0x1842   :  { %4313 = vmatmul.mubr.f32.gmra.mxu0 %v4207_v44 }
0x1843   :  { %4318 = vmatprep.mubr.f32.mxu0 %v6354_v56 }
0x1846   :  { %4319 = vmatmul.mubr.f32.gmra.mxu0 %v4208_v47 }
0x1847   :  { %4324 = vmatprep.mubr.f32.mxu0 %v6354_v56 }
0x184a   :  { %4325 = vmatmul.mubr.f32.gmra.mxu0 %v4209_v46 }
0x18fe   :  { %v4308_v8 = vpop.f32.mrf.mxu0 }
0x1900   :  { %v4310_v9 = vpop.f32.mrf.mxu0 }
0x1902   :  { %v4314_v10 = vpop.f32.mrf.mxu0 }
0x1904   :  { %v4316_v11 = vpop.f32.mrf.mxu0 }
0x1906   :  { %v4320_v12 = vpop.f32.mrf.mxu0 }
0x1908   :  { %v4322_v13 = vpop.f32.mrf.mxu0 }
0x190a   :  { %v4326_v14 = vpop.f32.mrf.mxu0 }
0x190c   :  { %v4328_v15 = vpop.f32.mrf.mxu0 }
0x190d   :  { %4387 = vmatprep.subr.mxu1 %v4328_v15 }
0x190e   :  { %4388 = vmatpush1.msra.mxu1 %v4326_v14 }
0x190f   :  { %4389 = vmatprep.subr.mxu1 %v4322_v13 }
0x1910   :  { %4390 = vmatpush1.msra.mxu1 %v4320_v12 }
0x1911   :  { %4391 = vmatprep.subr.mxu1 %v4316_v11 }
0x1912   :  { %4392 = vmatpush1.msra.mxu1 %v4314_v10 }
0x1913   :  { %4393 = vmatprep.subr.mxu1 %v4310_v9  ;;  %v4885_v9 = vld [vmem:[#allocation29] ss:$0 sm:$0xff] }
0x1914   :  { %4394 = vmatpush1.msra.mxu1 %v4308_v8 }
0x1915   :  { %4877 = vmatmul.mubr.msk.f32.vlgmr.msra.gmra.mxu1 %vm420_vm1, %v4331_v16  ;;  %5164 = vmatprep.subr.mxu1 %v4507_v18 }
0x1916   :  { %4433 = vmatprep.mubr.f32.mxu1 %v6354_v56  ;;  %5165 = vmatpush3.msra.mxu1 %v4491_v19 }
0x1917   :  { %5166 = vmatprep.subr.mxu1 %v4506_v20 }
0x1918   :  { %5167 = vmatpush3.msra.mxu1 %v4490_v21 }
0x1919   :  { %4878 = vmatmul.mubr.msk.f32.gmra.mxu1 %vm420_vm1, %v4332_v22  ;;  %5168 = vmatprep.subr.mxu1 %v4505_v23 }
0x191a   :  { %4439 = vmatprep.mubr.f32.mxu1 %v6354_v56  ;;  %5169 = vmatpush3.msra.mxu1 %v4489_v24 }
0x191b   :  { %5170 = vmatprep.subr.mxu1 %v4504_v25 }
0x191c   :  { %5171 = vmatpush3.msra.mxu1 %v4488_v17 }
0x191d   :  { %4879 = vmatmul.mubr.msk.f32.gmra.mxu1 %vm420_vm1, %v4333_v26  ;;  %5172 = vmatprep.subr.mxu1 %v4503_v27 }
0x191e   :  { %4445 = vmatprep.mubr.f32.mxu1 %v6354_v56  ;;  %5173 = vmatpush3.msra.mxu1 %v4487_v28 }
0x191f   :  { %5174 = vmatprep.subr.mxu1 %v4502_v29 }
0x1920   :  { %5175 = vmatpush3.msra.mxu1 %v4486_v30 }
0x1921   :  { %4880 = vmatmul.mubr.msk.f32.gmra.mxu1 %vm420_vm1, %v4334_v31  ;;  %5176 = vmatprep.subr.mxu1 %v4501_v32 }
0x1922   :  { %4451 = vmatprep.mubr.f32.mxu1 %v6354_v56  ;;  %5177 = vmatpush3.msra.mxu1 %v4485_v34 }
0x1923   :  { %5178 = vmatprep.subr.mxu1 %v4500_v35 }
0x1924   :  { %5179 = vmatpush3.msra.mxu1 %v4484_v36 }
0x1925   :  { %4881 = vmatmul.mubr.msk.f32.gmra.mxu1 %vm420_vm1, %v4335_v39  ;;  %5180 = vmatprep.subr.mxu1 %v4499_v40 }
0x1926   :  { %4457 = vmatprep.mubr.f32.mxu1 %v6354_v56  ;;  %5181 = vmatpush3.msra.mxu1 %v4483_v41 }
0x1927   :  { %5182 = vmatprep.subr.mxu1 %v4498_v43 }
0x1928   :  { %5183 = vmatpush3.msra.mxu1 %v4482_v45 }
0x1929   :  { %4882 = vmatmul.mubr.msk.f32.gmra.mxu1 %vm420_vm1, %v4336_v48  ;;  %5184 = vmatprep.subr.mxu1 %v4497_v50 }
0x192a   :  { %4463 = vmatprep.mubr.f32.mxu1 %v6354_v56  ;;  %5185 = vmatpush3.msra.mxu1 %v4481_v51 }
0x192b   :  { %5186 = vmatprep.subr.mxu1 %v4496_v49 }
0x192c   :  { %5187 = vmatpush3.msra.mxu1 %v4480_v52 }
0x192d   :  { %4883 = vmatmul.mubr.msk.f32.gmra.mxu1 %vm420_vm1, %v4337_v53  ;;  %5188 = vmatprep.subr.mxu1 %v4495_v54 }
0x192e   :  { %4469 = vmatprep.mubr.f32.mxu1 %v6354_v56  ;;  %5189 = vmatpush3.msra.mxu1 %v4479_v55 }
0x192f   :  { %5190 = vmatprep.subr.mxu1 %v4494_v57 }
0x1930   :  { %5191 = vmatpush3.msra.mxu1 %v4478_v58 }
0x1931   :  { %4884 = vmatmul.mubr.msk.f32.gmra.mxu1 %vm420_vm1, %v4338_v59  ;;  %5192 = vmatprep.subr.mxu1 %v4493_v60 }
0x1932   :  { %5193 = vmatpush3.msra.mxu1 %v4477_v62 }
0x1933   :  { %5194 = vmatprep.subr.mxu1 %v4492_v61 }
0x1934   :  { %5195 = vmatpush3.msra.mxu1 %v4476_v0 }
0x19d5   :  { %v4429_v1 = vpop.f32.mrf.mxu1 }
0x19d7   :  { %v4431_v2 = vpop.f32.mrf.mxu1 }
0x19d8   :  { %4579 = vmatprep.mubr.f32.mxu1 %v4431_v2 }
0x19d9   :  { %v4435_v3 = vpop.f32.mrf.mxu1  ;;  %4580 = vmatmul.mubr.f32.vlgmr.msra.gmra.mxu1 %v4429_v1 }
0x19db   :  { %v4437_v56 = vpop.f32.mrf.mxu1 }
0x19dc   :  { %4584 = vmatprep.mubr.f32.mxu1 %v4437_v56 }
0x19dd   :  { %v4441_v63 = vpop.f32.mrf.mxu1  ;;  %4585 = vmatmul.mubr.f32.gmra.mxu1 %v4435_v3 }
0x19df   :  { %v4443_v4 = vpop.f32.mrf.mxu1 }
0x19e0   :  { %4589 = vmatprep.mubr.f32.mxu1 %v4443_v4 }
0x19e1   :  { %v4447_v5 = vpop.f32.mrf.mxu1  ;;  %4590 = vmatmul.mubr.f32.gmra.mxu1 %v4441_v63 }
0x19e3   :  { %v4449_v6 = vpop.f32.mrf.mxu1 }
0x19e4   :  { %4594 = vmatprep.mubr.f32.mxu1 %v4449_v6 }
0x19e5   :  { %v4453_v42 = vpop.f32.mrf.mxu1  ;;  %4595 = vmatmul.mubr.f32.gmra.mxu1 %v4447_v5 }
0x19e7   :  { %v4455_v33 = vpop.f32.mrf.mxu1 }
0x19e8   :  { %4599 = vmatprep.mubr.f32.mxu1 %v4455_v33 }
0x19e9   :  { %v4459_v44 = vpop.f32.mrf.mxu1  ;;  %4600 = vmatmul.mubr.f32.gmra.mxu1 %v4453_v42 }
0x19eb   :  { %v4461_v37 = vpop.f32.mrf.mxu1 }
0x19ec   :  { %4604 = vmatprep.mubr.f32.mxu1 %v4461_v37 }
0x19ed   :  { %v4465_v38 = vpop.f32.mrf.mxu1  ;;  %4605 = vmatmul.mubr.f32.gmra.mxu1 %v4459_v44 }
0x19ef   :  { %v4467_v47 = vpop.f32.mrf.mxu1 }
0x19f0   :  { %4609 = vmatprep.mubr.f32.mxu1 %v4467_v47 }
0x19f1   :  { %v4471_v7 = vpop.f32.mrf.mxu1  ;;  %4610 = vmatmul.mubr.f32.gmra.mxu1 %v4465_v38 }
0x19f3   :  { %v4473_v46 = vpop.f32.mrf.mxu1 }
0x19f4   :  { %4614 = vmatprep.mubr.f32.mxu1 %v4473_v46 }
0x19f5   :  { %4615 = vmatmul.mubr.f32.gmra.mxu1 %v4471_v7 }
0x1a99   :  { %v5196_v8 = vpop.f32.mrf.mxu1 }
0x1a9b   :  { %v5197_v10 = vpop.f32.mrf.mxu1 }
0x1a9c   :  { %v5198_v11 = vadd.f32 %v5197_v10, %v5196_v8 }
0x1a9d   :  { %v5199_v12 = vpop.f32.mrf.mxu1 }
0x1a9e   :  { %v4582_v13 = vadd.f32 %v5198_v11, %v4885_v9 }
0x1a9f   :  { %v5200_v14 = vpop.f32.mrf.mxu1 }
0x1aa0   :  { %v4620_v15 = vsub.f32 0.0, %v4582_v13  ;;  %v5201_v16 = vadd.f32 %v5200_v14, %v5199_v12 }
0x1aa1   :  { %v5202_v18 = vpop.f32.mrf.mxu1 }
0x1aa2   :  { %v4628_v19 = vmul.f32 1.442695, %v4620_v15  ;;  %v4587_v20 = vadd.f32 %v5201_v16, %v4885_v9 }
0x1aa3   :  { %v5203_v21 = vpop.f32.mrf.mxu1 }
0x1aa4   :  { %5860 = vpow2.f32 %v4628_v19  ;;  %v4621_v22 = vsub.f32 0.0, %v4587_v20  ;;  %v5204_v23 = vadd.f32 %v5203_v21, %v5202_v18 }
0x1aa5   :  { %v5205_v24 = vpop.f32.mrf.mxu1 }
0x1aa6   :  { %v4630_v25 = vmul.f32 1.442695, %v4621_v22  ;;  %v4592_v17 = vadd.f32 %v5204_v23, %v4885_v9 }
0x1aa7   :  { %v5206_v26 = vpop.f32.mrf.mxu1 }
0x1aa8   :  { %5862 = vpow2.f32 %v4630_v25  ;;  %v4622_v27 = vsub.f32 0.0, %v4592_v17  ;;  %v5207_v28 = vadd.f32 %v5206_v26, %v5205_v24 }
0x1aa9   :  { %v5208_v29 = vpop.f32.mrf.mxu1 }
0x1aaa   :  { %v4632_v30 = vmul.f32 1.442695, %v4622_v27  ;;  %v4597_v31 = vadd.f32 %v5207_v28, %v4885_v9 }
0x1aab   :  { %v5209_v32 = vpop.f32.mrf.mxu1 }
0x1aac   :  { %5864 = vpow2.f32 %v4632_v30  ;;  %v4623_v34 = vsub.f32 0.0, %v4597_v31  ;;  %v5210_v35 = vadd.f32 %v5209_v32, %v5208_v29 }
0x1aad   :  { %v5211_v36 = vpop.f32.mrf.mxu1 }
0x1aae   :  { %v4634_v39 = vmul.f32 1.442695, %v4623_v34  ;;  %v4602_v40 = vadd.f32 %v5210_v35, %v4885_v9 }
0x1aaf   :  { %v5212_v41 = vpop.f32.mrf.mxu1 }
0x1ab0   :  { %5866 = vpow2.f32 %v4634_v39  ;;  %v4624_v43 = vsub.f32 0.0, %v4602_v40  ;;  %v5213_v45 = vadd.f32 %v5212_v41, %v5211_v36 }
0x1ab1   :  { %v5861_v48 = vpop.eup %5860  ;;  %v5214_v50 = vpop.f32.mrf.mxu1 }
0x1ab2   :  { %v4644_v51 = vadd.f32 1.0, %v5861_v48  ;;  %v4636_v49 = vmul.f32 1.442695, %v4624_v43  ;;  %v4607_v52 = vadd.f32 %v5213_v45, %v4885_v9 }
0x1ab3   :  { %v5215_v53 = vpop.f32.mrf.mxu1 }
0x1ab4   :  { %5868 = vrcp.f32 %v4644_v51  ;;  %v4625_v54 = vsub.f32 0.0, %v4607_v52  ;;  %v5216_v55 = vadd.f32 %v5215_v53, %v5214_v50 }
0x1ab5   :  { %v5863_v57 = vpop.eup %5862  ;;  %5870 = vpow2.f32 %v4636_v49  ;;  %v5217_v58 = vpop.f32.mrf.mxu1 }
0x1ab6   :  { %v4645_v59 = vadd.f32 1.0, %v5863_v57  ;;  %v4638_v60 = vmul.f32 1.442695, %v4625_v54  ;;  %v4612_v62 = vadd.f32 %v5216_v55, %v4885_v9 }
0x1ab7   :  { %v5218_v61 = vpop.f32.mrf.mxu1 }
0x1ab8   :  { %5872 = vrcp.f32 %v4645_v59  ;;  %v4626_v0 = vsub.f32 0.0, %v4612_v62  ;;  %v5219_v1 = vadd.f32 %v5218_v61, %v5217_v58 }
0x1ab9   :  { %v5865_v2 = vpop.eup %5864  ;;  %5874 = vpow2.f32 %v4638_v60 }
0x1aba   :  { %v4646_v3 = vadd.f32 1.0, %v5865_v2  ;;  %v4640_v56 = vmul.f32 1.442695, %v4626_v0  ;;  %v4617_v63 = vadd.f32 %v5219_v1, %v4885_v9 }
0x1abc   :  { %5876 = vrcp.f32 %v4646_v3  ;;  %v4627_v4 = vsub.f32 0.0, %v4617_v63 }
0x1abd   :  { %v5867_v5 = vpop.eup %5866  ;;  %5878 = vpow2.f32 %v4640_v56 }
0x1abe   :  { %v4647_v6 = vadd.f32 1.0, %v5867_v5  ;;  %v4642_v42 = vmul.f32 1.442695, %v4627_v4 }
0x1ac0   :  { %5880 = vrcp.f32 %v4647_v6 }
0x1ac1   :  { %v5869_v33 = vpop.eup %5868  ;;  %5882 = vpow2.f32 %v4642_v42 }
0x1ac2   :  { %v5871_v44 = vpop.eup %5870  ;;  %4668 = vst [vmem:[#allocation31] sm:$0xff] %v5869_v33 }
0x1ac3   :  { %v4648_v37 = vadd.f32 1.0, %v5871_v44 }
0x1ac5   :  { %v5873_v38 = vpop.eup %5872  ;;  %5884 = vrcp.f32 %v4648_v37 }
0x1ac6   :  { %v5875_v47 = vpop.eup %5874  ;;  %4669 = vst [vmem:[#allocation31 + $0x8] sm:$0xff] %v5873_v38 }
0x1ac7   :  { %v4649_v7 = vadd.f32 1.0, %v5875_v47 }
0x1ac9   :  { %v5877_v46 = vpop.eup %5876  ;;  %5886 = vrcp.f32 %v4649_v7 }
0x1aca   :  { %v5879_v8 = vpop.eup %5878  ;;  %4670 = vst [vmem:[#allocation31 + $0x10] sm:$0xff] %v5877_v46 }
0x1acb   :  { %v4650_v9 = vadd.f32 1.0, %v5879_v8 }
0x1acd   :  { %v5881_v10 = vpop.eup %5880  ;;  %5888 = vrcp.f32 %v4650_v9 }
0x1ace   :  { %v5883_v11 = vpop.eup %5882  ;;  %4671 = vst [vmem:[#allocation31 + $0x18] sm:$0xff] %v5881_v10 }
0x1acf   :  { %v4651_v12 = vadd.f32 1.0, %v5883_v11 }
0x1ad1   :  { %5890 = vrcp.f32 %v4651_v12 }
0x1ad2   :  { %v5885_v13 = vpop.eup %5884 }
0x1ad3   :  { %4672 = vst [vmem:[#allocation31 + $0x20] sm:$0xff] %v5885_v13 }
0x1ad6   :  { %v5887_v14 = vpop.eup %5886 }
0x1ad7   :  { %4673 = vst [vmem:[#allocation31 + $0x28] sm:$0xff] %v5887_v14 }
0x1ada   :  { %v5889_v15 = vpop.eup %5888 }
0x1adb   :  { %4674 = vst [vmem:[#allocation31 + $0x30] sm:$0xff] %v5889_v15 }
0x1ade   :  { %v5891_v16 = vpop.eup %5890 }
0x1adf   :  { %4675 = vst [vmem:[#allocation31 + $0x38] sm:$0xff] %v5891_v16 }
0x1ae0   :  { %6263 = shalt.err (!%p6260_p10)
}
0x1ae1   :  { %4687 = dma.vmem_to_hbm [thread:$0]  %s4682_s13, 1024, %s6561_s17, [#allocation4], %s6339_s8, %s6339_s8, %s6340_s28  }
0x1ae2   :  { %6292 = dma.done.wait [#allocation4], 1024  }
0x1ae3   :  { %6293 = vsyncadd [#allocation4], 4294966272 }
0x1ae4   :  { %4691 = vsyncpa [#allocation3], 1 }
0x1ae5   :  { %4692 = vsyncpa [#allocation6], 1 }
0x1ae6   :  { %4693 = vsyncpa [#allocation9], 1 }
0x1ae7   :  { %4694 = vsyncpa [#allocation12], 1 }
0x1ae8   :  { %4695 = vsyncpa [#allocation15], 1 }
0x1ae9   :  { %4696 = vsyncpa [#allocation18], 1 }
0x1aea   :  { %4697 = vsyncpa [#allocation21], 1 }
0x1aeb   :  { %4698 = vsyncpa [#allocation24], 1 }
0x1aec   :  { %4699 = vsyncpa [#allocation27], 1 }
0x1aed   :  { %4700 = vsyncpa [#allocation30], 1 }
0x1aee   :  { %4701 = vsyncpa [#allocation4], 1 }

</bundles_post_ra>
